<compile_context>
chip_gen: v7x
topology: tpu7x:2x2x1
jax: 0.10.0
libtpu: 0.0.40
codegen_flags: <defaults>
</compile_context>

<pallas_src>
import functools
import math

import jax
import jax.numpy as jnp
from jax import lax
from jax.experimental import pallas as pl
from jax.experimental.pallas import tpu as pltpu

# ----------------------------- model config ---------------------------------
NUM_LAYERS = 2
VOCAB_SIZE = 64
VOCAB_PAD = 128          # pad decoder output to a full 128-lane width (lane-dense store)
D_MODEL = 32
NHEAD = 4
HEAD_DIM = D_MODEL // NHEAD
DIM_FF = 2048            # hard-coded in the PyTorch module
MAX_LEN = 64
SEQ = 8
BATCH = 2
LN_EPS = 1e-5
EMB_SCALE = math.sqrt(D_MODEL)


# ------------------------------ fused kernel --------------------------------
def _fused_forward_kernel(
    x_ref, pe_ref,
    wqkv_ref, bqkv_ref, wo_ref, bo_ref,
    w1_ref, b1_ref, w2_ref, b2_ref,
    ln1_g_ref, ln1_b_ref, ln2_g_ref, ln2_b_ref,
    dec_w_ref, dec_b_ref,
    out_ref,
    *, seq, batch, nhead, num_layers,
):
    d_model = x_ref.shape[1]
    head_dim = d_model // nhead
    att_scale = 1.0 / math.sqrt(head_dim)

    def linear(x, w, b, relu=False):
        # bf16 MXU feed, f32 accumulate; bias / activation in f32 on the VPU.
        y = jnp.dot(x.astype(jnp.bfloat16), w.astype(jnp.bfloat16),
                    preferred_element_type=jnp.float32) + b
        if relu:
            y = jnp.maximum(y, 0.0)
        return y

    def layernorm(x, g, b):
        mean = jnp.mean(x, axis=-1, keepdims=True)
        xc = x - mean
        var = jnp.mean(xc * xc, axis=-1, keepdims=True)
        return xc * lax.rsqrt(var + LN_EPS) * g + b

    # embedding * sqrt(d_model) + positional encoding (pre-broadcast, batch-major rows)
    x = x_ref[...] * EMB_SCALE + pe_ref[...]                          # (B*S, D) f32

    for li in range(num_layers):                                      # static unroll
        # ---- fused QKV projection: one (D, 3D) matmul ----
        qkv = linear(x, wqkv_ref[li], bqkv_ref[li])                   # (B*S, 3D) f32

        # ---- per-(batch, head) scaled-dot-product attention, all in VMEM ----
        batch_rows = []
        for b in range(batch):
            r0 = b * seq
            head_outs = []
            for h in range(nhead):
                c0 = h * head_dim
                q = qkv[r0:r0 + seq, c0:c0 + head_dim]                              # (S, hd)
                k = qkv[r0:r0 + seq, d_model + c0:d_model + c0 + head_dim]          # (S, hd)
                v = qkv[r0:r0 + seq, 2 * d_model + c0:2 * d_model + c0 + head_dim]  # (S, hd)
                # q @ k^T without an explicit transpose (contract last dims)
                s = lax.dot_general(q, k, (((1,), (1,)), ((), ())),
                                    preferred_element_type=jnp.float32) * att_scale
                m = jnp.max(s, axis=-1, keepdims=True)
                p = jnp.exp(s - m)
                denom = jnp.sum(p, axis=-1, keepdims=True)
                attn = p * pl.reciprocal(denom, approx=True)
                head_outs.append(jnp.dot(attn, v, preferred_element_type=jnp.float32))
            batch_rows.append(jnp.concatenate(head_outs, axis=-1))    # (S, D)
        attn_out = jnp.concatenate(batch_rows, axis=0)                # (B*S, D)

        # ---- output projection + post-norm residual 1 ----
        x = layernorm(x + linear(attn_out, wo_ref[li], bo_ref[li]),
                      ln1_g_ref[li], ln1_b_ref[li])

        # ---- fused FFN: FF1 + ReLU + FF2, hidden stays in VMEM ----
        h_mid = linear(x, w1_ref[li], b1_ref[li], relu=True)          # (B*S, DIM_FF)
        x = layernorm(x + linear(h_mid, w2_ref[li], b2_ref[li]),
                      ln2_g_ref[li], ln2_b_ref[li])

    # ---- decoder (vocab padded to 128 lanes -> unmasked stores) ----
    out_ref[...] = linear(x, dec_w_ref[...], dec_b_ref[...]).astype(out_ref.dtype)


def fused_forward(x, pe, params, *, seq, batch):
    n_rows = x.shape[0]
    vmem_spec = pl.BlockSpec(memory_space=pltpu.MemorySpace.VMEM)
    inputs = (
        x, pe,
        params["wqkv"], params["bqkv"], params["wo"], params["bo"],
        params["w1"], params["b1"], params["w2"], params["b2"],
        params["ln1_g"], params["ln1_b"], params["ln2_g"], params["ln2_b"],
        params["dec_w"], params["dec_b"],
    )
    kernel = functools.partial(
        _fused_forward_kernel, seq=seq, batch=batch, nhead=NHEAD, num_layers=NUM_LAYERS
    )
    return pl.pallas_call(
        kernel,
        out_shape=jax.ShapeDtypeStruct((n_rows, VOCAB_PAD), jnp.float32),
        in_specs=[vmem_spec] * len(inputs),
        out_specs=vmem_spec,
        compiler_params=pltpu.CompilerParams(vmem_limit_bytes=32 * 1024 * 1024),
    )(*inputs)


# --------------------------- parameter construction --------------------------
def make_positional_encoding(max_len, d_model):
    position = jnp.arange(max_len, dtype=jnp.float32)[:, None]
    div_term = jnp.exp(
        jnp.arange(0, d_model, 2, dtype=jnp.float32) * -(math.log(10000.0) / d_model)
    )
    pe = jnp.zeros((max_len, 1, d_model), dtype=jnp.float32)
    pe = pe.at[:, 0, 0::2].set(jnp.sin(position * div_term))
    pe = pe.at[:, 0, 1::2].set(jnp.cos(position * div_term))
    return pe


def init_params(key):
    initrange = 0.1
    keys = jax.random.split(key, 2 + NUM_LAYERS)
    params = {}
    params["emb"] = jax.random.uniform(
        keys[0], (VOCAB_SIZE, D_MODEL), jnp.float32, -initrange, initrange
    )
    params["pe"] = make_positional_encoding(MAX_LEN, D_MODEL)

    dec_w = jax.random.uniform(
        keys[1], (D_MODEL, VOCAB_SIZE), jnp.float32, -initrange, initrange
    )
    params["dec_w"] = jnp.zeros((D_MODEL, VOCAB_PAD), jnp.float32).at[:, :VOCAB_SIZE].set(dec_w)
    params["dec_b"] = jnp.zeros((1, VOCAB_PAD), jnp.float32)

    s_attn = 1.0 / math.sqrt(D_MODEL)
    s_ff = 1.0 / math.sqrt(DIM_FF)
    wqkv, wo, w1, w2 = [], [], [], []
    for li in range(NUM_LAYERS):
        lk = jax.random.split(keys[2 + li], 6)
        wqkv.append(jnp.concatenate(
            [jax.random.normal(lk[0], (D_MODEL, D_MODEL), jnp.float32) * s_attn,
             jax.random.normal(lk[1], (D_MODEL, D_MODEL), jnp.float32) * s_attn,
             jax.random.normal(lk[2], (D_MODEL, D_MODEL), jnp.float32) * s_attn],
            axis=1))                                                   # (D, 3D) fused QKV
        wo.append(jax.random.normal(lk[3], (D_MODEL, D_MODEL), jnp.float32) * s_attn)
        w1.append(jax.random.normal(lk[4], (D_MODEL, DIM_FF), jnp.float32) * s_attn)
        w2.append(jax.random.normal(lk[5], (DIM_FF, D_MODEL), jnp.float32) * s_ff)

    params["wqkv"] = jnp.stack(wqkv)                                   # (L, D, 3D)
    params["bqkv"] = jnp.zeros((NUM_LAYERS, 1, 3 * D_MODEL), jnp.float32)
    params["wo"] = jnp.stack(wo)                                       # (L, D, D)
    params["bo"] = jnp.zeros((NUM_LAYERS, 1, D_MODEL), jnp.float32)
    params["w1"] = jnp.stack(w1)                                       # (L, D, F)
    params["b1"] = jnp.zeros((NUM_LAYERS, 1, DIM_FF), jnp.float32)
    params["w2"] = jnp.stack(w2)                                       # (L, F, D)
    params["b2"] = jnp.zeros((NUM_LAYERS, 1, D_MODEL), jnp.float32)
    params["ln1_g"] = jnp.ones((NUM_LAYERS, 1, D_MODEL), jnp.float32)
    params["ln1_b"] = jnp.zeros((NUM_LAYERS, 1, D_MODEL), jnp.float32)
    params["ln2_g"] = jnp.ones((NUM_LAYERS, 1, D_MODEL), jnp.float32)
    params["ln2_b"] = jnp.zeros((NUM_LAYERS, 1, D_MODEL), jnp.float32)
    return params


# ------------------------------- forward pass --------------------------------
def transformer_forward(tokens, params):
    S, B = tokens.shape
    # TODO(synk): embedding gather (data-dependent indexing) and dropout (eval-mode
    # identity) stay as XLA glue; all hot-path math runs in the single fused Pallas kernel.
    emb = jnp.take(params["emb"], tokens, axis=0)                    # (S, B, D)
    # batch-major row layout so per-(batch, head) attention slices are contiguous in-kernel
    x = jnp.transpose(emb, (1, 0, 2)).reshape(B * S, D_MODEL)        # (B*S, D)
    pe = jnp.broadcast_to(params["pe"][:S, 0][None, :, :],
                          (B, S, D_MODEL)).reshape(B * S, D_MODEL)   # (B*S, D)

    logits_pad = fused_forward(x, pe, params, seq=S, batch=B)        # (B*S, VOCAB_PAD)
    logits = logits_pad.reshape(B, S, VOCAB_PAD)[:, :, :VOCAB_SIZE]  # (B, S, V)
    return jnp.transpose(logits, (1, 0, 2))                          # (S, B, V)


# ---------------------------------- main --------------------------------------
if __name__ == "__main__":
    key = jax.random.PRNGKey(0)
    pkey, tkey = jax.random.split(key)
    params = init_params(pkey)
    tokens = jax.random.randint(tkey, (SEQ, BATCH), 0, VOCAB_SIZE, dtype=jnp.int32)

    out = jax.jit(transformer_forward)(tokens, params)
    out = jax.block_until_ready(out)
    assert out.shape == (SEQ, BATCH, VOCAB_SIZE), out.shape
    assert jnp.all(jnp.isfinite(out))
    print("KERNEL_OK")
</pallas_src>

<mosaic_0001>
module attributes {stable_mosaic.version = 11 : i64} {
  func.func @_fused_forward_kernel(%arg0: memref<16x32xf32, #tpu.memory_space<vmem>>, %arg1: memref<16x32xf32, #tpu.memory_space<vmem>>, %arg2: memref<2x32x96xf32, #tpu.memory_space<vmem>>, %arg3: memref<2x1x96xf32, #tpu.memory_space<vmem>>, %arg4: memref<2x32x32xf32, #tpu.memory_space<vmem>>, %arg5: memref<2x1x32xf32, #tpu.memory_space<vmem>>, %arg6: memref<2x32x2048xf32, #tpu.memory_space<vmem>>, %arg7: memref<2x1x2048xf32, #tpu.memory_space<vmem>>, %arg8: memref<2x2048x32xf32, #tpu.memory_space<vmem>>, %arg9: memref<2x1x32xf32, #tpu.memory_space<vmem>>, %arg10: memref<2x1x32xf32, #tpu.memory_space<vmem>>, %arg11: memref<2x1x32xf32, #tpu.memory_space<vmem>>, %arg12: memref<2x1x32xf32, #tpu.memory_space<vmem>>, %arg13: memref<2x1x32xf32, #tpu.memory_space<vmem>>, %arg14: memref<32x128xf32, #tpu.memory_space<vmem>>, %arg15: memref<1x128xf32, #tpu.memory_space<vmem>>, %arg16: memref<16x128xf32, #tpu.memory_space<vmem>>) attributes {dimension_semantics = [], scalar_prefetch = 0 : i64, scratch_operands = 0 : i64, tpu.core_type = #tpu.core_type<tc>} {
    %c0 = arith.constant 0 : index
    %c0_0 = arith.constant 0 : index
    %0 = vector.load %arg0[%c0, %c0_0] : memref<16x32xf32, #tpu.memory_space<vmem>>, vector<16x32xf32>
    %cst = arith.constant 5.65685415 : f32
    %1 = vector.broadcast %cst : f32 to vector<16x32xf32>
    %2 = arith.mulf %0, %1 : vector<16x32xf32>
    %c0_1 = arith.constant 0 : index
    %c0_2 = arith.constant 0 : index
    %3 = vector.load %arg1[%c0_1, %c0_2] : memref<16x32xf32, #tpu.memory_space<vmem>>, vector<16x32xf32>
    %4 = arith.addf %2, %3 : vector<16x32xf32>
    %c0_3 = arith.constant 0 : index
    %c0_4 = arith.constant 0 : index
    %c0_5 = arith.constant 0 : index
    %5 = vector.load %arg2[%c0_3, %c0_4, %c0_5] : memref<2x32x96xf32, #tpu.memory_space<vmem>>, vector<1x32x96xf32>
    %6 = vector.shape_cast %5 : vector<1x32x96xf32> to vector<32x96xf32>
    %c0_6 = arith.constant 0 : index
    %c0_7 = arith.constant 0 : index
    %c0_8 = arith.constant 0 : index
    %7 = vector.load %arg3[%c0_6, %c0_7, %c0_8] : memref<2x1x96xf32, #tpu.memory_space<vmem>>, vector<1x1x96xf32>
    %8 = vector.shape_cast %7 : vector<1x1x96xf32> to vector<1x96xf32>
    %9 = arith.truncf %4 : vector<16x32xf32> to vector<16x32xbf16>
    %10 = arith.truncf %6 : vector<32x96xf32> to vector<32x96xbf16>
    %cst_9 = arith.constant dense<0.000000e+00> : vector<16x96xf32>
    %11 = tpu.matmul %9, %10, %cst_9 {dimension_numbers = #tpu.dot_dimension_numbers<[1], [0], [0], [1], [0, 0, 1, 1], [], []>} : vector<16x32xbf16>, vector<32x96xbf16>, vector<16x96xf32> -> vector<16x96xf32>
    %12 = vector.broadcast %8 : vector<1x96xf32> to vector<16x96xf32>
    %13 = arith.addf %11, %12 : vector<16x96xf32>
    %14 = vector.extract_strided_slice %13 {offsets = [0, 0], sizes = [8, 8], strides = [1, 1]} : vector<16x96xf32> to vector<8x8xf32>
    %15 = vector.extract_strided_slice %13 {offsets = [0, 32], sizes = [8, 8], strides = [1, 1]} : vector<16x96xf32> to vector<8x8xf32>
    %16 = vector.extract_strided_slice %13 {offsets = [0, 64], sizes = [8, 8], strides = [1, 1]} : vector<16x96xf32> to vector<8x8xf32>
    %cst_10 = arith.constant dense<0.000000e+00> : vector<8x8xf32>
    %17 = tpu.matmul %14, %15, %cst_10 {dimension_numbers = #tpu.dot_dimension_numbers<[1], [1], [0], [0], [0, 0, 1, 0], [], []>} : vector<8x8xf32>, vector<8x8xf32>, vector<8x8xf32> -> vector<8x8xf32>
    %cst_11 = arith.constant 0.353553385 : f32
    %18 = vector.broadcast %cst_11 : f32 to vector<8x8xf32>
    %19 = arith.mulf %17, %18 : vector<8x8xf32>
    %cst_12 = arith.constant dense<0xFF800000> : vector<8xf32>
    %20 = vector.multi_reduction <maximumf>, %19, %cst_12 [1] : vector<8x8xf32> to vector<8xf32>
    %21 = vector.shape_cast %20 : vector<8xf32> to vector<8x1xf32>
    %22 = vector.broadcast %21 : vector<8x1xf32> to vector<8x8xf32>
    %23 = arith.subf %19, %22 : vector<8x8xf32>
    %24 = math.exp %23 : vector<8x8xf32>
    %cst_13 = arith.constant dense<0.000000e+00> : vector<8xf32>
    %25 = vector.multi_reduction <add>, %24, %cst_13 [1] : vector<8x8xf32> to vector<8xf32>
    %26 = vector.shape_cast %25 : vector<8xf32> to vector<8x1xf32>
    %27 = tpu.reciprocal %26 {approx = true} : vector<8x1xf32> -> vector<8x1xf32>
    %28 = vector.broadcast %27 : vector<8x1xf32> to vector<8x8xf32>
    %29 = arith.mulf %24, %28 : vector<8x8xf32>
    %cst_14 = arith.constant dense<0.000000e+00> : vector<8x8xf32>
    %30 = tpu.matmul %29, %16, %cst_14 {dimension_numbers = #tpu.dot_dimension_numbers<[1], [0], [0], [1], [0, 0, 1, 1], [], []>} : vector<8x8xf32>, vector<8x8xf32>, vector<8x8xf32> -> vector<8x8xf32>
    %31 = vector.extract_strided_slice %13 {offsets = [0, 8], sizes = [8, 8], strides = [1, 1]} : vector<16x96xf32> to vector<8x8xf32>
    %32 = vector.extract_strided_slice %13 {offsets = [0, 40], sizes = [8, 8], strides = [1, 1]} : vector<16x96xf32> to vector<8x8xf32>
    %33 = vector.extract_strided_slice %13 {offsets = [0, 72], sizes = [8, 8], strides = [1, 1]} : vector<16x96xf32> to vector<8x8xf32>
    %cst_15 = arith.constant dense<0.000000e+00> : vector<8x8xf32>
    %34 = tpu.matmul %31, %32, %cst_15 {dimension_numbers = #tpu.dot_dimension_numbers<[1], [1], [0], [0], [0, 0, 1, 0], [], []>} : vector<8x8xf32>, vector<8x8xf32>, vector<8x8xf32> -> vector<8x8xf32>
    %cst_16 = arith.constant 0.353553385 : f32
    %35 = vector.broadcast %cst_16 : f32 to vector<8x8xf32>
    %36 = arith.mulf %34, %35 : vector<8x8xf32>
    %cst_17 = arith.constant dense<0xFF800000> : vector<8xf32>
    %37 = vector.multi_reduction <maximumf>, %36, %cst_17 [1] : vector<8x8xf32> to vector<8xf32>
    %38 = vector.shape_cast %37 : vector<8xf32> to vector<8x1xf32>
    %39 = vector.broadcast %38 : vector<8x1xf32> to vector<8x8xf32>
    %40 = arith.subf %36, %39 : vector<8x8xf32>
    %41 = math.exp %40 : vector<8x8xf32>
    %cst_18 = arith.constant dense<0.000000e+00> : vector<8xf32>
    %42 = vector.multi_reduction <add>, %41, %cst_18 [1] : vector<8x8xf32> to vector<8xf32>
    %43 = vector.shape_cast %42 : vector<8xf32> to vector<8x1xf32>
    %44 = tpu.reciprocal %43 {approx = true} : vector<8x1xf32> -> vector<8x1xf32>
    %45 = vector.broadcast %44 : vector<8x1xf32> to vector<8x8xf32>
    %46 = arith.mulf %41, %45 : vector<8x8xf32>
    %cst_19 = arith.constant dense<0.000000e+00> : vector<8x8xf32>
    %47 = tpu.matmul %46, %33, %cst_19 {dimension_numbers = #tpu.dot_dimension_numbers<[1], [0], [0], [1], [0, 0, 1, 1], [], []>} : vector<8x8xf32>, vector<8x8xf32>, vector<8x8xf32> -> vector<8x8xf32>
    %48 = vector.extract_strided_slice %13 {offsets = [0, 16], sizes = [8, 8], strides = [1, 1]} : vector<16x96xf32> to vector<8x8xf32>
    %49 = vector.extract_strided_slice %13 {offsets = [0, 48], sizes = [8, 8], strides = [1, 1]} : vector<16x96xf32> to vector<8x8xf32>
    %50 = vector.extract_strided_slice %13 {offsets = [0, 80], sizes = [8, 8], strides = [1, 1]} : vector<16x96xf32> to vector<8x8xf32>
    %cst_20 = arith.constant dense<0.000000e+00> : vector<8x8xf32>
    %51 = tpu.matmul %48, %49, %cst_20 {dimension_numbers = #tpu.dot_dimension_numbers<[1], [1], [0], [0], [0, 0, 1, 0], [], []>} : vector<8x8xf32>, vector<8x8xf32>, vector<8x8xf32> -> vector<8x8xf32>
    %cst_21 = arith.constant 0.353553385 : f32
    %52 = vector.broadcast %cst_21 : f32 to vector<8x8xf32>
    %53 = arith.mulf %51, %52 : vector<8x8xf32>
    %cst_22 = arith.constant dense<0xFF800000> : vector<8xf32>
    %54 = vector.multi_reduction <maximumf>, %53, %cst_22 [1] : vector<8x8xf32> to vector<8xf32>
    %55 = vector.shape_cast %54 : vector<8xf32> to vector<8x1xf32>
    %56 = vector.broadcast %55 : vector<8x1xf32> to vector<8x8xf32>
    %57 = arith.subf %53, %56 : vector<8x8xf32>
    %58 = math.exp %57 : vector<8x8xf32>
    %cst_23 = arith.constant dense<0.000000e+00> : vector<8xf32>
    %59 = vector.multi_reduction <add>, %58, %cst_23 [1] : vector<8x8xf32> to vector<8xf32>
    %60 = vector.shape_cast %59 : vector<8xf32> to vector<8x1xf32>
    %61 = tpu.reciprocal %60 {approx = true} : vector<8x1xf32> -> vector<8x1xf32>
    %62 = vector.broadcast %61 : vector<8x1xf32> to vector<8x8xf32>
    %63 = arith.mulf %58, %62 : vector<8x8xf32>
    %cst_24 = arith.constant dense<0.000000e+00> : vector<8x8xf32>
    %64 = tpu.matmul %63, %50, %cst_24 {dimension_numbers = #tpu.dot_dimension_numbers<[1], [0], [0], [1], [0, 0, 1, 1], [], []>} : vector<8x8xf32>, vector<8x8xf32>, vector<8x8xf32> -> vector<8x8xf32>
    %65 = vector.extract_strided_slice %13 {offsets = [0, 24], sizes = [8, 8], strides = [1, 1]} : vector<16x96xf32> to vector<8x8xf32>
    %66 = vector.extract_strided_slice %13 {offsets = [0, 56], sizes = [8, 8], strides = [1, 1]} : vector<16x96xf32> to vector<8x8xf32>
    %67 = vector.extract_strided_slice %13 {offsets = [0, 88], sizes = [8, 8], strides = [1, 1]} : vector<16x96xf32> to vector<8x8xf32>
    %cst_25 = arith.constant dense<0.000000e+00> : vector<8x8xf32>
    %68 = tpu.matmul %65, %66, %cst_25 {dimension_numbers = #tpu.dot_dimension_numbers<[1], [1], [0], [0], [0, 0, 1, 0], [], []>} : vector<8x8xf32>, vector<8x8xf32>, vector<8x8xf32> -> vector<8x8xf32>
    %cst_26 = arith.constant 0.353553385 : f32
    %69 = vector.broadcast %cst_26 : f32 to vector<8x8xf32>
    %70 = arith.mulf %68, %69 : vector<8x8xf32>
    %cst_27 = arith.constant dense<0xFF800000> : vector<8xf32>
    %71 = vector.multi_reduction <maximumf>, %70, %cst_27 [1] : vector<8x8xf32> to vector<8xf32>
    %72 = vector.shape_cast %71 : vector<8xf32> to vector<8x1xf32>
    %73 = vector.broadcast %72 : vector<8x1xf32> to vector<8x8xf32>
    %74 = arith.subf %70, %73 : vector<8x8xf32>
    %75 = math.exp %74 : vector<8x8xf32>
    %cst_28 = arith.constant dense<0.000000e+00> : vector<8xf32>
    %76 = vector.multi_reduction <add>, %75, %cst_28 [1] : vector<8x8xf32> to vector<8xf32>
    %77 = vector.shape_cast %76 : vector<8xf32> to vector<8x1xf32>
    %78 = tpu.reciprocal %77 {approx = true} : vector<8x1xf32> -> vector<8x1xf32>
    %79 = vector.broadcast %78 : vector<8x1xf32> to vector<8x8xf32>
    %80 = arith.mulf %75, %79 : vector<8x8xf32>
    %cst_29 = arith.constant dense<0.000000e+00> : vector<8x8xf32>
    %81 = tpu.matmul %80, %67, %cst_29 {dimension_numbers = #tpu.dot_dimension_numbers<[1], [0], [0], [1], [0, 0, 1, 1], [], []>} : vector<8x8xf32>, vector<8x8xf32>, vector<8x8xf32> -> vector<8x8xf32>
    %82 = tpu.concatenate %30, %47, %64, %81 in 1 : vector<8x8xf32>, vector<8x8xf32>, vector<8x8xf32>, vector<8x8xf32> -> vector<8x32xf32>
    %83 = vector.extract_strided_slice %13 {offsets = [8, 0], sizes = [8, 8], strides = [1, 1]} : vector<16x96xf32> to vector<8x8xf32>
    %84 = vector.extract_strided_slice %13 {offsets = [8, 32], sizes = [8, 8], strides = [1, 1]} : vector<16x96xf32> to vector<8x8xf32>
    %85 = vector.extract_strided_slice %13 {offsets = [8, 64], sizes = [8, 8], strides = [1, 1]} : vector<16x96xf32> to vector<8x8xf32>
    %cst_30 = arith.constant dense<0.000000e+00> : vector<8x8xf32>
    %86 = tpu.matmul %83, %84, %cst_30 {dimension_numbers = #tpu.dot_dimension_numbers<[1], [1], [0], [0], [0, 0, 1, 0], [], []>} : vector<8x8xf32>, vector<8x8xf32>, vector<8x8xf32> -> vector<8x8xf32>
    %cst_31 = arith.constant 0.353553385 : f32
    %87 = vector.broadcast %cst_31 : f32 to vector<8x8xf32>
    %88 = arith.mulf %86, %87 : vector<8x8xf32>
    %cst_32 = arith.constant dense<0xFF800000> : vector<8xf32>
    %89 = vector.multi_reduction <maximumf>, %88, %cst_32 [1] : vector<8x8xf32> to vector<8xf32>
    %90 = vector.shape_cast %89 : vector<8xf32> to vector<8x1xf32>
    %91 = vector.broadcast %90 : vector<8x1xf32> to vector<8x8xf32>
    %92 = arith.subf %88, %91 : vector<8x8xf32>
    %93 = math.exp %92 : vector<8x8xf32>
    %cst_33 = arith.constant dense<0.000000e+00> : vector<8xf32>
    %94 = vector.multi_reduction <add>, %93, %cst_33 [1] : vector<8x8xf32> to vector<8xf32>
    %95 = vector.shape_cast %94 : vector<8xf32> to vector<8x1xf32>
    %96 = tpu.reciprocal %95 {approx = true} : vector<8x1xf32> -> vector<8x1xf32>
    %97 = vector.broadcast %96 : vector<8x1xf32> to vector<8x8xf32>
    %98 = arith.mulf %93, %97 : vector<8x8xf32>
    %cst_34 = arith.constant dense<0.000000e+00> : vector<8x8xf32>
    %99 = tpu.matmul %98, %85, %cst_34 {dimension_numbers = #tpu.dot_dimension_numbers<[1], [0], [0], [1], [0, 0, 1, 1], [], []>} : vector<8x8xf32>, vector<8x8xf32>, vector<8x8xf32> -> vector<8x8xf32>
    %100 = vector.extract_strided_slice %13 {offsets = [8, 8], sizes = [8, 8], strides = [1, 1]} : vector<16x96xf32> to vector<8x8xf32>
    %101 = vector.extract_strided_slice %13 {offsets = [8, 40], sizes = [8, 8], strides = [1, 1]} : vector<16x96xf32> to vector<8x8xf32>
    %102 = vector.extract_strided_slice %13 {offsets = [8, 72], sizes = [8, 8], strides = [1, 1]} : vector<16x96xf32> to vector<8x8xf32>
    %cst_35 = arith.constant dense<0.000000e+00> : vector<8x8xf32>
    %103 = tpu.matmul %100, %101, %cst_35 {dimension_numbers = #tpu.dot_dimension_numbers<[1], [1], [0], [0], [0, 0, 1, 0], [], []>} : vector<8x8xf32>, vector<8x8xf32>, vector<8x8xf32> -> vector<8x8xf32>
    %cst_36 = arith.constant 0.353553385 : f32
    %104 = vector.broadcast %cst_36 : f32 to vector<8x8xf32>
    %105 = arith.mulf %103, %104 : vector<8x8xf32>
    %cst_37 = arith.constant dense<0xFF800000> : vector<8xf32>
    %106 = vector.multi_reduction <maximumf>, %105, %cst_37 [1] : vector<8x8xf32> to vector<8xf32>
    %107 = vector.shape_cast %106 : vector<8xf32> to vector<8x1xf32>
    %108 = vector.broadcast %107 : vector<8x1xf32> to vector<8x8xf32>
    %109 = arith.subf %105, %108 : vector<8x8xf32>
    %110 = math.exp %109 : vector<8x8xf32>
    %cst_38 = arith.constant dense<0.000000e+00> : vector<8xf32>
    %111 = vector.multi_reduction <add>, %110, %cst_38 [1] : vector<8x8xf32> to vector<8xf32>
    %112 = vector.shape_cast %111 : vector<8xf32> to vector<8x1xf32>
    %113 = tpu.reciprocal %112 {approx = true} : vector<8x1xf32> -> vector<8x1xf32>
    %114 = vector.broadcast %113 : vector<8x1xf32> to vector<8x8xf32>
    %115 = arith.mulf %110, %114 : vector<8x8xf32>
    %cst_39 = arith.constant dense<0.000000e+00> : vector<8x8xf32>
    %116 = tpu.matmul %115, %102, %cst_39 {dimension_numbers = #tpu.dot_dimension_numbers<[1], [0], [0], [1], [0, 0, 1, 1], [], []>} : vector<8x8xf32>, vector<8x8xf32>, vector<8x8xf32> -> vector<8x8xf32>
    %117 = vector.extract_strided_slice %13 {offsets = [8, 16], sizes = [8, 8], strides = [1, 1]} : vector<16x96xf32> to vector<8x8xf32>
    %118 = vector.extract_strided_slice %13 {offsets = [8, 48], sizes = [8, 8], strides = [1, 1]} : vector<16x96xf32> to vector<8x8xf32>
    %119 = vector.extract_strided_slice %13 {offsets = [8, 80], sizes = [8, 8], strides = [1, 1]} : vector<16x96xf32> to vector<8x8xf32>
    %cst_40 = arith.constant dense<0.000000e+00> : vector<8x8xf32>
    %120 = tpu.matmul %117, %118, %cst_40 {dimension_numbers = #tpu.dot_dimension_numbers<[1], [1], [0], [0], [0, 0, 1, 0], [], []>} : vector<8x8xf32>, vector<8x8xf32>, vector<8x8xf32> -> vector<8x8xf32>
    %cst_41 = arith.constant 0.353553385 : f32
    %121 = vector.broadcast %cst_41 : f32 to vector<8x8xf32>
    %122 = arith.mulf %120, %121 : vector<8x8xf32>
    %cst_42 = arith.constant dense<0xFF800000> : vector<8xf32>
    %123 = vector.multi_reduction <maximumf>, %122, %cst_42 [1] : vector<8x8xf32> to vector<8xf32>
    %124 = vector.shape_cast %123 : vector<8xf32> to vector<8x1xf32>
    %125 = vector.broadcast %124 : vector<8x1xf32> to vector<8x8xf32>
    %126 = arith.subf %122, %125 : vector<8x8xf32>
    %127 = math.exp %126 : vector<8x8xf32>
    %cst_43 = arith.constant dense<0.000000e+00> : vector<8xf32>
    %128 = vector.multi_reduction <add>, %127, %cst_43 [1] : vector<8x8xf32> to vector<8xf32>
    %129 = vector.shape_cast %128 : vector<8xf32> to vector<8x1xf32>
    %130 = tpu.reciprocal %129 {approx = true} : vector<8x1xf32> -> vector<8x1xf32>
    %131 = vector.broadcast %130 : vector<8x1xf32> to vector<8x8xf32>
    %132 = arith.mulf %127, %131 : vector<8x8xf32>
    %cst_44 = arith.constant dense<0.000000e+00> : vector<8x8xf32>
    %133 = tpu.matmul %132, %119, %cst_44 {dimension_numbers = #tpu.dot_dimension_numbers<[1], [0], [0], [1], [0, 0, 1, 1], [], []>} : vector<8x8xf32>, vector<8x8xf32>, vector<8x8xf32> -> vector<8x8xf32>
    %134 = vector.extract_strided_slice %13 {offsets = [8, 24], sizes = [8, 8], strides = [1, 1]} : vector<16x96xf32> to vector<8x8xf32>
    %135 = vector.extract_strided_slice %13 {offsets = [8, 56], sizes = [8, 8], strides = [1, 1]} : vector<16x96xf32> to vector<8x8xf32>
    %136 = vector.extract_strided_slice %13 {offsets = [8, 88], sizes = [8, 8], strides = [1, 1]} : vector<16x96xf32> to vector<8x8xf32>
    %cst_45 = arith.constant dense<0.000000e+00> : vector<8x8xf32>
    %137 = tpu.matmul %134, %135, %cst_45 {dimension_numbers = #tpu.dot_dimension_numbers<[1], [1], [0], [0], [0, 0, 1, 0], [], []>} : vector<8x8xf32>, vector<8x8xf32>, vector<8x8xf32> -> vector<8x8xf32>
    %cst_46 = arith.constant 0.353553385 : f32
    %138 = vector.broadcast %cst_46 : f32 to vector<8x8xf32>
    %139 = arith.mulf %137, %138 : vector<8x8xf32>
    %cst_47 = arith.constant dense<0xFF800000> : vector<8xf32>
    %140 = vector.multi_reduction <maximumf>, %139, %cst_47 [1] : vector<8x8xf32> to vector<8xf32>
    %141 = vector.shape_cast %140 : vector<8xf32> to vector<8x1xf32>
    %142 = vector.broadcast %141 : vector<8x1xf32> to vector<8x8xf32>
    %143 = arith.subf %139, %142 : vector<8x8xf32>
    %144 = math.exp %143 : vector<8x8xf32>
    %cst_48 = arith.constant dense<0.000000e+00> : vector<8xf32>
    %145 = vector.multi_reduction <add>, %144, %cst_48 [1] : vector<8x8xf32> to vector<8xf32>
    %146 = vector.shape_cast %145 : vector<8xf32> to vector<8x1xf32>
    %147 = tpu.reciprocal %146 {approx = true} : vector<8x1xf32> -> vector<8x1xf32>
    %148 = vector.broadcast %147 : vector<8x1xf32> to vector<8x8xf32>
    %149 = arith.mulf %144, %148 : vector<8x8xf32>
    %cst_49 = arith.constant dense<0.000000e+00> : vector<8x8xf32>
    %150 = tpu.matmul %149, %136, %cst_49 {dimension_numbers = #tpu.dot_dimension_numbers<[1], [0], [0], [1], [0, 0, 1, 1], [], []>} : vector<8x8xf32>, vector<8x8xf32>, vector<8x8xf32> -> vector<8x8xf32>
    %151 = tpu.concatenate %99, %116, %133, %150 in 1 : vector<8x8xf32>, vector<8x8xf32>, vector<8x8xf32>, vector<8x8xf32> -> vector<8x32xf32>
    %152 = tpu.concatenate %82, %151 in 0 : vector<8x32xf32>, vector<8x32xf32> -> vector<16x32xf32>
    %c0_50 = arith.constant 0 : index
    %c0_51 = arith.constant 0 : index
    %c0_52 = arith.constant 0 : index
    %153 = vector.load %arg4[%c0_50, %c0_51, %c0_52] : memref<2x32x32xf32, #tpu.memory_space<vmem>>, vector<1x32x32xf32>
    %154 = vector.shape_cast %153 : vector<1x32x32xf32> to vector<32x32xf32>
    %c0_53 = arith.constant 0 : index
    %c0_54 = arith.constant 0 : index
    %c0_55 = arith.constant 0 : index
    %155 = vector.load %arg5[%c0_53, %c0_54, %c0_55] : memref<2x1x32xf32, #tpu.memory_space<vmem>>, vector<1x1x32xf32>
    %156 = vector.shape_cast %155 : vector<1x1x32xf32> to vector<1x32xf32>
    %157 = arith.truncf %152 : vector<16x32xf32> to vector<16x32xbf16>
    %158 = arith.truncf %154 : vector<32x32xf32> to vector<32x32xbf16>
    %cst_56 = arith.constant dense<0.000000e+00> : vector<16x32xf32>
    %159 = tpu.matmul %157, %158, %cst_56 {dimension_numbers = #tpu.dot_dimension_numbers<[1], [0], [0], [1], [0, 0, 1, 1], [], []>} : vector<16x32xbf16>, vector<32x32xbf16>, vector<16x32xf32> -> vector<16x32xf32>
    %160 = vector.broadcast %156 : vector<1x32xf32> to vector<16x32xf32>
    %161 = arith.addf %159, %160 : vector<16x32xf32>
    %162 = arith.addf %4, %161 : vector<16x32xf32>
    %c0_57 = arith.constant 0 : index
    %c0_58 = arith.constant 0 : index
    %c0_59 = arith.constant 0 : index
    %163 = vector.load %arg10[%c0_57, %c0_58, %c0_59] : memref<2x1x32xf32, #tpu.memory_space<vmem>>, vector<1x1x32xf32>
    %164 = vector.shape_cast %163 : vector<1x1x32xf32> to vector<1x32xf32>
    %c0_60 = arith.constant 0 : index
    %c0_61 = arith.constant 0 : index
    %c0_62 = arith.constant 0 : index
    %165 = vector.load %arg11[%c0_60, %c0_61, %c0_62] : memref<2x1x32xf32, #tpu.memory_space<vmem>>, vector<1x1x32xf32>
    %166 = vector.shape_cast %165 : vector<1x1x32xf32> to vector<1x32xf32>
    %cst_63 = arith.constant dense<0.000000e+00> : vector<16xf32>
    %167 = vector.multi_reduction <add>, %162, %cst_63 [1] : vector<16x32xf32> to vector<16xf32>
    %168 = vector.shape_cast %167 : vector<16xf32> to vector<16x1xf32>
    %cst_64 = arith.constant 3.200000e+01 : f32
    %169 = vector.broadcast %cst_64 : f32 to vector<16x1xf32>
    %170 = arith.divf %168, %169 : vector<16x1xf32>
    %171 = vector.broadcast %170 : vector<16x1xf32> to vector<16x32xf32>
    %172 = arith.subf %162, %171 : vector<16x32xf32>
    %173 = arith.mulf %172, %172 : vector<16x32xf32>
    %cst_65 = arith.constant dense<0.000000e+00> : vector<16xf32>
    %174 = vector.multi_reduction <add>, %173, %cst_65 [1] : vector<16x32xf32> to vector<16xf32>
    %175 = vector.shape_cast %174 : vector<16xf32> to vector<16x1xf32>
    %cst_66 = arith.constant 3.200000e+01 : f32
    %176 = vector.broadcast %cst_66 : f32 to vector<16x1xf32>
    %177 = arith.divf %175, %176 : vector<16x1xf32>
    %cst_67 = arith.constant 9.99999974E-6 : f32
    %178 = vector.broadcast %cst_67 : f32 to vector<16x1xf32>
    %179 = arith.addf %177, %178 : vector<16x1xf32>
    %180 = math.rsqrt %179 : vector<16x1xf32>
    %181 = vector.broadcast %180 : vector<16x1xf32> to vector<16x32xf32>
    %182 = arith.mulf %172, %181 : vector<16x32xf32>
    %183 = vector.broadcast %164 : vector<1x32xf32> to vector<16x32xf32>
    %184 = arith.mulf %182, %183 : vector<16x32xf32>
    %185 = vector.broadcast %166 : vector<1x32xf32> to vector<16x32xf32>
    %186 = arith.addf %184, %185 : vector<16x32xf32>
    %c0_68 = arith.constant 0 : index
    %c0_69 = arith.constant 0 : index
    %c0_70 = arith.constant 0 : index
    %187 = vector.load %arg6[%c0_68, %c0_69, %c0_70] : memref<2x32x2048xf32, #tpu.memory_space<vmem>>, vector<1x32x2048xf32>
    %188 = vector.shape_cast %187 : vector<1x32x2048xf32> to vector<32x2048xf32>
    %c0_71 = arith.constant 0 : index
    %c0_72 = arith.constant 0 : index
    %c0_73 = arith.constant 0 : index
    %189 = vector.load %arg7[%c0_71, %c0_72, %c0_73] : memref<2x1x2048xf32, #tpu.memory_space<vmem>>, vector<1x1x2048xf32>
    %190 = vector.shape_cast %189 : vector<1x1x2048xf32> to vector<1x2048xf32>
    %191 = arith.truncf %186 : vector<16x32xf32> to vector<16x32xbf16>
    %192 = arith.truncf %188 : vector<32x2048xf32> to vector<32x2048xbf16>
    %cst_74 = arith.constant dense<0.000000e+00> : vector<16x2048xf32>
    %193 = tpu.matmul %191, %192, %cst_74 {dimension_numbers = #tpu.dot_dimension_numbers<[1], [0], [0], [1], [0, 0, 1, 1], [], []>} : vector<16x32xbf16>, vector<32x2048xbf16>, vector<16x2048xf32> -> vector<16x2048xf32>
    %194 = vector.broadcast %190 : vector<1x2048xf32> to vector<16x2048xf32>
    %195 = arith.addf %193, %194 : vector<16x2048xf32>
    %cst_75 = arith.constant 0.000000e+00 : f32
    %196 = vector.broadcast %cst_75 : f32 to vector<16x2048xf32>
    %197 = arith.maximumf %195, %196 : vector<16x2048xf32>
    %c0_76 = arith.constant 0 : index
    %c0_77 = arith.constant 0 : index
    %c0_78 = arith.constant 0 : index
    %198 = vector.load %arg8[%c0_76, %c0_77, %c0_78] : memref<2x2048x32xf32, #tpu.memory_space<vmem>>, vector<1x2048x32xf32>
    %199 = vector.shape_cast %198 : vector<1x2048x32xf32> to vector<2048x32xf32>
    %c0_79 = arith.constant 0 : index
    %c0_80 = arith.constant 0 : index
    %c0_81 = arith.constant 0 : index
    %200 = vector.load %arg9[%c0_79, %c0_80, %c0_81] : memref<2x1x32xf32, #tpu.memory_space<vmem>>, vector<1x1x32xf32>
    %201 = vector.shape_cast %200 : vector<1x1x32xf32> to vector<1x32xf32>
    %202 = arith.truncf %197 : vector<16x2048xf32> to vector<16x2048xbf16>
    %203 = arith.truncf %199 : vector<2048x32xf32> to vector<2048x32xbf16>
    %cst_82 = arith.constant dense<0.000000e+00> : vector<16x32xf32>
    %204 = tpu.matmul %202, %203, %cst_82 {dimension_numbers = #tpu.dot_dimension_numbers<[1], [0], [0], [1], [0, 0, 1, 1], [], []>} : vector<16x2048xbf16>, vector<2048x32xbf16>, vector<16x32xf32> -> vector<16x32xf32>
    %205 = vector.broadcast %201 : vector<1x32xf32> to vector<16x32xf32>
    %206 = arith.addf %204, %205 : vector<16x32xf32>
    %207 = arith.addf %186, %206 : vector<16x32xf32>
    %c0_83 = arith.constant 0 : index
    %c0_84 = arith.constant 0 : index
    %c0_85 = arith.constant 0 : index
    %208 = vector.load %arg12[%c0_83, %c0_84, %c0_85] : memref<2x1x32xf32, #tpu.memory_space<vmem>>, vector<1x1x32xf32>
    %209 = vector.shape_cast %208 : vector<1x1x32xf32> to vector<1x32xf32>
    %c0_86 = arith.constant 0 : index
    %c0_87 = arith.constant 0 : index
    %c0_88 = arith.constant 0 : index
    %210 = vector.load %arg13[%c0_86, %c0_87, %c0_88] : memref<2x1x32xf32, #tpu.memory_space<vmem>>, vector<1x1x32xf32>
    %211 = vector.shape_cast %210 : vector<1x1x32xf32> to vector<1x32xf32>
    %cst_89 = arith.constant dense<0.000000e+00> : vector<16xf32>
    %212 = vector.multi_reduction <add>, %207, %cst_89 [1] : vector<16x32xf32> to vector<16xf32>
    %213 = vector.shape_cast %212 : vector<16xf32> to vector<16x1xf32>
    %cst_90 = arith.constant 3.200000e+01 : f32
    %214 = vector.broadcast %cst_90 : f32 to vector<16x1xf32>
    %215 = arith.divf %213, %214 : vector<16x1xf32>
    %216 = vector.broadcast %215 : vector<16x1xf32> to vector<16x32xf32>
    %217 = arith.subf %207, %216 : vector<16x32xf32>
    %218 = arith.mulf %217, %217 : vector<16x32xf32>
    %cst_91 = arith.constant dense<0.000000e+00> : vector<16xf32>
    %219 = vector.multi_reduction <add>, %218, %cst_91 [1] : vector<16x32xf32> to vector<16xf32>
    %220 = vector.shape_cast %219 : vector<16xf32> to vector<16x1xf32>
    %cst_92 = arith.constant 3.200000e+01 : f32
    %221 = vector.broadcast %cst_92 : f32 to vector<16x1xf32>
    %222 = arith.divf %220, %221 : vector<16x1xf32>
    %cst_93 = arith.constant 9.99999974E-6 : f32
    %223 = vector.broadcast %cst_93 : f32 to vector<16x1xf32>
    %224 = arith.addf %222, %223 : vector<16x1xf32>
    %225 = math.rsqrt %224 : vector<16x1xf32>
    %226 = vector.broadcast %225 : vector<16x1xf32> to vector<16x32xf32>
    %227 = arith.mulf %217, %226 : vector<16x32xf32>
    %228 = vector.broadcast %209 : vector<1x32xf32> to vector<16x32xf32>
    %229 = arith.mulf %227, %228 : vector<16x32xf32>
    %230 = vector.broadcast %211 : vector<1x32xf32> to vector<16x32xf32>
    %231 = arith.addf %229, %230 : vector<16x32xf32>
    %c1 = arith.constant 1 : index
    %c0_94 = arith.constant 0 : index
    %c0_95 = arith.constant 0 : index
    %232 = vector.load %arg2[%c1, %c0_94, %c0_95] : memref<2x32x96xf32, #tpu.memory_space<vmem>>, vector<1x32x96xf32>
    %233 = vector.shape_cast %232 : vector<1x32x96xf32> to vector<32x96xf32>
    %c1_96 = arith.constant 1 : index
    %c0_97 = arith.constant 0 : index
    %c0_98 = arith.constant 0 : index
    %234 = vector.load %arg3[%c1_96, %c0_97, %c0_98] : memref<2x1x96xf32, #tpu.memory_space<vmem>>, vector<1x1x96xf32>
    %235 = vector.shape_cast %234 : vector<1x1x96xf32> to vector<1x96xf32>
    %236 = arith.truncf %231 : vector<16x32xf32> to vector<16x32xbf16>
    %237 = arith.truncf %233 : vector<32x96xf32> to vector<32x96xbf16>
    %cst_99 = arith.constant dense<0.000000e+00> : vector<16x96xf32>
    %238 = tpu.matmul %236, %237, %cst_99 {dimension_numbers = #tpu.dot_dimension_numbers<[1], [0], [0], [1], [0, 0, 1, 1], [], []>} : vector<16x32xbf16>, vector<32x96xbf16>, vector<16x96xf32> -> vector<16x96xf32>
    %239 = vector.broadcast %235 : vector<1x96xf32> to vector<16x96xf32>
    %240 = arith.addf %238, %239 : vector<16x96xf32>
    %241 = vector.extract_strided_slice %240 {offsets = [0, 0], sizes = [8, 8], strides = [1, 1]} : vector<16x96xf32> to vector<8x8xf32>
    %242 = vector.extract_strided_slice %240 {offsets = [0, 32], sizes = [8, 8], strides = [1, 1]} : vector<16x96xf32> to vector<8x8xf32>
    %243 = vector.extract_strided_slice %240 {offsets = [0, 64], sizes = [8, 8], strides = [1, 1]} : vector<16x96xf32> to vector<8x8xf32>
    %cst_100 = arith.constant dense<0.000000e+00> : vector<8x8xf32>
    %244 = tpu.matmul %241, %242, %cst_100 {dimension_numbers = #tpu.dot_dimension_numbers<[1], [1], [0], [0], [0, 0, 1, 0], [], []>} : vector<8x8xf32>, vector<8x8xf32>, vector<8x8xf32> -> vector<8x8xf32>
    %cst_101 = arith.constant 0.353553385 : f32
    %245 = vector.broadcast %cst_101 : f32 to vector<8x8xf32>
    %246 = arith.mulf %244, %245 : vector<8x8xf32>
    %cst_102 = arith.constant dense<0xFF800000> : vector<8xf32>
    %247 = vector.multi_reduction <maximumf>, %246, %cst_102 [1] : vector<8x8xf32> to vector<8xf32>
    %248 = vector.shape_cast %247 : vector<8xf32> to vector<8x1xf32>
    %249 = vector.broadcast %248 : vector<8x1xf32> to vector<8x8xf32>
    %250 = arith.subf %246, %249 : vector<8x8xf32>
    %251 = math.exp %250 : vector<8x8xf32>
    %cst_103 = arith.constant dense<0.000000e+00> : vector<8xf32>
    %252 = vector.multi_reduction <add>, %251, %cst_103 [1] : vector<8x8xf32> to vector<8xf32>
    %253 = vector.shape_cast %252 : vector<8xf32> to vector<8x1xf32>
    %254 = tpu.reciprocal %253 {approx = true} : vector<8x1xf32> -> vector<8x1xf32>
    %255 = vector.broadcast %254 : vector<8x1xf32> to vector<8x8xf32>
    %256 = arith.mulf %251, %255 : vector<8x8xf32>
    %cst_104 = arith.constant dense<0.000000e+00> : vector<8x8xf32>
    %257 = tpu.matmul %256, %243, %cst_104 {dimension_numbers = #tpu.dot_dimension_numbers<[1], [0], [0], [1], [0, 0, 1, 1], [], []>} : vector<8x8xf32>, vector<8x8xf32>, vector<8x8xf32> -> vector<8x8xf32>
    %258 = vector.extract_strided_slice %240 {offsets = [0, 8], sizes = [8, 8], strides = [1, 1]} : vector<16x96xf32> to vector<8x8xf32>
    %259 = vector.extract_strided_slice %240 {offsets = [0, 40], sizes = [8, 8], strides = [1, 1]} : vector<16x96xf32> to vector<8x8xf32>
    %260 = vector.extract_strided_slice %240 {offsets = [0, 72], sizes = [8, 8], strides = [1, 1]} : vector<16x96xf32> to vector<8x8xf32>
    %cst_105 = arith.constant dense<0.000000e+00> : vector<8x8xf32>
    %261 = tpu.matmul %258, %259, %cst_105 {dimension_numbers = #tpu.dot_dimension_numbers<[1], [1], [0], [0], [0, 0, 1, 0], [], []>} : vector<8x8xf32>, vector<8x8xf32>, vector<8x8xf32> -> vector<8x8xf32>
    %cst_106 = arith.constant 0.353553385 : f32
    %262 = vector.broadcast %cst_106 : f32 to vector<8x8xf32>
    %263 = arith.mulf %261, %262 : vector<8x8xf32>
    %cst_107 = arith.constant dense<0xFF800000> : vector<8xf32>
    %264 = vector.multi_reduction <maximumf>, %263, %cst_107 [1] : vector<8x8xf32> to vector<8xf32>
    %265 = vector.shape_cast %264 : vector<8xf32> to vector<8x1xf32>
    %266 = vector.broadcast %265 : vector<8x1xf32> to vector<8x8xf32>
    %267 = arith.subf %263, %266 : vector<8x8xf32>
    %268 = math.exp %267 : vector<8x8xf32>
    %cst_108 = arith.constant dense<0.000000e+00> : vector<8xf32>
    %269 = vector.multi_reduction <add>, %268, %cst_108 [1] : vector<8x8xf32> to vector<8xf32>
    %270 = vector.shape_cast %269 : vector<8xf32> to vector<8x1xf32>
    %271 = tpu.reciprocal %270 {approx = true} : vector<8x1xf32> -> vector<8x1xf32>
    %272 = vector.broadcast %271 : vector<8x1xf32> to vector<8x8xf32>
    %273 = arith.mulf %268, %272 : vector<8x8xf32>
    %cst_109 = arith.constant dense<0.000000e+00> : vector<8x8xf32>
    %274 = tpu.matmul %273, %260, %cst_109 {dimension_numbers = #tpu.dot_dimension_numbers<[1], [0], [0], [1], [0, 0, 1, 1], [], []>} : vector<8x8xf32>, vector<8x8xf32>, vector<8x8xf32> -> vector<8x8xf32>
    %275 = vector.extract_strided_slice %240 {offsets = [0, 16], sizes = [8, 8], strides = [1, 1]} : vector<16x96xf32> to vector<8x8xf32>
    %276 = vector.extract_strided_slice %240 {offsets = [0, 48], sizes = [8, 8], strides = [1, 1]} : vector<16x96xf32> to vector<8x8xf32>
    %277 = vector.extract_strided_slice %240 {offsets = [0, 80], sizes = [8, 8], strides = [1, 1]} : vector<16x96xf32> to vector<8x8xf32>
    %cst_110 = arith.constant dense<0.000000e+00> : vector<8x8xf32>
    %278 = tpu.matmul %275, %276, %cst_110 {dimension_numbers = #tpu.dot_dimension_numbers<[1], [1], [0], [0], [0, 0, 1, 0], [], []>} : vector<8x8xf32>, vector<8x8xf32>, vector<8x8xf32> -> vector<8x8xf32>
    %cst_111 = arith.constant 0.353553385 : f32
    %279 = vector.broadcast %cst_111 : f32 to vector<8x8xf32>
    %280 = arith.mulf %278, %279 : vector<8x8xf32>
    %cst_112 = arith.constant dense<0xFF800000> : vector<8xf32>
    %281 = vector.multi_reduction <maximumf>, %280, %cst_112 [1] : vector<8x8xf32> to vector<8xf32>
    %282 = vector.shape_cast %281 : vector<8xf32> to vector<8x1xf32>
    %283 = vector.broadcast %282 : vector<8x1xf32> to vector<8x8xf32>
    %284 = arith.subf %280, %283 : vector<8x8xf32>
    %285 = math.exp %284 : vector<8x8xf32>
    %cst_113 = arith.constant dense<0.000000e+00> : vector<8xf32>
    %286 = vector.multi_reduction <add>, %285, %cst_113 [1] : vector<8x8xf32> to vector<8xf32>
    %287 = vector.shape_cast %286 : vector<8xf32> to vector<8x1xf32>
    %288 = tpu.reciprocal %287 {approx = true} : vector<8x1xf32> -> vector<8x1xf32>
    %289 = vector.broadcast %288 : vector<8x1xf32> to vector<8x8xf32>
    %290 = arith.mulf %285, %289 : vector<8x8xf32>
    %cst_114 = arith.constant dense<0.000000e+00> : vector<8x8xf32>
    %291 = tpu.matmul %290, %277, %cst_114 {dimension_numbers = #tpu.dot_dimension_numbers<[1], [0], [0], [1], [0, 0, 1, 1], [], []>} : vector<8x8xf32>, vector<8x8xf32>, vector<8x8xf32> -> vector<8x8xf32>
    %292 = vector.extract_strided_slice %240 {offsets = [0, 24], sizes = [8, 8], strides = [1, 1]} : vector<16x96xf32> to vector<8x8xf32>
    %293 = vector.extract_strided_slice %240 {offsets = [0, 56], sizes = [8, 8], strides = [1, 1]} : vector<16x96xf32> to vector<8x8xf32>
    %294 = vector.extract_strided_slice %240 {offsets = [0, 88], sizes = [8, 8], strides = [1, 1]} : vector<16x96xf32> to vector<8x8xf32>
    %cst_115 = arith.constant dense<0.000000e+00> : vector<8x8xf32>
    %295 = tpu.matmul %292, %293, %cst_115 {dimension_numbers = #tpu.dot_dimension_numbers<[1], [1], [0], [0], [0, 0, 1, 0], [], []>} : vector<8x8xf32>, vector<8x8xf32>, vector<8x8xf32> -> vector<8x8xf32>
    %cst_116 = arith.constant 0.353553385 : f32
    %296 = vector.broadcast %cst_116 : f32 to vector<8x8xf32>
    %297 = arith.mulf %295, %296 : vector<8x8xf32>
    %cst_117 = arith.constant dense<0xFF800000> : vector<8xf32>
    %298 = vector.multi_reduction <maximumf>, %297, %cst_117 [1] : vector<8x8xf32> to vector<8xf32>
    %299 = vector.shape_cast %298 : vector<8xf32> to vector<8x1xf32>
    %300 = vector.broadcast %299 : vector<8x1xf32> to vector<8x8xf32>
    %301 = arith.subf %297, %300 : vector<8x8xf32>
    %302 = math.exp %301 : vector<8x8xf32>
    %cst_118 = arith.constant dense<0.000000e+00> : vector<8xf32>
    %303 = vector.multi_reduction <add>, %302, %cst_118 [1] : vector<8x8xf32> to vector<8xf32>
    %304 = vector.shape_cast %303 : vector<8xf32> to vector<8x1xf32>
    %305 = tpu.reciprocal %304 {approx = true} : vector<8x1xf32> -> vector<8x1xf32>
    %306 = vector.broadcast %305 : vector<8x1xf32> to vector<8x8xf32>
    %307 = arith.mulf %302, %306 : vector<8x8xf32>
    %cst_119 = arith.constant dense<0.000000e+00> : vector<8x8xf32>
    %308 = tpu.matmul %307, %294, %cst_119 {dimension_numbers = #tpu.dot_dimension_numbers<[1], [0], [0], [1], [0, 0, 1, 1], [], []>} : vector<8x8xf32>, vector<8x8xf32>, vector<8x8xf32> -> vector<8x8xf32>
    %309 = tpu.concatenate %257, %274, %291, %308 in 1 : vector<8x8xf32>, vector<8x8xf32>, vector<8x8xf32>, vector<8x8xf32> -> vector<8x32xf32>
    %310 = vector.extract_strided_slice %240 {offsets = [8, 0], sizes = [8, 8], strides = [1, 1]} : vector<16x96xf32> to vector<8x8xf32>
    %311 = vector.extract_strided_slice %240 {offsets = [8, 32], sizes = [8, 8], strides = [1, 1]} : vector<16x96xf32> to vector<8x8xf32>
    %312 = vector.extract_strided_slice %240 {offsets = [8, 64], sizes = [8, 8], strides = [1, 1]} : vector<16x96xf32> to vector<8x8xf32>
    %cst_120 = arith.constant dense<0.000000e+00> : vector<8x8xf32>
    %313 = tpu.matmul %310, %311, %cst_120 {dimension_numbers = #tpu.dot_dimension_numbers<[1], [1], [0], [0], [0, 0, 1, 0], [], []>} : vector<8x8xf32>, vector<8x8xf32>, vector<8x8xf32> -> vector<8x8xf32>
    %cst_121 = arith.constant 0.353553385 : f32
    %314 = vector.broadcast %cst_121 : f32 to vector<8x8xf32>
    %315 = arith.mulf %313, %314 : vector<8x8xf32>
    %cst_122 = arith.constant dense<0xFF800000> : vector<8xf32>
    %316 = vector.multi_reduction <maximumf>, %315, %cst_122 [1] : vector<8x8xf32> to vector<8xf32>
    %317 = vector.shape_cast %316 : vector<8xf32> to vector<8x1xf32>
    %318 = vector.broadcast %317 : vector<8x1xf32> to vector<8x8xf32>
    %319 = arith.subf %315, %318 : vector<8x8xf32>
    %320 = math.exp %319 : vector<8x8xf32>
    %cst_123 = arith.constant dense<0.000000e+00> : vector<8xf32>
    %321 = vector.multi_reduction <add>, %320, %cst_123 [1] : vector<8x8xf32> to vector<8xf32>
    %322 = vector.shape_cast %321 : vector<8xf32> to vector<8x1xf32>
    %323 = tpu.reciprocal %322 {approx = true} : vector<8x1xf32> -> vector<8x1xf32>
    %324 = vector.broadcast %323 : vector<8x1xf32> to vector<8x8xf32>
    %325 = arith.mulf %320, %324 : vector<8x8xf32>
    %cst_124 = arith.constant dense<0.000000e+00> : vector<8x8xf32>
    %326 = tpu.matmul %325, %312, %cst_124 {dimension_numbers = #tpu.dot_dimension_numbers<[1], [0], [0], [1], [0, 0, 1, 1], [], []>} : vector<8x8xf32>, vector<8x8xf32>, vector<8x8xf32> -> vector<8x8xf32>
    %327 = vector.extract_strided_slice %240 {offsets = [8, 8], sizes = [8, 8], strides = [1, 1]} : vector<16x96xf32> to vector<8x8xf32>
    %328 = vector.extract_strided_slice %240 {offsets = [8, 40], sizes = [8, 8], strides = [1, 1]} : vector<16x96xf32> to vector<8x8xf32>
    %329 = vector.extract_strided_slice %240 {offsets = [8, 72], sizes = [8, 8], strides = [1, 1]} : vector<16x96xf32> to vector<8x8xf32>
    %cst_125 = arith.constant dense<0.000000e+00> : vector<8x8xf32>
    %330 = tpu.matmul %327, %328, %cst_125 {dimension_numbers = #tpu.dot_dimension_numbers<[1], [1], [0], [0], [0, 0, 1, 0], [], []>} : vector<8x8xf32>, vector<8x8xf32>, vector<8x8xf32> -> vector<8x8xf32>
    %cst_126 = arith.constant 0.353553385 : f32
    %331 = vector.broadcast %cst_126 : f32 to vector<8x8xf32>
    %332 = arith.mulf %330, %331 : vector<8x8xf32>
    %cst_127 = arith.constant dense<0xFF800000> : vector<8xf32>
    %333 = vector.multi_reduction <maximumf>, %332, %cst_127 [1] : vector<8x8xf32> to vector<8xf32>
    %334 = vector.shape_cast %333 : vector<8xf32> to vector<8x1xf32>
    %335 = vector.broadcast %334 : vector<8x1xf32> to vector<8x8xf32>
    %336 = arith.subf %332, %335 : vector<8x8xf32>
    %337 = math.exp %336 : vector<8x8xf32>
    %cst_128 = arith.constant dense<0.000000e+00> : vector<8xf32>
    %338 = vector.multi_reduction <add>, %337, %cst_128 [1] : vector<8x8xf32> to vector<8xf32>
    %339 = vector.shape_cast %338 : vector<8xf32> to vector<8x1xf32>
    %340 = tpu.reciprocal %339 {approx = true} : vector<8x1xf32> -> vector<8x1xf32>
    %341 = vector.broadcast %340 : vector<8x1xf32> to vector<8x8xf32>
    %342 = arith.mulf %337, %341 : vector<8x8xf32>
    %cst_129 = arith.constant dense<0.000000e+00> : vector<8x8xf32>
    %343 = tpu.matmul %342, %329, %cst_129 {dimension_numbers = #tpu.dot_dimension_numbers<[1], [0], [0], [1], [0, 0, 1, 1], [], []>} : vector<8x8xf32>, vector<8x8xf32>, vector<8x8xf32> -> vector<8x8xf32>
    %344 = vector.extract_strided_slice %240 {offsets = [8, 16], sizes = [8, 8], strides = [1, 1]} : vector<16x96xf32> to vector<8x8xf32>
    %345 = vector.extract_strided_slice %240 {offsets = [8, 48], sizes = [8, 8], strides = [1, 1]} : vector<16x96xf32> to vector<8x8xf32>
    %346 = vector.extract_strided_slice %240 {offsets = [8, 80], sizes = [8, 8], strides = [1, 1]} : vector<16x96xf32> to vector<8x8xf32>
    %cst_130 = arith.constant dense<0.000000e+00> : vector<8x8xf32>
    %347 = tpu.matmul %344, %345, %cst_130 {dimension_numbers = #tpu.dot_dimension_numbers<[1], [1], [0], [0], [0, 0, 1, 0], [], []>} : vector<8x8xf32>, vector<8x8xf32>, vector<8x8xf32> -> vector<8x8xf32>
    %cst_131 = arith.constant 0.353553385 : f32
    %348 = vector.broadcast %cst_131 : f32 to vector<8x8xf32>
    %349 = arith.mulf %347, %348 : vector<8x8xf32>
    %cst_132 = arith.constant dense<0xFF800000> : vector<8xf32>
    %350 = vector.multi_reduction <maximumf>, %349, %cst_132 [1] : vector<8x8xf32> to vector<8xf32>
    %351 = vector.shape_cast %350 : vector<8xf32> to vector<8x1xf32>
    %352 = vector.broadcast %351 : vector<8x1xf32> to vector<8x8xf32>
    %353 = arith.subf %349, %352 : vector<8x8xf32>
    %354 = math.exp %353 : vector<8x8xf32>
    %cst_133 = arith.constant dense<0.000000e+00> : vector<8xf32>
    %355 = vector.multi_reduction <add>, %354, %cst_133 [1] : vector<8x8xf32> to vector<8xf32>
    %356 = vector.shape_cast %355 : vector<8xf32> to vector<8x1xf32>
    %357 = tpu.reciprocal %356 {approx = true} : vector<8x1xf32> -> vector<8x1xf32>
    %358 = vector.broadcast %357 : vector<8x1xf32> to vector<8x8xf32>
    %359 = arith.mulf %354, %358 : vector<8x8xf32>
    %cst_134 = arith.constant dense<0.000000e+00> : vector<8x8xf32>
    %360 = tpu.matmul %359, %346, %cst_134 {dimension_numbers = #tpu.dot_dimension_numbers<[1], [0], [0], [1], [0, 0, 1, 1], [], []>} : vector<8x8xf32>, vector<8x8xf32>, vector<8x8xf32> -> vector<8x8xf32>
    %361 = vector.extract_strided_slice %240 {offsets = [8, 24], sizes = [8, 8], strides = [1, 1]} : vector<16x96xf32> to vector<8x8xf32>
    %362 = vector.extract_strided_slice %240 {offsets = [8, 56], sizes = [8, 8], strides = [1, 1]} : vector<16x96xf32> to vector<8x8xf32>
    %363 = vector.extract_strided_slice %240 {offsets = [8, 88], sizes = [8, 8], strides = [1, 1]} : vector<16x96xf32> to vector<8x8xf32>
    %cst_135 = arith.constant dense<0.000000e+00> : vector<8x8xf32>
    %364 = tpu.matmul %361, %362, %cst_135 {dimension_numbers = #tpu.dot_dimension_numbers<[1], [1], [0], [0], [0, 0, 1, 0], [], []>} : vector<8x8xf32>, vector<8x8xf32>, vector<8x8xf32> -> vector<8x8xf32>
    %cst_136 = arith.constant 0.353553385 : f32
    %365 = vector.broadcast %cst_136 : f32 to vector<8x8xf32>
    %366 = arith.mulf %364, %365 : vector<8x8xf32>
    %cst_137 = arith.constant dense<0xFF800000> : vector<8xf32>
    %367 = vector.multi_reduction <maximumf>, %366, %cst_137 [1] : vector<8x8xf32> to vector<8xf32>
    %368 = vector.shape_cast %367 : vector<8xf32> to vector<8x1xf32>
    %369 = vector.broadcast %368 : vector<8x1xf32> to vector<8x8xf32>
    %370 = arith.subf %366, %369 : vector<8x8xf32>
    %371 = math.exp %370 : vector<8x8xf32>
    %cst_138 = arith.constant dense<0.000000e+00> : vector<8xf32>
    %372 = vector.multi_reduction <add>, %371, %cst_138 [1] : vector<8x8xf32> to vector<8xf32>
    %373 = vector.shape_cast %372 : vector<8xf32> to vector<8x1xf32>
    %374 = tpu.reciprocal %373 {approx = true} : vector<8x1xf32> -> vector<8x1xf32>
    %375 = vector.broadcast %374 : vector<8x1xf32> to vector<8x8xf32>
    %376 = arith.mulf %371, %375 : vector<8x8xf32>
    %cst_139 = arith.constant dense<0.000000e+00> : vector<8x8xf32>
    %377 = tpu.matmul %376, %363, %cst_139 {dimension_numbers = #tpu.dot_dimension_numbers<[1], [0], [0], [1], [0, 0, 1, 1], [], []>} : vector<8x8xf32>, vector<8x8xf32>, vector<8x8xf32> -> vector<8x8xf32>
    %378 = tpu.concatenate %326, %343, %360, %377 in 1 : vector<8x8xf32>, vector<8x8xf32>, vector<8x8xf32>, vector<8x8xf32> -> vector<8x32xf32>
    %379 = tpu.concatenate %309, %378 in 0 : vector<8x32xf32>, vector<8x32xf32> -> vector<16x32xf32>
    %c1_140 = arith.constant 1 : index
    %c0_141 = arith.constant 0 : index
    %c0_142 = arith.constant 0 : index
    %380 = vector.load %arg4[%c1_140, %c0_141, %c0_142] : memref<2x32x32xf32, #tpu.memory_space<vmem>>, vector<1x32x32xf32>
    %381 = vector.shape_cast %380 : vector<1x32x32xf32> to vector<32x32xf32>
    %c1_143 = arith.constant 1 : index
    %c0_144 = arith.constant 0 : index
    %c0_145 = arith.constant 0 : index
    %382 = vector.load %arg5[%c1_143, %c0_144, %c0_145] : memref<2x1x32xf32, #tpu.memory_space<vmem>>, vector<1x1x32xf32>
    %383 = vector.shape_cast %382 : vector<1x1x32xf32> to vector<1x32xf32>
    %384 = arith.truncf %379 : vector<16x32xf32> to vector<16x32xbf16>
    %385 = arith.truncf %381 : vector<32x32xf32> to vector<32x32xbf16>
    %cst_146 = arith.constant dense<0.000000e+00> : vector<16x32xf32>
    %386 = tpu.matmul %384, %385, %cst_146 {dimension_numbers = #tpu.dot_dimension_numbers<[1], [0], [0], [1], [0, 0, 1, 1], [], []>} : vector<16x32xbf16>, vector<32x32xbf16>, vector<16x32xf32> -> vector<16x32xf32>
    %387 = vector.broadcast %383 : vector<1x32xf32> to vector<16x32xf32>
    %388 = arith.addf %386, %387 : vector<16x32xf32>
    %389 = arith.addf %231, %388 : vector<16x32xf32>
    %c1_147 = arith.constant 1 : index
    %c0_148 = arith.constant 0 : index
    %c0_149 = arith.constant 0 : index
    %390 = vector.load %arg10[%c1_147, %c0_148, %c0_149] : memref<2x1x32xf32, #tpu.memory_space<vmem>>, vector<1x1x32xf32>
    %391 = vector.shape_cast %390 : vector<1x1x32xf32> to vector<1x32xf32>
    %c1_150 = arith.constant 1 : index
    %c0_151 = arith.constant 0 : index
    %c0_152 = arith.constant 0 : index
    %392 = vector.load %arg11[%c1_150, %c0_151, %c0_152] : memref<2x1x32xf32, #tpu.memory_space<vmem>>, vector<1x1x32xf32>
    %393 = vector.shape_cast %392 : vector<1x1x32xf32> to vector<1x32xf32>
    %cst_153 = arith.constant dense<0.000000e+00> : vector<16xf32>
    %394 = vector.multi_reduction <add>, %389, %cst_153 [1] : vector<16x32xf32> to vector<16xf32>
    %395 = vector.shape_cast %394 : vector<16xf32> to vector<16x1xf32>
    %cst_154 = arith.constant 3.200000e+01 : f32
    %396 = vector.broadcast %cst_154 : f32 to vector<16x1xf32>
    %397 = arith.divf %395, %396 : vector<16x1xf32>
    %398 = vector.broadcast %397 : vector<16x1xf32> to vector<16x32xf32>
    %399 = arith.subf %389, %398 : vector<16x32xf32>
    %400 = arith.mulf %399, %399 : vector<16x32xf32>
    %cst_155 = arith.constant dense<0.000000e+00> : vector<16xf32>
    %401 = vector.multi_reduction <add>, %400, %cst_155 [1] : vector<16x32xf32> to vector<16xf32>
    %402 = vector.shape_cast %401 : vector<16xf32> to vector<16x1xf32>
    %cst_156 = arith.constant 3.200000e+01 : f32
    %403 = vector.broadcast %cst_156 : f32 to vector<16x1xf32>
    %404 = arith.divf %402, %403 : vector<16x1xf32>
    %cst_157 = arith.constant 9.99999974E-6 : f32
    %405 = vector.broadcast %cst_157 : f32 to vector<16x1xf32>
    %406 = arith.addf %404, %405 : vector<16x1xf32>
    %407 = math.rsqrt %406 : vector<16x1xf32>
    %408 = vector.broadcast %407 : vector<16x1xf32> to vector<16x32xf32>
    %409 = arith.mulf %399, %408 : vector<16x32xf32>
    %410 = vector.broadcast %391 : vector<1x32xf32> to vector<16x32xf32>
    %411 = arith.mulf %409, %410 : vector<16x32xf32>
    %412 = vector.broadcast %393 : vector<1x32xf32> to vector<16x32xf32>
    %413 = arith.addf %411, %412 : vector<16x32xf32>
    %c1_158 = arith.constant 1 : index
    %c0_159 = arith.constant 0 : index
    %c0_160 = arith.constant 0 : index
    %414 = vector.load %arg6[%c1_158, %c0_159, %c0_160] : memref<2x32x2048xf32, #tpu.memory_space<vmem>>, vector<1x32x2048xf32>
    %415 = vector.shape_cast %414 : vector<1x32x2048xf32> to vector<32x2048xf32>
    %c1_161 = arith.constant 1 : index
    %c0_162 = arith.constant 0 : index
    %c0_163 = arith.constant 0 : index
    %416 = vector.load %arg7[%c1_161, %c0_162, %c0_163] : memref<2x1x2048xf32, #tpu.memory_space<vmem>>, vector<1x1x2048xf32>
    %417 = vector.shape_cast %416 : vector<1x1x2048xf32> to vector<1x2048xf32>
    %418 = arith.truncf %413 : vector<16x32xf32> to vector<16x32xbf16>
    %419 = arith.truncf %415 : vector<32x2048xf32> to vector<32x2048xbf16>
    %cst_164 = arith.constant dense<0.000000e+00> : vector<16x2048xf32>
    %420 = tpu.matmul %418, %419, %cst_164 {dimension_numbers = #tpu.dot_dimension_numbers<[1], [0], [0], [1], [0, 0, 1, 1], [], []>} : vector<16x32xbf16>, vector<32x2048xbf16>, vector<16x2048xf32> -> vector<16x2048xf32>
    %421 = vector.broadcast %417 : vector<1x2048xf32> to vector<16x2048xf32>
    %422 = arith.addf %420, %421 : vector<16x2048xf32>
    %cst_165 = arith.constant 0.000000e+00 : f32
    %423 = vector.broadcast %cst_165 : f32 to vector<16x2048xf32>
    %424 = arith.maximumf %422, %423 : vector<16x2048xf32>
    %c1_166 = arith.constant 1 : index
    %c0_167 = arith.constant 0 : index
    %c0_168 = arith.constant 0 : index
    %425 = vector.load %arg8[%c1_166, %c0_167, %c0_168] : memref<2x2048x32xf32, #tpu.memory_space<vmem>>, vector<1x2048x32xf32>
    %426 = vector.shape_cast %425 : vector<1x2048x32xf32> to vector<2048x32xf32>
    %c1_169 = arith.constant 1 : index
    %c0_170 = arith.constant 0 : index
    %c0_171 = arith.constant 0 : index
    %427 = vector.load %arg9[%c1_169, %c0_170, %c0_171] : memref<2x1x32xf32, #tpu.memory_space<vmem>>, vector<1x1x32xf32>
    %428 = vector.shape_cast %427 : vector<1x1x32xf32> to vector<1x32xf32>
    %429 = arith.truncf %424 : vector<16x2048xf32> to vector<16x2048xbf16>
    %430 = arith.truncf %426 : vector<2048x32xf32> to vector<2048x32xbf16>
    %cst_172 = arith.constant dense<0.000000e+00> : vector<16x32xf32>
    %431 = tpu.matmul %429, %430, %cst_172 {dimension_numbers = #tpu.dot_dimension_numbers<[1], [0], [0], [1], [0, 0, 1, 1], [], []>} : vector<16x2048xbf16>, vector<2048x32xbf16>, vector<16x32xf32> -> vector<16x32xf32>
    %432 = vector.broadcast %428 : vector<1x32xf32> to vector<16x32xf32>
    %433 = arith.addf %431, %432 : vector<16x32xf32>
    %434 = arith.addf %413, %433 : vector<16x32xf32>
    %c1_173 = arith.constant 1 : index
    %c0_174 = arith.constant 0 : index
    %c0_175 = arith.constant 0 : index
    %435 = vector.load %arg12[%c1_173, %c0_174, %c0_175] : memref<2x1x32xf32, #tpu.memory_space<vmem>>, vector<1x1x32xf32>
    %436 = vector.shape_cast %435 : vector<1x1x32xf32> to vector<1x32xf32>
    %c1_176 = arith.constant 1 : index
    %c0_177 = arith.constant 0 : index
    %c0_178 = arith.constant 0 : index
    %437 = vector.load %arg13[%c1_176, %c0_177, %c0_178] : memref<2x1x32xf32, #tpu.memory_space<vmem>>, vector<1x1x32xf32>
    %438 = vector.shape_cast %437 : vector<1x1x32xf32> to vector<1x32xf32>
    %cst_179 = arith.constant dense<0.000000e+00> : vector<16xf32>
    %439 = vector.multi_reduction <add>, %434, %cst_179 [1] : vector<16x32xf32> to vector<16xf32>
    %440 = vector.shape_cast %439 : vector<16xf32> to vector<16x1xf32>
    %cst_180 = arith.constant 3.200000e+01 : f32
    %441 = vector.broadcast %cst_180 : f32 to vector<16x1xf32>
    %442 = arith.divf %440, %441 : vector<16x1xf32>
    %443 = vector.broadcast %442 : vector<16x1xf32> to vector<16x32xf32>
    %444 = arith.subf %434, %443 : vector<16x32xf32>
    %445 = arith.mulf %444, %444 : vector<16x32xf32>
    %cst_181 = arith.constant dense<0.000000e+00> : vector<16xf32>
    %446 = vector.multi_reduction <add>, %445, %cst_181 [1] : vector<16x32xf32> to vector<16xf32>
    %447 = vector.shape_cast %446 : vector<16xf32> to vector<16x1xf32>
    %cst_182 = arith.constant 3.200000e+01 : f32
    %448 = vector.broadcast %cst_182 : f32 to vector<16x1xf32>
    %449 = arith.divf %447, %448 : vector<16x1xf32>
    %cst_183 = arith.constant 9.99999974E-6 : f32
    %450 = vector.broadcast %cst_183 : f32 to vector<16x1xf32>
    %451 = arith.addf %449, %450 : vector<16x1xf32>
    %452 = math.rsqrt %451 : vector<16x1xf32>
    %453 = vector.broadcast %452 : vector<16x1xf32> to vector<16x32xf32>
    %454 = arith.mulf %444, %453 : vector<16x32xf32>
    %455 = vector.broadcast %436 : vector<1x32xf32> to vector<16x32xf32>
    %456 = arith.mulf %454, %455 : vector<16x32xf32>
    %457 = vector.broadcast %438 : vector<1x32xf32> to vector<16x32xf32>
    %458 = arith.addf %456, %457 : vector<16x32xf32>
    %c0_184 = arith.constant 0 : index
    %c0_185 = arith.constant 0 : index
    %459 = vector.load %arg14[%c0_184, %c0_185] : memref<32x128xf32, #tpu.memory_space<vmem>>, vector<32x128xf32>
    %c0_186 = arith.constant 0 : index
    %c0_187 = arith.constant 0 : index
    %460 = vector.load %arg15[%c0_186, %c0_187] : memref<1x128xf32, #tpu.memory_space<vmem>>, vector<1x128xf32>
    %461 = arith.truncf %458 : vector<16x32xf32> to vector<16x32xbf16>
    %462 = arith.truncf %459 : vector<32x128xf32> to vector<32x128xbf16>
    %cst_188 = arith.constant dense<0.000000e+00> : vector<16x128xf32>
    %463 = tpu.matmul %461, %462, %cst_188 {dimension_numbers = #tpu.dot_dimension_numbers<[1], [0], [0], [1], [0, 0, 1, 1], [], []>} : vector<16x32xbf16>, vector<32x128xbf16>, vector<16x128xf32> -> vector<16x128xf32>
    %464 = vector.broadcast %460 : vector<1x128xf32> to vector<16x128xf32>
    %465 = arith.addf %463, %464 : vector<16x128xf32>
    %c0_189 = arith.constant 0 : index
    %c0_190 = arith.constant 0 : index
    %466 = vector.load %arg16[%c0_189, %c0_190] : memref<16x128xf32, #tpu.memory_space<vmem>>, vector<16x128xf32>
    tpu.vector_store %arg16[%c0_189, %c0_190], %465 {strides = array<i32>} : memref<16x128xf32, #tpu.memory_space<vmem>>, vector<16x128xf32>,
    return
  }
}

</mosaic_0001>

<bundles_post_ra>
// kernel: transformer_forward.1
= control target key start
LH: loop header
LB: loop body
LE: loop exit
PB: predicated region body
PF: predicated region fallthrough
CT: control target
= control target key end

     0   :  { %v10166_v0 = vmov 0.0   ;;  %vm7041_vm0 = vmmov 0   ;;  %vm76_vm1 = vcmask 261120   ;;  %s10156_s24 = smov 64   ;;  %s7043_s25 = smov 96   ;;  %vm124_vm2 = vcmask 64512   ;;  %s10129_s2 = inlined_call_operand.vmem [shape: f32[2,32,96], index: 2, kind: input, shape index: {}]   ;;  %s10130_s0 = inlined_call_operand.vmem [shape: f32[16,32], index: 0, kind: input, shape index: {}]   ;;  %s10131_s1 = inlined_call_operand.vmem [shape: f32[16,32], index: 1, kind: input, shape index: {}]   ;;  %s10132_s3 = inlined_call_operand.vmem [shape: f32[2,1,96], index: 3, kind: input, shape index: {}]   ;;  %s10133_s4 = inlined_call_operand.vmem [shape: f32[2,32,32], index: 4, kind: input, shape index: {}]   ;;  %s10134_s5 = inlined_call_operand.vmem [shape: f32[2,1,32], index: 5, kind: input, shape index: {}]   ;;  %s10135_s6 = inlined_call_operand.vmem [shape: f32[2,32,2048], index: 6, kind: input, shape index: {}]   ;;  %s10136_s10 = inlined_call_operand.vmem [shape: f32[2,1,32], index: 10, kind: input, shape index: {}]   ;;  %s10137_s11 = inlined_call_operand.vmem [shape: f32[2,1,32], index: 11, kind: input, shape index: {}]   ;;  %s10138_s8 = inlined_call_operand.vmem [shape: f32[2,2048,32], index: 8, kind: input, shape index: {}]   ;;  %s10139_s7 = inlined_call_operand.vmem [shape: f32[2,1,2048], index: 7, kind: input, shape index: {}]   ;;  %s10140_s9 = inlined_call_operand.vmem [shape: f32[2,1,32], index: 9, kind: input, shape index: {}]   ;;  %s10141_s12 = inlined_call_operand.vmem [shape: f32[2,1,32], index: 12, kind: input, shape index: {}]   ;;  %s10142_s13 = inlined_call_operand.vmem [shape: f32[2,1,32], index: 13, kind: input, shape index: {}]   ;;  %s10143_s14 = inlined_call_operand.vmem [shape: f32[32,128], index: 14, kind: input, shape index: {}]   ;;  %s10144_s15 = inlined_call_operand.vmem [shape: f32[1,128], index: 15, kind: input, shape index: {}]   ;;  %s10145_s16 = inlined_call_operand.vmem [shape: f32[16,128], index: 16, kind: output, shape index: {}]  }
   0x1   :  { %10168 = sst [smem:[#allocation2_spill]] %s10129_s2  ;;  %6713 = vmatprep.subr.bf16.mxu0 %v10166_v0  ;;  %6717 = vmatprep.mubr.msk.bf16.mxu0 %vm7041_vm0, %v10166_v0  ;;  %v54_v6 = vld [vmem:[%s10130_s0] sm:$0xff]  ;;  %v55_v7 = vld [vmem:[%s10130_s0 + $0x8] sm:$0xff]  ;;  %s7044_s26 = smov 88   ;;  %vm798_vm3 = vcmask 130048   ;;  %vm800_vm4 = vcmask 195584  }
   0x2   :  { %s10169_s23 = sld [smem:[#allocation2_spill]]  ;;  %6721 = vmatprep.subr.mxu1 %v10166_v0  ;;  %6723 = vmatprep.mubr.msk.f32.mxu1 %vm7041_vm0, %v10166_v0  ;;  %v56_v8 = vmul.f32 5.656854, %v54_v6  ;;  %v57_v9 = vmul.f32 5.656854, %v55_v7  ;;  %v58_v10 = vld [vmem:[%s10131_s1] sm:$0xff] }
   0x3   :  { %v59_v11 = vld [vmem:[%s10131_s1 + $0x8] sm:$0xff]  ;;  %v5861_v16 = vld [vmem:[%s10132_s3] ss:$0 sm:$0xff]  ;;  %s7045_s27 = smov 120   ;;  %s7046_s28 = smov 80  }
   0x4   :  { %v7173_v13 = vadd.f32 %v58_v10, %v56_v8  ;;  %v7175_v14 = vadd.f32 %v59_v11, %v57_v9  ;;  %s10162_s29 = smov 112   ;;  %s10158_s30 = smov 104  }
   0x5   :  { %s10160_s2 = smov 72   ;;  %s10151_s17 = smov 48  }
   0x6   :  { %v67_v15 = vpack.c.bf16 %v7175_v14, %v7173_v13  ;;  %s10147_s18 = smov 40   ;;  %s10149_s19 = smov 56  }
   0x7   :  { %s10155_s20 = smov 8   ;;  %s10154_s21 = smov 16  }
   0x8   :  { %v62_v1 = vld [vmem:[%s10169_s23] sm:$0xff]  ;;  %v63_v2 = vld [vmem:[%s10169_s23 + $0x8] sm:$0xff]  ;;  %v64_v3 = vld [vmem:[%s10169_s23 + $0x10] sm:$0xff] }
   0x9   :  { %v68_v4 = vpack.c.bf16 %v63_v2, %v62_v1  ;;  %v65_v5 = vld [vmem:[%s10169_s23 + $0x18] sm:$0xff] }
   0xa   :  { %v69_v12 = vpack.c.bf16 %v65_v5, %v64_v3 }
   0xb   :  { %6714 = vmatpush3.bf16.msra.mxu0 %v68_v4 }
   0xc   :  { %6715 = vmatprep.subr.bf16.mxu0 %v10166_v0 }
   0xf   :  { %6716 = vmatpush3.bf16.msra.mxu0 %v69_v12 }
  0x10   :  { %6736 = vmatprep.subr.mxu0 %v10166_v0 }
  0x12   :  { %6718 = vmatmul.mubr.msk.bf16.vlgmr.msra.gmra.mrb[0].mxu0 %vm76_vm1, %v67_v15 }
  0x13   :  { %6738 = vmatprep.mubr.msk.f32.mxu0 %vm7041_vm0, %v10166_v0 }
  0xe5   :  { %v114_v17 = vpop.f32.mrb[0].mxu0 }
  0xe6   :  { %v7186_v18 = vadd.f32 %v5861_v16, %v114_v17  ;;  %v6719_v19 = vpop.f32.mrb[1].mxu0 }
  0xe7   :  { %v117_v20 = vpop.f32.mrb[2].mxu0 }
  0xe8   :  { %v7188_v21 = vadd.f32 %v5861_v16, %v117_v20  ;;  %211 = vrot.lane.b32.xlu1 %v7186_v18, %s10156_s24  ;;  %122 = vrot.lane.b32.xlu0 %v7186_v18, %s7043_s25  ;;  %v6720_v22 = vpop.f32.mrb[3].mxu0 }
  0xec   :  { %289 = vrot.lane.b32.xlu1 %v7186_v18, %s7044_s26 }
  0xf0   :  { %287 = vrot.lane.b32.xlu1 %v7186_v18, %s7045_s27 }
  0xf4   :  { %455 = vrot.lane.b32.xlu1 %v7186_v18, %s7046_s28 }
  0xf8   :  { %453 = vrot.lane.b32.xlu1 %v7186_v18, %s10162_s29 }
  0xfc   :  { %619 = vrot.lane.b32.xlu1 %v7186_v18, %s10158_s30 }
 0x15a   :  { %v123_v23 = vpop.permute.xlu0 %122  ;;  %v212_v24 = vpop.permute.xlu1 %211 }
 0x15b   :  { %6722 = vmatpush3.xpose.msk.msra.mxu1 %vm124_vm2, %v123_v23 }
 0x15c   :  { %6726 = vmatprep.subr.mxu1 %v10166_v0 }
 0x15e   :  { %6724 = vmatmul.mubr.msk.f32.vlgmr.msra.gmra.mrb[0].mxu1 %vm124_vm2, %v7186_v18  ;;  %v290_v34 = vpop.permute.xlu1 %289 }
 0x15f   :  { %6727 = vmatpush3.msra.mxu1 %v212_v24  ;;  %6728 = vmatprep.mubr.msk.f32.mxu1 %vm7041_vm0, %v10166_v0 }
 0x160   :  { %6731 = vmatprep.subr.mxu1 %v10166_v0 }
 0x162   :  { %v288_v35 = vpop.permute.xlu1 %287 }
 0x166   :  { %v456_v36 = vpop.permute.xlu1 %455 }
 0x16a   :  { %v454_v37 = vpop.permute.xlu1 %453 }
 0x16e   :  { %v620_v38 = vpop.permute.xlu1 %619 }
 0x231   :  { %v195_v25 = vpop.f32.mrb[0].mxu1 }
 0x232   :  { %v199_v26 = vmul.f32 0.35355338, %v195_v25  ;;  %v6725_v27 = vpop.f32.mrb[1].mxu1 }
 0x234   :  { %v200_v28 = vsel %vm124_vm2, %v199_v26, -inf }
 0x235   :  { %201 = vmax.xlane.f32.xlu0 %v200_v28 }
 0x24b   :  { %621 = vrot.lane.b32.xlu0 %v7186_v18, %s10160_s2 }
 0x24f   :  { %1133 = vrot.lane.b32.xlu0 %v7188_v21, %s10162_s29  ;;  %s10174_s29 = smov 104  }
 0x253   :  { %1299 = vrot.lane.b32.xlu0 %v7188_v21, %s10158_s30  ;;  %s10182_s30 = smov 24  }
 0x2c2   :  { %v202_v29 = vpop.xlane.xlu0 %201 }
 0x2c3   :  { %v203_v30 = vsub.f32 %v199_v26, %v202_v29 }
 0x2c5   :  { %v204_v31 = vmul.f32 1.442695, %v203_v30 }
 0x2c6   :  { %v622_v44 = vpop.permute.xlu0 %621 }
 0x2c7   :  { %6960 = vpow2.f32 %v204_v31 }
 0x2ca   :  { %v1134_v47 = vpop.permute.xlu0 %1133 }
 0x2ce   :  { %v1300_v49 = vpop.permute.xlu0 %1299 }
 0x2d1   :  { %v6961_v32 = vpop.eup %6960 }
 0x2d2   :  { %v206_v33 = vsel %vm124_vm2, %v6961_v32, 0.0 }
 0x2d3   :  { %207 = vadd.xlane.f32.xlu1 %v206_v33 }
 0x2e4   :  { %803 = vrot.lane.b32.xlu1 %v7188_v21, %s7043_s25 }
 0x2e8   :  { %969 = vrot.lane.b32.xlu1 %v7188_v21, %s7044_s26 }
 0x2ec   :  { %967 = vrot.lane.b32.xlu1 %v7188_v21, %s7045_s27 }
 0x2f0   :  { %1135 = vrot.lane.b32.xlu1 %v7188_v21, %s7046_s28 }
 0x2f4   :  { %1301 = vrot.lane.b32.xlu1 %v7188_v21, %s10160_s2  ;;  %s10172_s2 = smov 112  }
 0x360   :  { %v208_v39 = vpop.xlane.xlu1 %207 }
 0x361   :  { %6962 = vrcp.f32 %v208_v39 }
 0x364   :  { %v804_v42 = vpop.permute.xlu1 %803 }
 0x368   :  { %v970_v43 = vpop.permute.xlu1 %969 }
 0x36b   :  { %v6963_v40 = vpop.eup %6962 }
 0x36c   :  { %v210_v41 = vmul.f32 %v6963_v40, %v6961_v32  ;;  %v968_v45 = vpop.permute.xlu1 %967 }
 0x36e   :  { %6729 = vmatmul.mubr.msk.f32.vlgmr.msra.gmra.mrb[2].mxu1 %vm124_vm2, %v210_v41 }
 0x36f   :  { %6732 = vmatpush3.xpose.msk.msra.mxu1 %vm124_vm2, %v290_v34  ;;  %6733 = vmatprep.mubr.msk.f32.mxu1 %vm7041_vm0, %v10166_v0 }
 0x370   :  { %6741 = vmatprep.subr.mxu1 %v10166_v0  ;;  %v1136_v46 = vpop.permute.xlu1 %1135 }
 0x372   :  { %6734 = vmatmul.mubr.msk.f32.vlgmr.msra.gmra.mrb[4].mxu1 %vm124_vm2, %v288_v35 }
 0x373   :  { %6742 = vmatpush3.xpose.msk.msra.mxu1 %vm124_vm2, %v456_v36  ;;  %6743 = vmatprep.mubr.msk.f32.mxu1 %vm7041_vm0, %v10166_v0 }
 0x374   :  { %6751 = vmatprep.subr.mxu1 %v10166_v0  ;;  %v1302_v48 = vpop.permute.xlu1 %1301 }
 0x376   :  { %6744 = vmatmul.mubr.msk.f32.vlgmr.msra.gmra.mrb[6].mxu1 %vm124_vm2, %v454_v37 }
 0x377   :  { %6752 = vmatpush3.xpose.msk.msra.mxu1 %vm124_vm2, %v622_v44  ;;  %6753 = vmatprep.mubr.msk.f32.mxu1 %vm7041_vm0, %v10166_v0 }
 0x378   :  { %6761 = vmatprep.subr.mxu1 %v10166_v0 }
 0x37a   :  { %6754 = vmatmul.mubr.msk.f32.vlgmr.msra.gmra.mrb[8].mxu1 %vm124_vm2, %v620_v38 }
 0x37b   :  { %6762 = vmatpush3.xpose.msk.msra.mxu1 %vm124_vm2, %v804_v42  ;;  %6763 = vmatprep.mubr.msk.f32.mxu1 %vm7041_vm0, %v10166_v0 }
 0x37c   :  { %6771 = vmatprep.subr.mxu1 %v10166_v0 }
 0x37e   :  { %6764 = vmatmul.mubr.msk.f32.vlgmr.msra.gmra.mrb[10].mxu1 %vm124_vm2, %v7188_v21 }
 0x37f   :  { %6772 = vmatpush3.xpose.msk.msra.mxu1 %vm124_vm2, %v970_v43  ;;  %6773 = vmatprep.mubr.msk.f32.mxu1 %vm7041_vm0, %v10166_v0 }
 0x380   :  { %6781 = vmatprep.subr.mxu1 %v10166_v0 }
 0x382   :  { %6774 = vmatmul.mubr.msk.f32.vlgmr.msra.gmra.mrb[12].mxu1 %vm124_vm2, %v968_v45 }
 0x383   :  { %6782 = vmatpush3.xpose.msk.msra.mxu1 %vm124_vm2, %v1136_v46  ;;  %6783 = vmatprep.mubr.msk.f32.mxu1 %vm7041_vm0, %v10166_v0 }
 0x384   :  { %6791 = vmatprep.subr.mxu1 %v10166_v0 }
 0x386   :  { %6784 = vmatmul.mubr.msk.f32.vlgmr.msra.gmra.mrb[14].mxu1 %vm124_vm2, %v1134_v47 }
 0x387   :  { %6792 = vmatpush3.xpose.msk.msra.mxu1 %vm124_vm2, %v1302_v48  ;;  %6793 = vmatprep.mubr.msk.f32.mxu1 %vm7041_vm0, %v10166_v0 }
 0x388   :  { %6801 = vmatprep.subr.bf16.mxu1 %v10166_v0 }
 0x38a   :  { %6794 = vmatmul.mubr.msk.f32.vlgmr.msra.gmra.mrb[16].mxu1 %vm124_vm2, %v1300_v49 }
 0x38b   :  { %6805 = vmatprep.mubr.msk.bf16.mxu1 %vm7041_vm0, %v10166_v0 }
 0x441   :  { %v7268_v50 = vpop.f32.mrb[2].mxu1 }
 0x442   :  { %v6730_v51 = vpop.f32.mrb[3].mxu1 }
 0x445   :  { %v361_v52 = vpop.f32.mrb[4].mxu1 }
 0x446   :  { %v365_v53 = vmul.f32 0.35355338, %v361_v52  ;;  %v6735_v54 = vpop.f32.mrb[5].mxu1 }
 0x448   :  { %v366_v55 = vsel %vm124_vm2, %v365_v53, -inf }
 0x449   :  { %v527_v56 = vpop.f32.mrb[6].mxu1  ;;  %367 = vmax.xlane.f32.xlu1 %v366_v55 }
 0x44a   :  { %v531_v57 = vmul.f32 0.35355338, %v527_v56  ;;  %v6745_v58 = vpop.f32.mrb[7].mxu1 }
 0x44c   :  { %v532_v59 = vsel %vm124_vm2, %v531_v57, -inf }
 0x44d   :  { %v693_v60 = vpop.f32.mrb[8].mxu1  ;;  %533 = vmax.xlane.f32.xlu0 %v532_v59 }
 0x44e   :  { %v697_v61 = vmul.f32 0.35355338, %v693_v60  ;;  %v6755_v62 = vpop.f32.mrb[9].mxu1 }
 0x450   :  { %v698_v63 = vsel %vm124_vm2, %v697_v61, -inf }
 0x451   :  { %699 = vmax.xlane.f32.xlu0 %v698_v63  ;;  %v875_v1 = vpop.f32.mrb[10].mxu1 }
 0x452   :  { %v879_v2 = vmul.f32 0.35355338, %v875_v1  ;;  %v6765_v3 = vpop.f32.mrb[11].mxu1 }
 0x454   :  { %v880_v4 = vsel %vm124_vm2, %v879_v2, -inf }
 0x455   :  { %881 = vmax.xlane.f32.xlu1 %v880_v4  ;;  %v1041_v5 = vpop.f32.mrb[12].mxu1 }
 0x456   :  { %v1045_v6 = vmul.f32 0.35355338, %v1041_v5  ;;  %v6775_v7 = vpop.f32.mrb[13].mxu1 }
 0x458   :  { %v1046_v8 = vsel %vm124_vm2, %v1045_v6, -inf }
 0x459   :  { %1047 = vmax.xlane.f32.xlu0 %v1046_v8  ;;  %v1207_v9 = vpop.f32.mrb[14].mxu1 }
 0x45a   :  { %v1211_v10 = vmul.f32 0.35355338, %v1207_v9  ;;  %v6785_v11 = vpop.f32.mrb[15].mxu1 }
 0x45c   :  { %v1212_v12 = vsel %vm124_vm2, %v1211_v10, -inf }
 0x45d   :  { %1213 = vmax.xlane.f32.xlu1 %v1212_v12  ;;  %v1373_v15 = vpop.f32.mrb[16].mxu1 }
 0x45e   :  { %v1377_v16 = vmul.f32 0.35355338, %v1373_v15  ;;  %v6795_v17 = vpop.f32.mrb[17].mxu1 }
 0x460   :  { %v1378_v19 = vsel %vm124_vm2, %v1377_v16, -inf }
 0x461   :  { %1379 = vmax.xlane.f32.xlu0 %v1378_v19 }
 0x46e   :  { %543 = vrot.lane.b32.xlu1 %v7186_v18, %s10151_s17 }
 0x472   :  { %709 = vrot.lane.b32.xlu1 %v7186_v18, %s10147_s18 }
 0x477   :  { %377 = vrot.lane.b32.xlu0 %v7186_v18, %s10149_s19 }
 0x4d6   :  { %v368_v20 = vpop.xlane.xlu1 %367 }
 0x4d7   :  { %v369_v22 = vsub.f32 %v365_v53, %v368_v20 }
 0x4d9   :  { %v370_v23 = vmul.f32 1.442695, %v369_v22 }
 0x4da   :  { %v534_v24 = vpop.xlane.xlu0 %533 }
 0x4db   :  { %6964 = vpow2.f32 %v370_v23  ;;  %v535_v25 = vsub.f32 %v531_v57, %v534_v24 }
 0x4dd   :  { %v536_v26 = vmul.f32 1.442695, %v535_v25 }
 0x4de   :  { %v700_v28 = vpop.xlane.xlu0 %699 }
 0x4df   :  { %6966 = vpow2.f32 %v536_v26  ;;  %v701_v34 = vsub.f32 %v697_v61, %v700_v28 }
 0x4e1   :  { %v702_v37 = vmul.f32 1.442695, %v701_v34  ;;  %v1482_v34 = vld [vmem:[%s10133_s4 + $0x10] sm:$0xff] }
 0x4e2   :  { %v882_v35 = vpop.xlane.xlu1 %881 }
 0x4e3   :  { %v883_v36 = vsub.f32 %v879_v2, %v882_v35  ;;  %6968 = vpow2.f32 %v702_v37  ;;  %v1483_v35 = vld [vmem:[%s10133_s4 + $0x18] sm:$0xff] }
 0x4e5   :  { %v6965_v27 = vpop.eup %6964  ;;  %v884_v40 = vmul.f32 1.442695, %v883_v36  ;;  %v1487_v36 = vpack.c.bf16 %v1483_v35, %v1482_v34  ;;  %v1620_v34 = vld [vmem:[%s10135_s6 + $0x118] sm:$0xff] }
 0x4e6   :  { %v372_v29 = vsel %vm124_vm2, %v6965_v27, 0.0  ;;  %v1048_v31 = vpop.xlane.xlu0 %1047 }
 0x4e7   :  { %373 = vadd.xlane.f32.xlu1 %v372_v29  ;;  %v1049_v38 = vsub.f32 %v1045_v6, %v1048_v31  ;;  %6970 = vpow2.f32 %v884_v40  ;;  %v1481_v31 = vld [vmem:[%s10133_s4 + $0x8] sm:$0xff] }
 0x4e9   :  { %v6967_v30 = vpop.eup %6966  ;;  %v1050_v42 = vmul.f32 1.442695, %v1049_v38 }
 0x4ea   :  { %v538_v32 = vsel %vm124_vm2, %v6967_v30, 0.0  ;;  %v1214_v39 = vpop.xlane.xlu1 %1213 }
 0x4eb   :  { %539 = vadd.xlane.f32.xlu0 %v538_v32  ;;  %v1215_v41 = vsub.f32 %v1211_v10, %v1214_v39  ;;  %6972 = vpow2.f32 %v1050_v42 }
 0x4ed   :  { %v1216_v44 = vmul.f32 1.442695, %v1215_v41  ;;  %v6969_v46 = vpop.eup %6968 }
 0x4ee   :  { %v1380_v33 = vpop.xlane.xlu0 %1379  ;;  %v704_v48 = vsel %vm124_vm2, %v6969_v46, 0.0  ;;  %v544_v57 = vpop.permute.xlu1 %543 }
 0x4ef   :  { %v1381_v43 = vsub.f32 %v1377_v16, %v1380_v33  ;;  %6974 = vpow2.f32 %v1216_v44 }
 0x4f1   :  { %v1382_v45 = vmul.f32 1.442695, %v1381_v43  ;;  %v6971_v47 = vpop.eup %6970 }
 0x4f2   :  { %v378_v18 = vpop.permute.xlu0 %377  ;;  %v886_v53 = vsel %vm124_vm2, %v6971_v47, 0.0  ;;  %v710_v58 = vpop.permute.xlu1 %709 }
 0x4f3   :  { %6737 = vmatpush3.msra.mxu0 %v378_v18  ;;  %6976 = vpow2.f32 %v1382_v45 }
 0x4f4   :  { %6746 = vmatprep.subr.mxu0 %v10166_v0 }
 0x4f5   :  { %v6973_v49 = vpop.eup %6972 }
 0x4f6   :  { %v1052_v52 = vsel %vm124_vm2, %v6973_v49, 0.0 }
 0x4f8   :  { %1057 = vrot.lane.b32.xlu1 %v7188_v21, %s10149_s19 }
 0x4f9   :  { %v6975_v51 = vpop.eup %6974 }
 0x4fa   :  { %v1218_v56 = vsel %vm124_vm2, %v6975_v51, 0.0 }
 0x4fd   :  { %v7293_v54 = vpop.eup %6976 }
 0x4fe   :  { %v1384_v55 = vsel %vm124_vm2, %v7293_v54, 0.0 }
 0x501   :  { %891 = vrot.lane.b32.xlu0 %v7188_v21, %s10156_s24  ;;  %s10181_s24 = smov 16  }
 0x51c   :  { %705 = vadd.xlane.f32.xlu1 %v704_v48 }
 0x520   :  { %1053 = vadd.xlane.f32.xlu1 %v1052_v52  ;;  %887 = vadd.xlane.f32.xlu0 %v886_v53 }
 0x524   :  { %1385 = vadd.xlane.f32.xlu1 %v1384_v55  ;;  %1219 = vadd.xlane.f32.xlu0 %v1218_v56 }
 0x535   :  { %1389 = vrot.lane.b32.xlu1 %v7188_v21, %s10147_s18  ;;  %s10153_s18 = smov 24  }
 0x53a   :  { %1223 = vrot.lane.b32.xlu0 %v7188_v21, %s10151_s17  ;;  %s10180_s17 = smov 8  }
 0x574   :  { %v374_v59 = vpop.xlane.xlu1 %373 }
 0x575   :  { %6978 = vrcp.f32 %v374_v59 }
 0x578   :  { %v540_v60 = vpop.xlane.xlu0 %539  ;;  %v1058_v21 = vpop.permute.xlu1 %1057 }
 0x579   :  { %6980 = vrcp.f32 %v540_v60 }
 0x57c   :  { %v892_v2 = vpop.permute.xlu0 %891 }
 0x57f   :  { %v6979_v61 = vpop.eup %6978 }
 0x580   :  { %v376_v62 = vmul.f32 %v6979_v61, %v6965_v27 }
 0x582   :  { %6739 = vmatmul.mubr.msk.f32.vlgmr.msra.gmra.mrb[4].mxu0 %vm124_vm2, %v376_v62 }
 0x583   :  { %v6981_v63 = vpop.eup %6980  ;;  %6747 = vmatpush3.msra.mxu0 %v544_v57  ;;  %6748 = vmatprep.mubr.msk.f32.mxu0 %vm7041_vm0, %v10166_v0 }
 0x584   :  { %v542_v1 = vmul.f32 %v6981_v63, %v6967_v30  ;;  %6756 = vmatprep.subr.mxu0 %v10166_v0  ;;  %v1480_v30 = vld [vmem:[%s10133_s4] sm:$0xff] }
 0x585   :  { %v1486_v32 = vpack.c.bf16 %v1481_v31, %v1480_v30  ;;  %v5887_v63 = vld [vmem:[%s10134_s5] ss:$0 sm:$0xff]  ;;  %v1587_v30 = vld [vmem:[%s10135_s6 + $0x10] sm:$0xff] }
 0x586   :  { %6749 = vmatmul.mubr.msk.f32.vlgmr.msra.gmra.mrb[6].mxu0 %vm124_vm2, %v542_v1  ;;  %v1603_v31 = vld [vmem:[%s10135_s6 + $0x90] sm:$0xff] }
 0x587   :  { %6757 = vmatpush3.msra.mxu0 %v710_v58  ;;  %6758 = vmatprep.mubr.msk.f32.mxu0 %vm7041_vm0, %v10166_v0 }
 0x588   :  { %6766 = vmatprep.subr.mxu0 %v10166_v0  ;;  %6802 = vmatpush3.bf16.msra.mxu1 %v1486_v32  ;;  %v1654_v32 = vpack.c.bf16 %v1603_v31, %v1587_v30 }
 0x589   :  { %6803 = vmatprep.subr.bf16.mxu1 %v10166_v0 }
 0x58c   :  { %6804 = vmatpush3.bf16.msra.mxu1 %v1487_v36  ;;  %v1636_v36 = vld [vmem:[%s10135_s6 + $0x198] sm:$0xff] }
 0x5a9   :  { %v706_v3 = vpop.xlane.xlu1 %705 }
 0x5aa   :  { %6982 = vrcp.f32 %v706_v3 }
 0x5ad   :  { %v888_v4 = vpop.xlane.xlu0 %887  ;;  %v1054_v5 = vpop.xlane.xlu1 %1053 }
 0x5ae   :  { %6984 = vrcp.f32 %v888_v4 }
 0x5af   :  { %6986 = vrcp.f32 %v1054_v5 }
 0x5b1   :  { %v1220_v6 = vpop.xlane.xlu0 %1219  ;;  %v1386_v9 = vpop.xlane.xlu1 %1385 }
 0x5b2   :  { %6988 = vrcp.f32 %v1220_v6 }
 0x5b3   :  { %6990 = vrcp.f32 %v1386_v9 }
 0x5b4   :  { %v6983_v7 = vpop.eup %6982 }
 0x5b5   :  { %v708_v8 = vmul.f32 %v6983_v7, %v6969_v46  ;;  %v1224_v17 = vpop.permute.xlu0 %1223  ;;  %v1390_v22 = vpop.permute.xlu1 %1389 }
 0x5b7   :  { %6759 = vmatmul.mubr.msk.f32.vlgmr.msra.gmra.mrb[8].mxu0 %vm124_vm2, %v708_v8 }
 0x5b8   :  { %v6985_v10 = vpop.eup %6984  ;;  %6767 = vmatpush3.msra.mxu0 %v892_v2  ;;  %6768 = vmatprep.mubr.msk.f32.mxu0 %vm7041_vm0, %v10166_v0 }
 0x5b9   :  { %v890_v11 = vmul.f32 %v6985_v10, %v6971_v47  ;;  %6776 = vmatprep.subr.mxu0 %v10166_v0  ;;  %v6987_v12 = vpop.eup %6986 }
 0x5ba   :  { %v1056_v15 = vmul.f32 %v6987_v12, %v6973_v49 }
 0x5bb   :  { %6769 = vmatmul.mubr.msk.f32.vlgmr.msra.gmra.mrb[10].mxu0 %vm124_vm2, %v890_v11 }
 0x5bc   :  { %6777 = vmatpush3.msra.mxu0 %v1058_v21  ;;  %6778 = vmatprep.mubr.msk.f32.mxu0 %vm7041_vm0, %v10166_v0  ;;  %v6989_v16 = vpop.eup %6988 }
 0x5bd   :  { %6786 = vmatprep.subr.mxu0 %v10166_v0  ;;  %v1222_v19 = vmul.f32 %v6989_v16, %v6975_v51  ;;  %v6991_v20 = vpop.eup %6990 }
 0x5be   :  { %v1388_v23 = vmul.f32 %v6991_v20, %v7293_v54  ;;  %v1586_v20 = vld [vmem:[%s10135_s6 + $0x8] sm:$0xff] }
 0x5bf   :  { %6779 = vmatmul.mubr.msk.f32.vlgmr.msra.gmra.mrb[12].mxu0 %vm124_vm2, %v1056_v15 }
 0x5c0   :  { %6787 = vmatpush3.msra.mxu0 %v1224_v17  ;;  %6788 = vmatprep.mubr.msk.f32.mxu0 %vm7041_vm0, %v10166_v0 }
 0x5c1   :  { %6796 = vmatprep.subr.mxu0 %v10166_v0 }
 0x5c3   :  { %6789 = vmatmul.mubr.msk.f32.vlgmr.msra.gmra.mrb[14].mxu0 %vm124_vm2, %v1222_v19 }
 0x5c4   :  { %6797 = vmatpush3.msra.mxu0 %v1390_v22  ;;  %6798 = vmatprep.mubr.msk.f32.mxu0 %vm7041_vm0, %v10166_v0  ;;  %v1602_v22 = vld [vmem:[%s10135_s6 + $0x88] sm:$0xff] }
 0x5c7   :  { %6799 = vmatmul.mubr.msk.f32.vlgmr.msra.gmra.mrb[16].mxu0 %vm124_vm2, %v1388_v23  ;;  %v1588_v23 = vld [vmem:[%s10135_s6 + $0x18] sm:$0xff] }
 0x655   :  { %v449_v24 = vpop.f32.mrb[4].mxu0 }
 0x656   :  { %v6740_v25 = vpop.f32.mrb[5].mxu0 }
 0x657   :  { %v1604_v25 = vld [vmem:[%s10135_s6 + $0x98] sm:$0xff] }
 0x659   :  { %v615_v26 = vpop.f32.mrb[6].mxu0 }
 0x65a   :  { %v6750_v27 = vpop.f32.mrb[7].mxu0 }
 0x65b   :  { %v1601_v27 = vld [vmem:[%s10135_s6 + $0x80] sm:$0xff] }
 0x68a   :  { %v781_v28 = vpop.f32.mrb[8].mxu0 }
 0x68b   :  { %v6760_v29 = vpop.f32.mrb[9].mxu0 }
 0x68e   :  { %v963_v33 = vpop.f32.mrb[10].mxu0 }
 0x68f   :  { %v6770_v18 = vpop.f32.mrb[11].mxu0 }
 0x690   :  { %v1634_v18 = vld [vmem:[%s10135_s6 + $0x188] sm:$0xff] }
 0x692   :  { %v1129_v37 = vpop.f32.mrb[12].mxu0 }
 0x693   :  { %v6930_v38 = vpack.i.bf16 %v1129_v37, %v449_v24  ;;  %v6780_v39 = vpop.f32.mrb[13].mxu0  ;;  %v1653_v24 = vpack.c.bf16 %v1602_v22, %v1586_v20  ;;  %v1617_v37 = vld [vmem:[%s10135_s6 + $0x100] sm:$0xff]  ;;  %v1639_v20 = vld [vmem:[%s10135_s6 + $0x1b0] sm:$0xff]  ;;  %v1594_v22 = vld [vmem:[%s10135_s6 + $0x48] sm:$0xff] }
 0x694   :  { %v1671_v39 = vpack.c.bf16 %v1636_v36, %v1620_v34  ;;  %v1642_v34 = vld [vmem:[%s10135_s6 + $0x1c8] sm:$0xff]  ;;  %v1644_v36 = vld [vmem:[%s10135_s6 + $0x1d8] sm:$0xff] }
 0x695   :  { %6931 = vrot.lane.b32.xlu0 %v6930_v38, %s10155_s20  ;;  %1769 = vmatprep.subr.bf16.mxu0 %v1653_v24  ;;  %v1633_v38 = vld [vmem:[%s10135_s6 + $0x180] sm:$0xff]  ;;  %v1596_v24 = vld [vmem:[%s10135_s6 + $0x58] sm:$0xff]  ;;  %s10175_s20 = smov 64  }
 0x696   :  { %v1295_v40 = vpop.f32.mrb[14].mxu0 }
 0x697   :  { %v6935_v41 = vpack.i.bf16 %v1295_v40, %v615_v26  ;;  %v6790_v42 = vpop.f32.mrb[15].mxu0  ;;  %v1585_v26 = vld [vmem:[%s10135_s6] sm:$0xff]  ;;  %v1668_v40 = vpack.c.bf16 %v1633_v38, %v1617_v37 }
 0x698   :  { %v1652_v29 = vpack.c.bf16 %v1601_v27, %v1585_v26  ;;  %v1635_v42 = vld [vmem:[%s10135_s6 + $0x190] sm:$0xff] }
 0x699   :  { %6936 = vrot.lane.b32.xlu1 %v6935_v41, %s10154_s21  ;;  %v1619_v41 = vld [vmem:[%s10135_s6 + $0x110] sm:$0xff] }
 0x69a   :  { %v1461_v43 = vpop.f32.mrb[16].mxu0  ;;  %1770 = vmatpush1.bf16.msra.mxu0 %v1652_v29  ;;  %v1609_v29 = vld [vmem:[%s10135_s6 + $0xc0] sm:$0xff] }
 0x69b   :  { %v6940_v44 = vpack.i.bf16 %v1461_v43, %v781_v28  ;;  %v6800_v45 = vpop.f32.mrb[17].mxu0  ;;  %v1655_v28 = vpack.c.bf16 %v1604_v25, %v1588_v23  ;;  %v1670_v43 = vpack.c.bf16 %v1635_v42, %v1619_v41  ;;  %v1610_v23 = vld [vmem:[%s10135_s6 + $0xc8] sm:$0xff]  ;;  %v1612_v25 = vld [vmem:[%s10135_s6 + $0xd8] sm:$0xff] }
 0x69c   :  { %v1606_v45 = vld [vmem:[%s10135_s6 + $0xa8] sm:$0xff]  ;;  %v1661_v30 = vpack.c.bf16 %v1610_v23, %v1594_v22  ;;  %v1663_v31 = vpack.c.bf16 %v1612_v25, %v1596_v24  ;;  %v2163_v23 = vld [vmem:[%s10138_s8 + $0x90] sm:$0xff]  ;;  %v2164_v24 = vld [vmem:[%s10138_s8 + $0x98] sm:$0xff] }
 0x69d   :  { %6941 = vrot.lane.b32.xlu0 %v6940_v44, %s10153_s18  ;;  %1812 = vmatprep.subr.bf16.mxu1 %v1655_v28  ;;  %v1590_v44 = vld [vmem:[%s10135_s6 + $0x28] sm:$0xff]  ;;  %v1593_v28 = vld [vmem:[%s10135_s6 + $0x40] sm:$0xff]  ;;  %v2195_v25 = vld [vmem:[%s10138_s8 + $0x190] sm:$0xff] }
 0x69e   :  { %v1660_v37 = vpack.c.bf16 %v1609_v29, %v1593_v28  ;;  %v2178_v22 = vld [vmem:[%s10138_s8 + $0x108] sm:$0xff]  ;;  %v2147_v29 = vld [vmem:[%s10138_s8 + $0x10] sm:$0xff] }
 0x707   :  { %v6932_v46 = vpop.permute.xlu0 %6931 }
 0x708   :  { %v6934_v48 = vunpack.i.h.bf16 %v6932_v46  ;;  %v6933_v49 = vunpack.i.l.bf16 %v6932_v46  ;;  %v1592_v46 = vld [vmem:[%s10135_s6 + $0x38] sm:$0xff] }
 0x70a   :  { %v1477_v54 = vsel %vm124_vm2, %v963_v33, %v6934_v48  ;;  %v797_v55 = vsel %vm124_vm2, %v7268_v50, %v6933_v49  ;;  %v1618_v33 = vld [vmem:[%s10135_s6 + $0x108] sm:$0xff]  ;;  %v1657_v48 = vpack.c.bf16 %v1606_v45, %v1590_v44  ;;  %v1608_v49 = vld [vmem:[%s10135_s6 + $0xb8] sm:$0xff]  ;;  %v1643_v44 = vld [vmem:[%s10135_s6 + $0x1d0] sm:$0xff] }
 0x70b   :  { %v6937_v47 = vpop.permute.xlu1 %6936  ;;  %v1669_v35 = vpack.c.bf16 %v1634_v18, %v1618_v33  ;;  %v1611_v33 = vld [vmem:[%s10135_s6 + $0xd0] sm:$0xff]  ;;  %v1626_v18 = vld [vmem:[%s10135_s6 + $0x148] sm:$0xff] }
 0x70c   :  { %v6939_v51 = vunpack.i.h.bf16 %v6937_v47  ;;  %v6938_v52 = vunpack.i.l.bf16 %v6937_v47  ;;  %v10164_v47 = vmov 0   ;;  %v1677_v41 = vpack.c.bf16 %v1642_v34, %v1626_v18  ;;  %v1598_v45 = vld [vmem:[%s10135_s6 + $0x68] sm:$0xff]  ;;  %v2180_v18 = vld [vmem:[%s10138_s8 + $0x118] sm:$0xff]  ;;  %v2165_v34 = vld [vmem:[%s10138_s8 + $0xa0] sm:$0xff] }
 0x70d   :  { %1771 = vmatprep.subr.bf16.mxu0 %v1669_v35  ;;  %1801 = vmatprep.mubr.bf16.mxu0 %v10164_v47  ;;  %v1628_v35 = vld [vmem:[%s10135_s6 + $0x158] sm:$0xff] }
 0x70e   :  { %v1478_v58 = vsel %vm798_vm3, %v1477_v54, %v6939_v51  ;;  %v799_v59 = vsel %vm798_vm3, %v797_v55, %v6938_v52  ;;  %1772 = vmatpush1.bf16.msra.mxu0 %v1668_v40  ;;  %v1659_v51 = vpack.c.bf16 %v1608_v49, %v1592_v46  ;;  %v1641_v40 = vld [vmem:[%s10135_s6 + $0x1c0] sm:$0xff]  ;;  %v1679_v42 = vpack.c.bf16 %v1644_v36, %v1628_v35  ;;  %v1614_v46 = vld [vmem:[%s10135_s6 + $0xe8] sm:$0xff]  ;;  %v1616_v49 = vld [vmem:[%s10135_s6 + $0xf8] sm:$0xff] }
 0x70f   :  { %v6942_v53 = vpop.permute.xlu0 %6941  ;;  %1855 = vmatprep.subr.bf16.mxu0 %v1657_v48  ;;  %v1600_v48 = vld [vmem:[%s10135_s6 + $0x78] sm:$0xff]  ;;  %v2166_v35 = vld [vmem:[%s10138_s8 + $0xa8] sm:$0xff]  ;;  %v2197_v36 = vld [vmem:[%s10138_s8 + $0x1a0] sm:$0xff] }
 0x710   :  { %v6944_v56 = vunpack.i.h.bf16 %v6942_v53  ;;  %v6943_v57 = vunpack.i.l.bf16 %v6942_v53 }
 0x712   :  { %v1479_v60 = vsel %vm800_vm4, %v1478_v58, %v6944_v56  ;;  %v801_v61 = vsel %vm800_vm4, %v799_v59, %v6943_v57  ;;  %v5889_v59 = vld [vmem:[%s10136_s10] ss:$0 sm:$0xff] }
 0x713   :  { %v1485_v62 = vpack.c.bf16 %v1479_v60, %v801_v61 }
 0x715   :  { %6806 = vmatmul.mubr.msk.bf16.vlgmr.msra.gmra.mrb[20].mxu1 %vm76_vm1, %v1485_v62 }
 0x716   :  { %1813 = vmatpush1.bf16.msra.mxu1 %v1654_v32  ;;  %1844 = vmatprep.mubr.bf16.mxu1 %v10164_v47  ;;  %v1595_v32 = vld [vmem:[%s10135_s6 + $0x50] sm:$0xff] }
 0x717   :  { %1814 = vmatprep.subr.bf16.mxu1 %v1671_v39  ;;  %v1662_v38 = vpack.c.bf16 %v1611_v33, %v1595_v32  ;;  %v1625_v39 = vld [vmem:[%s10135_s6 + $0x140] sm:$0xff]  ;;  %v2179_v33 = vld [vmem:[%s10138_s8 + $0x110] sm:$0xff] }
 0x71a   :  { %1815 = vmatpush1.bf16.msra.mxu1 %v1670_v43  ;;  %v1627_v43 = vld [vmem:[%s10135_s6 + $0x150] sm:$0xff] }
 0x71b   :  { %1898 = vmatprep.subr.bf16.mxu1 %v1659_v51  ;;  %v1676_v51 = vpack.c.bf16 %v1641_v40, %v1625_v39  ;;  %v2435_v39 = vpack.c.bf16 %v2180_v18, %v2179_v33  ;;  %v2149_v40 = vld [vmem:[%s10138_s8 + $0x20] sm:$0xff] }
 0x71c   :  { %v2189_v18 = vld [vmem:[%s10138_s8 + $0x160] sm:$0xff] }
 0x7e8   :  { %v1531_v1 = vpop.f32.mrb[20].mxu1 }
 0x7e9   :  { %v1532_v21 = vadd.f32 %v5887_v63, %v1531_v1  ;;  %v6807_v50 = vpop.f32.mrb[21].mxu1  ;;  %v5890_v1 = vld [vmem:[%s10137_s11] ss:$0 sm:$0xff] }
 0x7ea   :  { %v1534_v2 = vpop.f32.mrb[22].mxu1  ;;  %v1605_v50 = vld [vmem:[%s10135_s6 + $0xa0] sm:$0xff] }
 0x7eb   :  { %v1535_v3 = vadd.f32 %v5887_v63, %v1534_v2  ;;  %v6808_v4 = vpop.f32.mrb[23].mxu1  ;;  %v1538_v5 = vadd.f32 %v1532_v21, %v7173_v13  ;;  %v1589_v21 = vld [vmem:[%s10135_s6 + $0x20] sm:$0xff] }
 0x7ec   :  { %v1607_v4 = vld [vmem:[%s10135_s6 + $0xb0] sm:$0xff] }
 0x7ed   :  { %v1542_v6 = vsel %vm76_vm1, %v1538_v5, 0.0  ;;  %v1539_v7 = vadd.f32 %v1535_v3, %v7175_v14  ;;  %v1591_v3 = vld [vmem:[%s10135_s6 + $0x30] sm:$0xff] }
 0x7ee   :  { %1543 = vadd.xlane.f32.xlu1 %v1542_v6  ;;  %v1638_v6 = vld [vmem:[%s10135_s6 + $0x1a8] sm:$0xff] }
 0x7ef   :  { %v1545_v8 = vsel %vm76_vm1, %v1539_v7, 0.0 }
 0x7f0   :  { %1546 = vadd.xlane.f32.xlu0 %v1545_v8  ;;  %v1640_v8 = vld [vmem:[%s10135_s6 + $0x1b8] sm:$0xff] }
 0x87b   :  { %v1544_v9 = vpop.xlane.xlu1 %1543 }
 0x87c   :  { %v1549_v10 = vmul.f32 0.03125, %v1544_v9 }
 0x87d   :  { %v1547_v11 = vpop.xlane.xlu0 %1546 }
 0x87e   :  { %v7358_v12 = vsub.f32 %v1538_v5, %v1549_v10  ;;  %v1550_v15 = vmul.f32 0.03125, %v1547_v11  ;;  %v1622_v5 = vld [vmem:[%s10135_s6 + $0x128] sm:$0xff]  ;;  %v1656_v11 = vpack.c.bf16 %v1605_v50, %v1589_v21  ;;  %v1629_v21 = vld [vmem:[%s10135_s6 + $0x160] sm:$0xff] }
 0x87f   :  { %v1645_v50 = vld [vmem:[%s10135_s6 + $0x1e0] sm:$0xff] }
 0x880   :  { %v7360_v16 = vsub.f32 %v1539_v7, %v1550_v15  ;;  %v1553_v17 = vmul.f32 %v7358_v12, %v7358_v12  ;;  %v1624_v7 = vld [vmem:[%s10135_s6 + $0x138] sm:$0xff]  ;;  %v1621_v15 = vld [vmem:[%s10135_s6 + $0x120] sm:$0xff] }
 0x882   :  { %v1555_v13 = vsel %vm76_vm1, %v1553_v17, 0.0  ;;  %v1554_v14 = vmul.f32 %v7360_v16, %v7360_v16 }
 0x883   :  { %1556 = vadd.xlane.f32.xlu0 %v1555_v13  ;;  %v1673_v13 = vpack.c.bf16 %v1638_v6, %v1622_v5  ;;  %v1647_v5 = vld [vmem:[%s10135_s6 + $0x1f0] sm:$0xff]  ;;  %v2161_v6 = vld [vmem:[%s10138_s8 + $0x80] sm:$0xff] }
 0x884   :  { %v1558_v19 = vsel %vm76_vm1, %v1554_v14, 0.0  ;;  %v1675_v14 = vpack.c.bf16 %v1640_v8, %v1624_v7  ;;  %v2162_v7 = vld [vmem:[%s10138_s8 + $0x88] sm:$0xff]  ;;  %v2193_v8 = vld [vmem:[%s10138_s8 + $0x180] sm:$0xff] }
 0x885   :  { %1559 = vadd.xlane.f32.xlu1 %v1558_v19  ;;  %v1623_v19 = vld [vmem:[%s10135_s6 + $0x130] sm:$0xff] }
 0x886   :  { %v1674_v27 = vpack.c.bf16 %v1639_v20, %v1623_v19  ;;  %v2177_v20 = vld [vmem:[%s10138_s8 + $0x100] sm:$0xff] }
 0x887   :  { %v2434_v28 = vpack.c.bf16 %v2178_v22, %v2177_v20  ;;  %v2187_v20 = vld [vmem:[%s10138_s8 + $0x150] sm:$0xff]  ;;  %v2188_v22 = vld [vmem:[%s10138_s8 + $0x158] sm:$0xff] }
 0x910   :  { %v1557_v52 = vpop.xlane.xlu0 %1556 }
 0x911   :  { %v1561_v53 = vmul.f32 0.03125, %v1557_v52  ;;  %v1678_v52 = vpack.c.bf16 %v1643_v44, %v1627_v43  ;;  %v2182_v44 = vld [vmem:[%s10138_s8 + $0x128] sm:$0xff] }
 0x912   :  { %v1560_v54 = vpop.xlane.xlu1 %1559 }
 0x913   :  { %v1563_v55 = vadd.f32 1e-05, %v1561_v53  ;;  %v1562_v56 = vmul.f32 0.03125, %v1560_v54  ;;  %v1597_v53 = vld [vmem:[%s10135_s6 + $0x60] sm:$0xff] }
 0x914   :  { %v1613_v54 = vld [vmem:[%s10135_s6 + $0xe0] sm:$0xff] }
 0x915   :  { %6992 = vrsqrt.f32 %v1563_v55  ;;  %v1564_v57 = vadd.f32 1e-05, %v1562_v56  ;;  %v1665_v55 = vpack.c.bf16 %v1614_v46, %v1598_v45  ;;  %v1667_v56 = vpack.c.bf16 %v1616_v49, %v1600_v48  ;;  %v2167_v45 = vld [vmem:[%s10138_s8 + $0xb0] sm:$0xff]  ;;  %v2168_v46 = vld [vmem:[%s10138_s8 + $0xb8] sm:$0xff] }
 0x916   :  { %v2199_v48 = vld [vmem:[%s10138_s8 + $0x1b0] sm:$0xff]  ;;  %v2200_v49 = vld [vmem:[%s10138_s8 + $0x1b8] sm:$0xff] }
 0x917   :  { %6994 = vrsqrt.f32 %v1564_v57  ;;  %v1599_v57 = vld [vmem:[%s10135_s6 + $0x70] sm:$0xff] }
 0x91f   :  { %v6993_v58 = vpop.eup %6992 }
 0x920   :  { %v1567_v60 = vmul.f32 %v6993_v58, %v7358_v12  ;;  %v1658_v12 = vpack.c.bf16 %v1607_v4, %v1591_v3  ;;  %v1615_v58 = vld [vmem:[%s10135_s6 + $0xf0] sm:$0xff] }
 0x921   :  { %v6995_v61 = vpop.eup %6994  ;;  %v1631_v4 = vld [vmem:[%s10135_s6 + $0x170] sm:$0xff] }
 0x922   :  { %v1575_v62 = vmul.f32 %v5889_v59, %v1567_v60  ;;  %v1568_v63 = vmul.f32 %v6995_v61, %v7360_v16  ;;  %v1637_v16 = vld [vmem:[%s10135_s6 + $0x1a0] sm:$0xff]  ;;  %v1646_v60 = vld [vmem:[%s10135_s6 + $0x1e8] sm:$0xff]  ;;  %v1632_v61 = vld [vmem:[%s10135_s6 + $0x178] sm:$0xff] }
 0x923   :  { %v1672_v26 = vpack.c.bf16 %v1637_v16, %v1621_v15  ;;  %v1682_v15 = vpack.c.bf16 %v1647_v5, %v1631_v4  ;;  %v2145_v16 = vld [vmem:[%s10138_s8] sm:$0xff]  ;;  %v2186_v5 = vld [vmem:[%s10138_s8 + $0x148] sm:$0xff] }
 0x924   :  { %v1576_v2 = vmul.f32 %v5889_v59, %v1568_v63  ;;  %v7462_v9 = vadd.f32 %v5890_v1, %v1575_v62  ;;  %v1630_v59 = vld [vmem:[%s10135_s6 + $0x168] sm:$0xff]  ;;  %v1648_v62 = vld [vmem:[%s10135_s6 + $0x1f8] sm:$0xff]  ;;  %v1664_v63 = vpack.c.bf16 %v1613_v54, %v1597_v53  ;;  %v2151_v53 = vld [vmem:[%s10138_s8 + $0x30] sm:$0xff] }
 0x925   :  { %v1683_v3 = vpack.c.bf16 %v1648_v62, %v1632_v61  ;;  %v2152_v54 = vld [vmem:[%s10138_s8 + $0x38] sm:$0xff]  ;;  %v2201_v61 = vld [vmem:[%s10138_s8 + $0x1c0] sm:$0xff]  ;;  %v2202_v62 = vld [vmem:[%s10138_s8 + $0x1c8] sm:$0xff] }
 0x926   :  { %v7464_v10 = vadd.f32 %v5890_v1, %v1576_v2  ;;  %v1666_v1 = vpack.c.bf16 %v1615_v58, %v1599_v57  ;;  %v1681_v2 = vpack.c.bf16 %v1646_v60, %v1630_v59  ;;  %v2183_v57 = vld [vmem:[%s10138_s8 + $0x130] sm:$0xff]  ;;  %v2184_v58 = vld [vmem:[%s10138_s8 + $0x138] sm:$0xff]  ;;  %v2169_v59 = vld [vmem:[%s10138_s8 + $0xc0] sm:$0xff] }
 0x927   :  { %v2170_v60 = vld [vmem:[%s10138_s8 + $0xc8] sm:$0xff]  ;;  %v2185_v4 = vld [vmem:[%s10138_s8 + $0x140] sm:$0xff] }
 0x928   :  { %v7474_v17 = vpack.c.bf16 %v7464_v10, %v7462_v9 }
 0x92a   :  { %5891 = vmatmul.mubr.msk.bf16.vlgmr.msra.gmra.mrb[20].mxu0 %vm76_vm1, %v7474_v17  ;;  %5892 = vmatmul.mubr.msk.bf16.vlgmr.msra.gmra.mrb[24].mxu1 %vm76_vm1, %v7474_v17 }
 0x92b   :  { %1856 = vmatpush1.bf16.msra.mxu0 %v1656_v11  ;;  %1899 = vmatpush1.bf16.msra.mxu1 %v1658_v12  ;;  %v2194_v11 = vld [vmem:[%s10138_s8 + $0x188] sm:$0xff]  ;;  %v1680_v12 = vpack.c.bf16 %v1645_v50, %v1629_v21  ;;  %v2153_v21 = vld [vmem:[%s10138_s8 + $0x40] sm:$0xff] }
 0x92c   :  { %1857 = vmatprep.subr.bf16.mxu0 %v1673_v13  ;;  %1900 = vmatprep.subr.bf16.mxu1 %v1675_v14  ;;  %v2146_v13 = vld [vmem:[%s10138_s8 + $0x8] sm:$0xff]  ;;  %v2426_v14 = vpack.c.bf16 %v2162_v7, %v2161_v6  ;;  %v2442_v19 = vpack.c.bf16 %v2194_v11, %v2193_v8  ;;  %v2171_v6 = vld [vmem:[%s10138_s8 + $0xd0] sm:$0xff]  ;;  %v2172_v7 = vld [vmem:[%s10138_s8 + $0xd8] sm:$0xff] }
 0x92d   :  { %1887 = vmatprep.mubr.bf16.mxu0 %v10164_v47  ;;  %1930 = vmatprep.mubr.bf16.mxu1 %v10164_v47  ;;  %v2154_v50 = vld [vmem:[%s10138_s8 + $0x48] sm:$0xff]  ;;  %v2203_v8 = vld [vmem:[%s10138_s8 + $0x1d0] sm:$0xff]  ;;  %v2204_v11 = vld [vmem:[%s10138_s8 + $0x1d8] sm:$0xff] }
 0x92f   :  { %1858 = vmatpush1.bf16.msra.mxu0 %v1672_v26  ;;  %1901 = vmatpush1.bf16.msra.mxu1 %v1674_v27  ;;  %v2196_v26 = vld [vmem:[%s10138_s8 + $0x198] sm:$0xff]  ;;  %v2418_v27 = vpack.c.bf16 %v2146_v13, %v2145_v16  ;;  %v2155_v16 = vld [vmem:[%s10138_s8 + $0x50] sm:$0xff]  ;;  %v2431_v13 = vpack.c.bf16 %v2172_v7, %v2171_v6  ;;  %v7835_v6 = vld [vmem:[%s10138_s8 + $0x208] sm:$0xff] }
 0x930   :  { %1941 = vmatprep.subr.bf16.mxu0 %v1661_v30  ;;  %1984 = vmatprep.subr.bf16.mxu1 %v1663_v31  ;;  %v2148_v30 = vld [vmem:[%s10138_s8 + $0x18] sm:$0xff]  ;;  %v2427_v31 = vpack.c.bf16 %v2164_v24, %v2163_v23  ;;  %v2443_v32 = vpack.c.bf16 %v2196_v26, %v2195_v25  ;;  %v2439_v24 = vpack.c.bf16 %v2188_v22, %v2187_v20  ;;  %v2173_v25 = vld [vmem:[%s10138_s8 + $0xe0] sm:$0xff]  ;;  %v2174_v26 = vld [vmem:[%s10138_s8 + $0xe8] sm:$0xff] }
 0x931   :  { %v7840_v7 = vld [vmem:[%s10138_s8 + $0x300] sm:$0xff]  ;;  %v7874_v22 = vld [vmem:[%s10138_s8 + $0x398] sm:$0xff] }
 0x932   :  { %5893 = vmatmul.mubr.msk.bf16.vlgmr.msra.gmra.mrb[24].mxu0 %vm76_vm1, %v7474_v17  ;;  %5894 = vmatmul.mubr.msk.bf16.vlgmr.msra.gmra.mrb[28].mxu1 %vm76_vm1, %v7474_v17 }
 0x933   :  { %1942 = vmatpush1.bf16.msra.mxu0 %v1660_v37  ;;  %1985 = vmatpush1.bf16.msra.mxu1 %v1662_v38  ;;  %v2198_v37 = vld [vmem:[%s10138_s8 + $0x1a8] sm:$0xff]  ;;  %v2419_v38 = vpack.c.bf16 %v2148_v30, %v2147_v29  ;;  %v2157_v30 = vld [vmem:[%s10138_s8 + $0x60] sm:$0xff] }
 0x934   :  { %1943 = vmatprep.subr.bf16.mxu0 %v1677_v41  ;;  %1986 = vmatprep.subr.bf16.mxu1 %v1679_v42  ;;  %v2150_v41 = vld [vmem:[%s10138_s8 + $0x28] sm:$0xff]  ;;  %v2428_v42 = vpack.c.bf16 %v2166_v35, %v2165_v34  ;;  %v2444_v43 = vpack.c.bf16 %v2198_v37, %v2197_v36  ;;  %v2175_v36 = vld [vmem:[%s10138_s8 + $0xf0] sm:$0xff]  ;;  %v2176_v37 = vld [vmem:[%s10138_s8 + $0xf8] sm:$0xff] }
 0x935   :  { %1973 = vmatprep.mubr.bf16.mxu0 %v10164_v47  ;;  %2016 = vmatprep.mubr.bf16.mxu1 %v10164_v47  ;;  %v2206_v29 = vld [vmem:[%s10138_s8 + $0x1e8] sm:$0xff] }
 0x936   :  { %v2190_v34 = vld [vmem:[%s10138_s8 + $0x168] sm:$0xff] }
 0x937   :  { %1944 = vmatpush1.bf16.msra.mxu0 %v1676_v51  ;;  %1987 = vmatpush1.bf16.msra.mxu1 %v1678_v52  ;;  %v2420_v51 = vpack.c.bf16 %v2150_v41, %v2149_v40  ;;  %v2440_v35 = vpack.c.bf16 %v2190_v34, %v2189_v18  ;;  %v2208_v40 = vld [vmem:[%s10138_s8 + $0x1f8] sm:$0xff]  ;;  %v2159_v41 = vld [vmem:[%s10138_s8 + $0x70] sm:$0xff] }
 0x938   :  { %2027 = vmatprep.subr.bf16.mxu0 %v1665_v55  ;;  %2070 = vmatprep.subr.bf16.mxu1 %v1667_v56  ;;  %v2429_v55 = vpack.c.bf16 %v2168_v46, %v2167_v45  ;;  %v2445_v56 = vpack.c.bf16 %v2200_v49, %v2199_v48  ;;  %v2192_v45 = vld [vmem:[%s10138_s8 + $0x178] sm:$0xff]  ;;  %v2225_v48 = vld [vmem:[%s10138_s8 + $0x280] sm:$0xff]  ;;  %v2226_v49 = vld [vmem:[%s10138_s8 + $0x288] sm:$0xff] }
 0x93a   :  { %5895 = vmatmul.mubr.msk.bf16.vlgmr.msra.gmra.mrb[28].mxu0 %vm76_vm1, %v7474_v17  ;;  %5896 = vmatmul.mubr.msk.bf16.vlgmr.msra.gmra.mrb[32].mxu1 %vm76_vm1, %v7474_v17 }
 0x93b   :  { %2028 = vmatpush1.bf16.msra.mxu0 %v1664_v63  ;;  %2071 = vmatpush1.bf16.msra.mxu1 %v1666_v1  ;;  %v2421_v63 = vpack.c.bf16 %v2152_v54, %v2151_v53  ;;  %v2437_v1 = vpack.c.bf16 %v2184_v58, %v2183_v57  ;;  %v2258_v53 = vld [vmem:[%s10138_s8 + $0x388] sm:$0xff] }
 0x93c   :  { %2029 = vmatprep.subr.bf16.mxu0 %v1681_v2  ;;  %2072 = vmatprep.subr.bf16.mxu1 %v1683_v3  ;;  %v2430_v2 = vpack.c.bf16 %v2170_v60, %v2169_v59  ;;  %v2446_v3 = vpack.c.bf16 %v2202_v62, %v2201_v61  ;;  %v1649_v59 = vld [vmem:[%s10139_s7] sm:$0xff] }
 0x93d   :  { %2059 = vmatprep.mubr.bf16.mxu0 %v10164_v47  ;;  %2102 = vmatprep.mubr.bf16.mxu1 %v10164_v47 }
 0x93f   :  { %2030 = vmatpush1.bf16.msra.mxu0 %v1680_v12  ;;  %2073 = vmatpush1.bf16.msra.mxu1 %v1682_v15  ;;  %v2422_v12 = vpack.c.bf16 %v2154_v50, %v2153_v21  ;;  %v2438_v15 = vpack.c.bf16 %v2186_v5, %v2185_v4 }
 0x940   :  { %6320 = vmatprep.subr.bf16.mxu0 %v2426_v14  ;;  %6342 = vmatprep.subr.bf16.mxu1 %v2442_v19  ;;  %v2447_v14 = vpack.c.bf16 %v2204_v11, %v2203_v8  ;;  %v2156_v19 = vld [vmem:[%s10138_s8 + $0x58] sm:$0xff]  ;;  %v7845_v8 = vld [vmem:[%s10138_s8 + $0x308] sm:$0xff]  ;;  %v7850_v11 = vld [vmem:[%s10138_s8 + $0x290] sm:$0xff] }
 0x941   :  { %v2423_v23 = vpack.c.bf16 %v2156_v19, %v2155_v16 }
 0x942   :  { %5897 = vmatmul.mubr.msk.bf16.vlgmr.msra.gmra.mrb[32].mxu0 %vm76_vm1, %v7474_v17  ;;  %5898 = vmatmul.mubr.msk.bf16.vlgmr.msra.gmra.mrb[36].mxu1 %vm76_vm1, %v7474_v17  ;;  %v2181_v17 = vld [vmem:[%s10138_s8 + $0x120] sm:$0xff] }
 0x943   :  { %6321 = vmatpush3.bf16.msra.mxu0 %v2418_v27  ;;  %6343 = vmatpush3.bf16.msra.mxu1 %v2434_v28  ;;  %v2436_v52 = vpack.c.bf16 %v2182_v44, %v2181_v17  ;;  %v2205_v27 = vld [vmem:[%s10138_s8 + $0x1e0] sm:$0xff]  ;;  %v2432_v28 = vpack.c.bf16 %v2174_v26, %v2173_v25  ;;  %v2191_v44 = vld [vmem:[%s10138_s8 + $0x170] sm:$0xff] }
 0x944   :  { %6322 = vmatprep.subr.bf16.mxu0 %v2427_v31  ;;  %6344 = vmatprep.subr.bf16.mxu1 %v2443_v32  ;;  %v2158_v31 = vld [vmem:[%s10138_s8 + $0x68] sm:$0xff]  ;;  %v2448_v32 = vpack.c.bf16 %v2206_v29, %v2205_v27  ;;  %v2441_v46 = vpack.c.bf16 %v2192_v45, %v2191_v44 }
 0x945   :  { %v2424_v33 = vpack.c.bf16 %v2158_v31, %v2157_v30  ;;  %v7894_v31 = vld [vmem:[%s10138_s8 + $0x310] sm:$0xff] }
 0x947   :  { %6323 = vmatpush3.bf16.msra.mxu0 %v2419_v38  ;;  %6345 = vmatpush3.bf16.msra.mxu1 %v2435_v39  ;;  %v2207_v38 = vld [vmem:[%s10138_s8 + $0x1f0] sm:$0xff]  ;;  %v2433_v39 = vpack.c.bf16 %v2176_v37, %v2175_v36  ;;  %v2466_v37 = vpack.c.bf16 %v7845_v8, %v7840_v7 }
 0x948   :  { %6324 = vmatprep.subr.bf16.mxu0 %v2428_v42  ;;  %6346 = vmatprep.subr.bf16.mxu1 %v2444_v43  ;;  %v2160_v42 = vld [vmem:[%s10138_s8 + $0x78] sm:$0xff]  ;;  %v2449_v43 = vpack.c.bf16 %v2208_v40, %v2207_v38 }
 0x949   :  { %v2425_v17 = vpack.c.bf16 %v2160_v42, %v2159_v41 }
 0x94b   :  { %6325 = vmatpush3.bf16.msra.mxu0 %v2420_v51  ;;  %6347 = vmatpush3.bf16.msra.mxu1 %v2436_v52  ;;  %v2257_v51 = vld [vmem:[%s10138_s8 + $0x380] sm:$0xff]  ;;  %v2458_v52 = vpack.c.bf16 %v2226_v49, %v2225_v48 }
 0x94c   :  { %6326 = vmatprep.subr.bf16.mxu0 %v2429_v55  ;;  %6348 = vmatprep.subr.bf16.mxu1 %v2445_v56  ;;  %v2474_v54 = vpack.c.bf16 %v2258_v53, %v2257_v51  ;;  %v1686_v55 = vlaneseq  ;;  %v7923_v49 = vld [vmem:[%s10138_s8 + $0x2a0] sm:$0xff]  ;;  %v7928_v51 = vld [vmem:[%s10138_s8 + $0x2a8] sm:$0xff] }
 0x94e   :  { %v1687_v56 = vshrl.u32 %v1686_v55, 7 }
 0x94f   :  { %6327 = vmatpush3.bf16.msra.mxu0 %v2421_v63  ;;  %6349 = vmatpush3.bf16.msra.mxu1 %v2437_v1 }
 0x950   :  { %6328 = vmatprep.subr.bf16.mxu0 %v2430_v2  ;;  %6350 = vmatprep.subr.bf16.mxu1 %v2446_v3  ;;  %v7804_v57 = vsub.s32 0, %v1687_v56  ;;  %v7806_v58 = vsub.s32 2, %v1687_v56  ;;  %v7811_v60 = vsub.s32 1, %v1687_v56  ;;  %v7813_v61 = vsub.s32 3, %v1687_v56  ;;  %v7828_v3 = vld [vmem:[%s10138_s8 + $0x200] sm:$0xff] }
 0x951   :  { %v7815_v62 = vsub.s32 4, %v1687_v56  ;;  %v7817_v63 = vsub.s32 6, %v1687_v56  ;;  %v7819_v1 = vsub.s32 5, %v1687_v56  ;;  %v7823_v2 = vsub.s32 7, %v1687_v56  ;;  %v7933_v56 = vld [vmem:[%s10138_s8 + $0x3a0] sm:$0xff] }
 0x952   :  { %v1689_v21 = vrot.slane %v1649_v59, %v7804_v57  ;;  %v1697_v50 = vrot.slane %v1649_v59, %v7806_v58  ;;  %v1693_v4 = vrot.slane %v1649_v59, %v7811_v60  ;;  %v1701_v5 = vrot.slane %v1649_v59, %v7813_v61 }
 0x953   :  { %6329 = vmatpush3.bf16.msra.mxu0 %v2422_v12  ;;  %6351 = vmatpush3.bf16.msra.mxu1 %v2438_v15  ;;  %v7855_v12 = vld [vmem:[%s10138_s8 + $0x298] sm:$0xff]  ;;  %v7860_v15 = vld [vmem:[%s10138_s8 + $0x390] sm:$0xff]  ;;  %v7866_v19 = vrot.slane %v1649_v59, %v7817_v63  ;;  %v7869_v20 = vrot.slane %v1649_v59, %v7819_v1  ;;  %v7887_v29 = vrot.slane %v1649_v59, %v7823_v2 }
 0x954   :  { %6330 = vmatprep.subr.bf16.mxu0 %v2431_v13  ;;  %6352 = vmatprep.subr.bf16.mxu1 %v2447_v14  ;;  %v7863_v14 = vrot.slane %v1649_v59, %v7815_v62  ;;  %v2450_v30 = vpack.c.bf16 %v7835_v6, %v7828_v3  ;;  %v2459_v38 = vpack.c.bf16 %v7855_v12, %v7850_v11  ;;  %v7938_v59 = vld [vmem:[%s10138_s8 + $0x3a8] sm:$0xff]  ;;  %v8036_v3 = vld [vmem:[%s10138_s8 + $0x338] sm:$0xff] }
 0x957   :  { %6331 = vmatpush3.bf16.msra.mxu0 %v2423_v23  ;;  %6353 = vmatpush3.bf16.msra.mxu1 %v2439_v24  ;;  %v7879_v23 = vld [vmem:[%s10138_s8 + $0x210] sm:$0xff]  ;;  %v7884_v24 = vld [vmem:[%s10138_s8 + $0x218] sm:$0xff] }
 0x958   :  { %6332 = vmatprep.subr.bf16.mxu0 %v2432_v28  ;;  %6354 = vmatprep.subr.bf16.mxu1 %v2448_v32  ;;  %v7899_v32 = vld [vmem:[%s10138_s8 + $0x318] sm:$0xff] }
 0x95b   :  { %6333 = vmatpush3.bf16.msra.mxu0 %v2424_v33  ;;  %6355 = vmatpush3.bf16.msra.mxu1 %v2440_v35  ;;  %v7904_v33 = vld [vmem:[%s10139_s7 + $0x8] sm:$0xff] }
 0x95c   :  { %6334 = vmatprep.subr.bf16.mxu0 %v2433_v39  ;;  %6356 = vmatprep.subr.bf16.mxu1 %v2449_v43  ;;  %v2475_v43 = vpack.c.bf16 %v7874_v22, %v7860_v15  ;;  %v7918_v48 = vrot.slane %v7904_v33, %v7804_v57 }
 0x95f   :  { %6335 = vmatpush3.bf16.msra.mxu0 %v2425_v17  ;;  %6357 = vmatpush3.bf16.msra.mxu1 %v2441_v46  ;;  %v2451_v17 = vpack.c.bf16 %v7884_v24, %v7879_v23  ;;  %v2467_v46 = vpack.c.bf16 %v7899_v32, %v7894_v31  ;;  %v8070_v23 = vld [vmem:[%s10138_s8 + $0x2c8] sm:$0xff] }
 0x960   :  { %6364 = vmatprep.subr.bf16.mxu0 %v2458_v52  ;;  %6386 = vmatprep.subr.bf16.mxu1 %v2474_v54 }
 0x9fd   :  { %v1803_v16 = vpop.f32.mrb[20].mxu0  ;;  %v1846_v13 = vpop.f32.mrb[24].mxu1 }
 0x9fe   :  { %v1804_v25 = vadd.f32 %v1803_v16, %v1689_v21  ;;  %v1847_v26 = vadd.f32 %v1846_v13, %v1697_v50  ;;  %v1805_v27 = vpop.f32.mrb[21].mxu0  ;;  %v1848_v28 = vpop.f32.mrb[25].mxu1  ;;  %v7943_v16 = vld [vmem:[%s10138_s8 + $0x220] sm:$0xff]  ;;  %v7948_v13 = vld [vmem:[%s10138_s8 + $0x228] sm:$0xff] }
 0x9ff   :  { %v1806_v18 = vadd.f32 %v1805_v27, %v1693_v4  ;;  %v1849_v34 = vadd.f32 %v1848_v28, %v1701_v5  ;;  %v1807_v35 = vpop.f32.mrb[22].mxu0  ;;  %v1850_v36 = vpop.f32.mrb[26].mxu1  ;;  %v7952_v27 = vrot.slane %v7904_v33, %v7806_v58  ;;  %v7956_v28 = vrot.slane %v7904_v33, %v7811_v60 }
 0xa00   :  { %v1808_v39 = vadd.f32 %v1807_v35, %v1689_v21  ;;  %v1851_v40 = vadd.f32 %v1850_v36, %v1697_v50  ;;  %v1809_v41 = vpop.f32.mrb[23].mxu0  ;;  %v1852_v42 = vpop.f32.mrb[27].mxu1  ;;  %v2113_v52 = vmax.f32 %v1804_v25, 0.0  ;;  %v2115_v53 = vmax.f32 %v1847_v26, 0.0 }
 0xa01   :  { %v1810_v44 = vadd.f32 %v1809_v41, %v1693_v4  ;;  %v1853_v45 = vadd.f32 %v1852_v42, %v1701_v5  ;;  %v2114_v21 = vmax.f32 %v1806_v18, 0.0  ;;  %v2116_v50 = vmax.f32 %v1849_v34, 0.0  ;;  %v7961_v18 = vld [vmem:[%s10138_s8 + $0x320] sm:$0xff]  ;;  %v7966_v34 = vld [vmem:[%s10138_s8 + $0x328] sm:$0xff] }
 0xa02   :  { %v2129_v54 = vmax.f32 %v1808_v39, 0.0  ;;  %v2131_v55 = vmax.f32 %v1851_v40, 0.0  ;;  %v7970_v41 = vrot.slane %v7904_v33, %v7813_v61  ;;  %v2460_v42 = vpack.c.bf16 %v7928_v51, %v7923_v49  ;;  %v7993_v51 = vld [vmem:[%s10138_s8 + $0x3b0] sm:$0xff] }
 0xa03   :  { %v2130_v4 = vmax.f32 %v1810_v44, 0.0  ;;  %v2132_v5 = vmax.f32 %v1853_v45, 0.0  ;;  %v7977_v44 = vld [vmem:[%s10138_s8 + $0x2b0] sm:$0xff]  ;;  %v7982_v45 = vld [vmem:[%s10138_s8 + $0x2b8] sm:$0xff] }
 0xa04   :  { %v2402_v25 = vpack.c.bf16 %v2129_v54, %v2113_v52  ;;  %v2404_v26 = vpack.c.bf16 %v2131_v55, %v2115_v53 }
 0xa05   :  { %v2403_v35 = vpack.c.bf16 %v2130_v4, %v2114_v21  ;;  %v2405_v36 = vpack.c.bf16 %v2132_v5, %v2116_v50  ;;  %v1889_v39 = vpop.f32.mrb[24].mxu0  ;;  %v1932_v40 = vpop.f32.mrb[28].mxu1  ;;  %v2476_v21 = vpack.c.bf16 %v7938_v59, %v7933_v56  ;;  %v7998_v50 = vld [vmem:[%s10138_s8 + $0x3b8] sm:$0xff]  ;;  %v2468_v56 = vpack.c.bf16 %v7966_v34, %v7961_v18  ;;  %v2235_v18 = vld [vmem:[%s10138_s8 + $0x2d0] sm:$0xff] }
 0xa06   :  { %v1890_v52 = vadd.f32 %v1889_v39, %v7863_v14  ;;  %v1933_v53 = vadd.f32 %v1932_v40, %v7866_v19  ;;  %v1891_v54 = vpop.f32.mrb[25].mxu0  ;;  %v1934_v55 = vpop.f32.mrb[29].mxu1  ;;  %v2236_v34 = vld [vmem:[%s10138_s8 + $0x2d8] sm:$0xff] }
 0xa07   :  { %v1892_v4 = vadd.f32 %v1891_v54, %v7869_v20  ;;  %v1935_v5 = vadd.f32 %v1934_v55, %v7887_v29  ;;  %v1893_v39 = vpop.f32.mrb[26].mxu0  ;;  %v1936_v40 = vpop.f32.mrb[30].mxu1  ;;  %2584 = vmatprep.mubr.bf16.mxu0 %v2403_v35  ;;  %2625 = vmatprep.mubr.bf16.mxu1 %v2405_v36  ;;  %v2461_v54 = vpack.c.bf16 %v7982_v45, %v7977_v44  ;;  %v8011_v55 = vld [vmem:[%s10138_s8 + $0x230] sm:$0xff]  ;;  %v2268_v44 = vld [vmem:[%s10138_s8 + $0x3d8] sm:$0xff] }
 0xa08   :  { %v1894_v59 = vadd.f32 %v1893_v39, %v7863_v14  ;;  %v1937_v47 = vadd.f32 %v1936_v40, %v7866_v19  ;;  %v1895_v0 = vpop.f32.mrb[27].mxu0  ;;  %v1938_v49 = vpop.f32.mrb[31].mxu1  ;;  %2585 = vmatmul.mubr.bf16.vlgmr.msra.gmra.mrb[36].mxu0 %v2402_v25  ;;  %2626 = vmatmul.mubr.bf16.vlgmr.msra.gmra.mrb[40].mxu1 %v2404_v26  ;;  %v2477_v14 = vpack.c.bf16 %v7998_v50, %v7993_v51  ;;  %v8026_v19 = vld [vmem:[%s10138_s8 + $0x238] sm:$0xff]  ;;  %v2117_v6 = vmax.f32 %v1890_v52, 0.0  ;;  %v2266_v51 = vld [vmem:[%s10138_s8 + $0x3c8] sm:$0xff] }
 0xa09   :  { %v1896_v35 = vadd.f32 %v1895_v0, %v7869_v20  ;;  %v1939_v36 = vadd.f32 %v1938_v49, %v7887_v29  ;;  %6365 = vmatpush3.bf16.msra.mxu0 %v2450_v30  ;;  %6387 = vmatpush3.bf16.msra.mxu1 %v2466_v37  ;;  %v8031_v0 = vld [vmem:[%s10138_s8 + $0x330] sm:$0xff]  ;;  %v2119_v7 = vmax.f32 %v1933_v53, 0.0  ;;  %v2118_v29 = vmax.f32 %v1892_v4, 0.0  ;;  %v2265_v53 = vld [vmem:[%s10138_s8 + $0x3c0] sm:$0xff] }
 0xa0a   :  { %v2133_v8 = vmax.f32 %v1894_v59, 0.0  ;;  %v2135_v20 = vmax.f32 %v1937_v47, 0.0  ;;  %6366 = vmatprep.subr.bf16.mxu0 %v2459_v38  ;;  %6388 = vmatprep.subr.bf16.mxu1 %v2475_v43  ;;  %v2120_v30 = vmax.f32 %v1935_v5, 0.0  ;;  %v2453_v52 = vpack.c.bf16 %v8026_v19, %v8011_v55  ;;  %v8065_v43 = vld [vmem:[%s10138_s8 + $0x2c0] sm:$0xff]  ;;  %v2238_v55 = vld [vmem:[%s10138_s8 + $0x2e8] sm:$0xff] }
 0xa0b   :  { %v2134_v37 = vmax.f32 %v1896_v35, 0.0  ;;  %v2136_v25 = vmax.f32 %v1939_v36, 0.0  ;;  %v2469_v47 = vpack.c.bf16 %v8036_v3, %v8031_v0  ;;  %v8060_v38 = vrot.slane %v7904_v33, %v7815_v62 }
 0xa0c   :  { %v8044_v26 = vpack.c.bf16 %v2133_v8, %v2117_v6  ;;  %v8046_v49 = vpack.c.bf16 %v2135_v20, %v2119_v7  ;;  %v8094_v36 = vrot.slane %v7904_v33, %v7823_v2  ;;  %v2462_v6 = vpack.c.bf16 %v8070_v23, %v8065_v43  ;;  %v8101_v7 = vld [vmem:[%s10138_s8 + $0x240] sm:$0xff]  ;;  %v2218_v20 = vld [vmem:[%s10138_s8 + $0x248] sm:$0xff]  ;;  %v2220_v43 = vld [vmem:[%s10138_s8 + $0x258] sm:$0xff] }
 0xa0d   :  { %v2407_v11 = vpack.c.bf16 %v2134_v37, %v2118_v29  ;;  %v2409_v12 = vpack.c.bf16 %v2136_v25, %v2120_v30  ;;  %6367 = vmatpush3.bf16.msra.mxu0 %v2451_v17  ;;  %6389 = vmatpush3.bf16.msra.mxu1 %v2467_v46  ;;  %v1975_v15 = vpop.f32.mrb[28].mxu0  ;;  %v2018_v22 = vpop.f32.mrb[32].mxu1  ;;  %v8076_v46 = vrot.slane %v7904_v33, %v7817_v63  ;;  %v2249_v29 = vld [vmem:[%s10138_s8 + $0x340] sm:$0xff]  ;;  %v2251_v23 = vld [vmem:[%s10138_s8 + $0x350] sm:$0xff] }
 0xa0e   :  { %v1976_v24 = vadd.f32 %v1975_v15, %v7918_v48  ;;  %v2019_v31 = vadd.f32 %v2018_v22, %v7952_v27  ;;  %v1977_v32 = vpop.f32.mrb[29].mxu0  ;;  %v2020_v17 = vpop.f32.mrb[33].mxu1  ;;  %6368 = vmatprep.subr.bf16.mxu0 %v2460_v42  ;;  %6390 = vmatprep.subr.bf16.mxu1 %v2476_v21  ;;  %v8088_v42 = vrot.slane %v7904_v33, %v7819_v1  ;;  %v2219_v22 = vld [vmem:[%s10138_s8 + $0x250] sm:$0xff] }
 0xa0f   :  { %v1978_v50 = vadd.f32 %v1977_v32, %v7956_v28  ;;  %v2021_v4 = vadd.f32 %v2020_v17, %v7970_v41  ;;  %v1979_v5 = vpop.f32.mrb[30].mxu0  ;;  %v2022_v39 = vpop.f32.mrb[34].mxu1  ;;  %2666 = vmatprep.mubr.bf16.mxu0 %v2407_v11  ;;  %2707 = vmatprep.mubr.bf16.mxu1 %v2409_v12  ;;  %v2478_v33 = vpack.c.bf16 %v2266_v51, %v2265_v53  ;;  %v2267_v12 = vld [vmem:[%s10138_s8 + $0x3d0] sm:$0xff]  ;;  %v2252_v51 = vld [vmem:[%s10138_s8 + $0x358] sm:$0xff] }
 0xa10   :  { %v1980_v21 = vadd.f32 %v1979_v5, %v7918_v48  ;;  %v2023_v40 = vadd.f32 %v2022_v39, %v7952_v27  ;;  %v1981_v59 = vpop.f32.mrb[31].mxu0  ;;  %v2024_v35 = vpop.f32.mrb[35].mxu1  ;;  %v10170_v27 = vpack.c.bf16 %v7948_v13, %v7943_v16  ;;  %v2123_v16 = vmax.f32 %v2019_v31, 0.0  ;;  %v2270_v5 = vld [vmem:[%s10138_s8 + $0x3e8] sm:$0xff] }
 0xa11   :  { %v1982_v8 = vadd.f32 %v1981_v59, %v7956_v28  ;;  %v2025_v48 = vadd.f32 %v2024_v35, %v7970_v41  ;;  %6391 = vmatpush3.bf16.msra.mxu1 %v2468_v56  ;;  %v2250_v28 = vld [vmem:[%s10138_s8 + $0x348] sm:$0xff]  ;;  %v2121_v41 = vmax.f32 %v1976_v24, 0.0  ;;  %v2122_v56 = vmax.f32 %v1978_v50, 0.0  ;;  %v2237_v50 = vld [vmem:[%s10138_s8 + $0x2e0] sm:$0xff] }
 0xa12   :  { %6369 = vmatpush3.bf16.msra.mxu0 %v10170_v27  ;;  %v2137_v13 = vmax.f32 %v1980_v21, 0.0  ;;  %v2139_v30 = vmax.f32 %v2023_v40, 0.0  ;;  %6392 = vmatprep.subr.bf16.mxu1 %v2477_v14  ;;  %v2124_v37 = vmax.f32 %v2021_v4, 0.0  ;;  %v2454_v14 = vpack.c.bf16 %v2218_v20, %v8101_v7  ;;  %v2269_v4 = vld [vmem:[%s10138_s8 + $0x3e0] sm:$0xff] }
 0xa13   :  { %6370 = vmatprep.subr.bf16.mxu0 %v2461_v54  ;;  %v2138_v25 = vmax.f32 %v1982_v8, 0.0  ;;  %v2140_v11 = vmax.f32 %v2025_v48, 0.0  ;;  %v2470_v15 = vpack.c.bf16 %v2250_v28, %v2249_v29  ;;  %v2463_v53 = vpack.c.bf16 %v2236_v34, %v2235_v18  ;;  %v2221_v20 = vld [vmem:[%s10138_s8 + $0x260] sm:$0xff]  ;;  %v2240_v34 = vld [vmem:[%s10138_s8 + $0x2f8] sm:$0xff] }
 0xa14   :  { %v8135_v45 = vpack.c.bf16 %v2137_v13, %v2121_v41  ;;  %v8137_v54 = vpack.c.bf16 %v2139_v30, %v2123_v16  ;;  %v2455_v35 = vpack.c.bf16 %v2220_v43, %v2219_v22  ;;  %v2471_v27 = vpack.c.bf16 %v2252_v51, %v2251_v23  ;;  %v2254_v16 = vld [vmem:[%s10138_s8 + $0x368] sm:$0xff] }
 0xa15   :  { %v8149_v24 = vpack.c.bf16 %v2138_v25, %v2122_v56  ;;  %v8151_v31 = vpack.c.bf16 %v2140_v11, %v2124_v37  ;;  %6393 = vmatpush3.bf16.msra.mxu1 %v2469_v47  ;;  %v2061_v32 = vpop.f32.mrb[32].mxu0  ;;  %v2104_v17 = vpop.f32.mrb[36].mxu1  ;;  %v2479_v47 = vpack.c.bf16 %v2268_v44, %v2267_v12  ;;  %v2480_v41 = vpack.c.bf16 %v2270_v5, %v2269_v4  ;;  %v2271_v12 = vld [vmem:[%s10138_s8 + $0x3f0] sm:$0xff]  ;;  %v2272_v44 = vld [vmem:[%s10138_s8 + $0x3f8] sm:$0xff] }
 0xa16   :  { %6371 = vmatpush3.bf16.msra.mxu0 %v2453_v52  ;;  %v2062_v19 = vadd.f32 %v2061_v32, %v8060_v38  ;;  %v2105_v0 = vadd.f32 %v2104_v17, %v8076_v46  ;;  %v2063_v3 = vpop.f32.mrb[33].mxu0  ;;  %v2106_v52 = vpop.f32.mrb[37].mxu1  ;;  %6394 = vmatprep.subr.bf16.mxu1 %v2478_v33  ;;  %v2464_v33 = vpack.c.bf16 %v2238_v55, %v2237_v50  ;;  %v2223_v17 = vld [vmem:[%s10138_s8 + $0x270] sm:$0xff] }
 0xa17   :  { %6372 = vmatprep.subr.bf16.mxu0 %v2462_v6  ;;  %v2064_v39 = vadd.f32 %v2063_v3, %v8088_v42  ;;  %v2107_v21 = vadd.f32 %v2106_v52, %v8094_v36  ;;  %v2065_v40 = vpop.f32.mrb[34].mxu0  ;;  %v2108_v59 = vpop.f32.mrb[38].mxu1  ;;  %v2481_v50 = vpack.c.bf16 %v2272_v44, %v2271_v12  ;;  %v2255_v55 = vld [vmem:[%s10138_s8 + $0x370] sm:$0xff]  ;;  %v2290_v3 = vld [vmem:[%s10138_s8 + $0x488] sm:$0xff]  ;;  %v2321_v52 = vld [vmem:[%s10138_s8 + $0x580] sm:$0xff] }
 0xa18   :  { %v2066_v7 = vadd.f32 %v2065_v40, %v8060_v38  ;;  %v2109_v6 = vadd.f32 %v2108_v59, %v8076_v46  ;;  %v2067_v8 = vpop.f32.mrb[35].mxu0  ;;  %v2110_v48 = vpop.f32.mrb[39].mxu1  ;;  %v2222_v38 = vld [vmem:[%s10138_s8 + $0x268] sm:$0xff]  ;;  %v2253_v46 = vld [vmem:[%s10138_s8 + $0x360] sm:$0xff]  ;;  %v2125_v13 = vmax.f32 %v2062_v19, 0.0  ;;  %v2127_v30 = vmax.f32 %v2105_v0, 0.0 }
 0xa19   :  { %v2068_v29 = vadd.f32 %v2067_v8, %v8088_v42  ;;  %v2111_v28 = vadd.f32 %v2110_v48, %v8094_v36  ;;  %6395 = vmatpush3.bf16.msra.mxu1 %v2470_v15  ;;  %v2239_v36 = vld [vmem:[%s10138_s8 + $0x2f0] sm:$0xff]  ;;  %v2126_v56 = vmax.f32 %v2064_v39, 0.0  ;;  %v2128_v37 = vmax.f32 %v2107_v21, 0.0  ;;  %v2256_v19 = vld [vmem:[%s10138_s8 + $0x378] sm:$0xff]  ;;  %v2289_v0 = vld [vmem:[%s10138_s8 + $0x480] sm:$0xff] }
 0xa1a   :  { %6373 = vmatpush3.bf16.msra.mxu0 %v2454_v14  ;;  %v2141_v42 = vmax.f32 %v2066_v7, 0.0  ;;  %v2143_v18 = vmax.f32 %v2109_v6, 0.0  ;;  %6396 = vmatprep.subr.bf16.mxu1 %v2479_v47  ;;  %v2456_v22 = vpack.c.bf16 %v2222_v38, %v2221_v20  ;;  %v2472_v32 = vpack.c.bf16 %v2254_v16, %v2253_v46  ;;  %v2322_v47 = vld [vmem:[%s10138_s8 + $0x588] sm:$0xff]  ;;  %v2273_v40 = vld [vmem:[%s10138_s8 + $0x400] sm:$0xff]  ;;  %v2291_v6 = vld [vmem:[%s10138_s8 + $0x490] sm:$0xff] }
 0xa1b   :  { %6374 = vmatprep.subr.bf16.mxu0 %v2463_v53  ;;  %v2142_v25 = vmax.f32 %v2068_v29, 0.0  ;;  %v2144_v11 = vmax.f32 %v2111_v28, 0.0  ;;  %v2224_v53 = vld [vmem:[%s10138_s8 + $0x278] sm:$0xff]  ;;  %v2465_v51 = vpack.c.bf16 %v2240_v34, %v2239_v36  ;;  %v2473_v5 = vpack.c.bf16 %v2256_v19, %v2255_v55  ;;  %v2274_v59 = vld [vmem:[%s10138_s8 + $0x408] sm:$0xff]  ;;  %v2323_v48 = vld [vmem:[%s10138_s8 + $0x590] sm:$0xff] }
 0xa1c   :  { %v8206_v14 = vpack.c.bf16 %v2141_v42, %v2125_v13  ;;  %v8208_v15 = vpack.c.bf16 %v2143_v18, %v2127_v30  ;;  %v2457_v4 = vpack.c.bf16 %v2224_v53, %v2223_v17  ;;  %v2490_v39 = vpack.c.bf16 %v2290_v3, %v2289_v0  ;;  %v2306_v7 = vld [vmem:[%s10138_s8 + $0x508] sm:$0xff]  ;;  %v2292_v8 = vld [vmem:[%s10138_s8 + $0x498] sm:$0xff]  ;;  %v2275_v29 = vld [vmem:[%s10138_s8 + $0x410] sm:$0xff] }
 0xa1d   :  { %v8210_v43 = vpack.c.bf16 %v2142_v25, %v2126_v56  ;;  %v8212_v23 = vpack.c.bf16 %v2144_v11, %v2128_v37  ;;  %6397 = vmatpush3.bf16.msra.mxu1 %v2471_v27  ;;  %v2506_v21 = vpack.c.bf16 %v2322_v47, %v2321_v52  ;;  %v2324_v27 = vld [vmem:[%s10138_s8 + $0x598] sm:$0xff]  ;;  %v2491_v38 = vpack.c.bf16 %v2292_v8, %v2291_v6  ;;  %v2293_v13 = vld [vmem:[%s10138_s8 + $0x4a0] sm:$0xff]  ;;  %v2294_v30 = vld [vmem:[%s10138_s8 + $0x4a8] sm:$0xff] }
 0xa1e   :  { %6375 = vmatpush3.bf16.msra.mxu0 %v2455_v35  ;;  %6398 = vmatprep.subr.bf16.mxu1 %v2480_v41  ;;  %v2305_v35 = vld [vmem:[%s10138_s8 + $0x500] sm:$0xff]  ;;  %v2276_v28 = vld [vmem:[%s10138_s8 + $0x418] sm:$0xff]  ;;  %v2307_v41 = vld [vmem:[%s10138_s8 + $0x510] sm:$0xff]  ;;  %v2507_v46 = vpack.c.bf16 %v2324_v27, %v2323_v48  ;;  %v2492_v56 = vpack.c.bf16 %v2294_v30, %v2293_v13 }
 0xa1f   :  { %6376 = vmatprep.subr.bf16.mxu0 %v2464_v33  ;;  %v2482_v33 = vpack.c.bf16 %v2274_v59, %v2273_v40  ;;  %v2498_v20 = vpack.c.bf16 %v2306_v7, %v2305_v35  ;;  %v2308_v16 = vld [vmem:[%s10138_s8 + $0x518] sm:$0xff]  ;;  %v2325_v42 = vld [vmem:[%s10138_s8 + $0x5a0] sm:$0xff]  ;;  %v2326_v18 = vld [vmem:[%s10138_s8 + $0x5a8] sm:$0xff]  ;;  %v2483_v36 = vpack.c.bf16 %v2276_v28, %v2275_v29 }
 0xa20   :  { %v2499_v34 = vpack.c.bf16 %v2308_v16, %v2307_v41  ;;  %v2309_v37 = vld [vmem:[%s10138_s8 + $0x520] sm:$0xff]  ;;  %v2295_v25 = vld [vmem:[%s10138_s8 + $0x4b0] sm:$0xff]  ;;  %v2296_v11 = vld [vmem:[%s10138_s8 + $0x4b8] sm:$0xff] }
 0xa21   :  { %6399 = vmatpush3.bf16.msra.mxu1 %v2472_v32  ;;  %v2327_v12 = vld [vmem:[%s10138_s8 + $0x5b0] sm:$0xff]  ;;  %v2328_v44 = vld [vmem:[%s10138_s8 + $0x5b8] sm:$0xff]  ;;  %v2493_v17 = vpack.c.bf16 %v2296_v11, %v2295_v25  ;;  %v2297_v0 = vld [vmem:[%s10138_s8 + $0x4c0] sm:$0xff] }
 0xa22   :  { %6377 = vmatpush3.bf16.msra.mxu0 %v2456_v22  ;;  %6400 = vmatprep.subr.bf16.mxu1 %v2481_v50  ;;  %v2279_v53 = vld [vmem:[%s10138_s8 + $0x430] sm:$0xff]  ;;  %v2509_v55 = vpack.c.bf16 %v2328_v44, %v2327_v12  ;;  %v2312_v19 = vld [vmem:[%s10138_s8 + $0x538] sm:$0xff]  ;;  %v2298_v3 = vld [vmem:[%s10138_s8 + $0x4c8] sm:$0xff] }
 0xa23   :  { %6378 = vmatprep.subr.bf16.mxu0 %v2465_v51  ;;  %v2280_v51 = vld [vmem:[%s10138_s8 + $0x438] sm:$0xff]  ;;  %v2311_v50 = vld [vmem:[%s10138_s8 + $0x530] sm:$0xff]  ;;  %v2329_v52 = vld [vmem:[%s10138_s8 + $0x5c0] sm:$0xff] }
 0xa24   :  { %v2330_v47 = vld [vmem:[%s10138_s8 + $0x5c8] sm:$0xff]  ;;  %v2313_v59 = vld [vmem:[%s10138_s8 + $0x540] sm:$0xff]  ;;  %v2299_v6 = vld [vmem:[%s10138_s8 + $0x4d0] sm:$0xff] }
 0xa25   :  { %6401 = vmatpush3.bf16.msra.mxu1 %v2473_v5  ;;  %v2501_v5 = vpack.c.bf16 %v2312_v19, %v2311_v50  ;;  %v2282_v40 = vld [vmem:[%s10138_s8 + $0x448] sm:$0xff]  ;;  %v2510_v35 = vpack.c.bf16 %v2330_v47, %v2329_v52  ;;  %v2300_v8 = vld [vmem:[%s10138_s8 + $0x4d8] sm:$0xff]  ;;  %v2331_v48 = vld [vmem:[%s10138_s8 + $0x5d0] sm:$0xff] }
 0xa26   :  { %6379 = vmatpush3.bf16.msra.mxu0 %v2457_v4  ;;  %6430 = vmatprep.subr.bf16.mxu1 %v2506_v21  ;;  %v2485_v4 = vpack.c.bf16 %v2280_v51, %v2279_v53  ;;  %v2281_v21 = vld [vmem:[%s10138_s8 + $0x440] sm:$0xff]  ;;  %v2314_v7 = vld [vmem:[%s10138_s8 + $0x548] sm:$0xff]  ;;  %v2332_v27 = vld [vmem:[%s10138_s8 + $0x5d8] sm:$0xff]  ;;  %v2495_v29 = vpack.c.bf16 %v2300_v8, %v2299_v6 }
 0xa27   :  { %6408 = vmatprep.subr.bf16.mxu0 %v2490_v39  ;;  %v2494_v39 = vpack.c.bf16 %v2298_v3, %v2297_v0  ;;  %v2283_v28 = vld [vmem:[%s10138_s8 + $0x450] sm:$0xff]  ;;  %v2284_v41 = vld [vmem:[%s10138_s8 + $0x458] sm:$0xff]  ;;  %v2301_v13 = vld [vmem:[%s10138_s8 + $0x4e0] sm:$0xff] }
 0xa28   :  { %2708 = vmatmul.mubr.bf16.vlgmr.msra.gmra.mrb[44].mxu1 %v8046_v49  ;;  %v2278_v49 = vld [vmem:[%s10138_s8 + $0x428] sm:$0xff]  ;;  %v2316_v16 = vld [vmem:[%s10138_s8 + $0x558] sm:$0xff]  ;;  %v2303_v25 = vld [vmem:[%s10138_s8 + $0x4f0] sm:$0xff] }
 0xa29   :  { %2667 = vmatmul.mubr.bf16.vlgmr.msra.gmra.mrb[40].mxu0 %v8044_v26  ;;  %6431 = vmatpush3.bf16.msra.mxu1 %v2498_v20  ;;  %v2277_v26 = vld [vmem:[%s10138_s8 + $0x420] sm:$0xff]  ;;  %v2502_v20 = vpack.c.bf16 %v2314_v7, %v2313_v59  ;;  %v2302_v30 = vld [vmem:[%s10138_s8 + $0x4e8] sm:$0xff]  ;;  %v2304_v11 = vld [vmem:[%s10138_s8 + $0x4f8] sm:$0xff] }
 0xa2a   :  { %6409 = vmatpush3.bf16.msra.mxu0 %v2482_v33  ;;  %2748 = vmatprep.mubr.bf16.mxu0 %v8149_v24  ;;  %v2508_v24 = vpack.c.bf16 %v2326_v18, %v2325_v42  ;;  %v2484_v22 = vpack.c.bf16 %v2278_v49, %v2277_v26  ;;  %v2486_v33 = vpack.c.bf16 %v2282_v40, %v2281_v21  ;;  %v2333_v42 = vld [vmem:[%s10138_s8 + $0x5e0] sm:$0xff]  ;;  %v2334_v18 = vld [vmem:[%s10138_s8 + $0x5e8] sm:$0xff]  ;;  %v2335_v12 = vld [vmem:[%s10138_s8 + $0x5f0] sm:$0xff] }
 0xa2b   :  { %2789 = vmatprep.mubr.bf16.mxu1 %v8151_v31  ;;  %6410 = vmatprep.subr.bf16.mxu0 %v2491_v38  ;;  %v2310_v31 = vld [vmem:[%s10138_s8 + $0x528] sm:$0xff]  ;;  %v2315_v38 = vld [vmem:[%s10138_s8 + $0x550] sm:$0xff]  ;;  %v2285_v26 = vld [vmem:[%s10138_s8 + $0x460] sm:$0xff] }
 0xa2c   :  { %6432 = vmatprep.subr.bf16.mxu1 %v2507_v46  ;;  %v2500_v32 = vpack.c.bf16 %v2310_v31, %v2309_v37  ;;  %v2511_v46 = vpack.c.bf16 %v2332_v27, %v2331_v48  ;;  %v2286_v49 = vld [vmem:[%s10138_s8 + $0x468] sm:$0xff]  ;;  %v2317_v37 = vld [vmem:[%s10138_s8 + $0x560] sm:$0xff]  ;;  %v2336_v44 = vld [vmem:[%s10138_s8 + $0x5f8] sm:$0xff] }
 0xa2d   :  { %6433 = vmatpush3.bf16.msra.mxu1 %v2499_v34  ;;  %v2503_v34 = vpack.c.bf16 %v2316_v16, %v2315_v38  ;;  %v2318_v31 = vld [vmem:[%s10138_s8 + $0x568] sm:$0xff]  ;;  %v2287_v53 = vld [vmem:[%s10138_s8 + $0x470] sm:$0xff]  ;;  %v2288_v51 = vld [vmem:[%s10138_s8 + $0x478] sm:$0xff] }
 0xa2e   :  { %6411 = vmatpush3.bf16.msra.mxu0 %v2483_v36  ;;  %6434 = vmatprep.subr.bf16.mxu1 %v2508_v24  ;;  %v2487_v36 = vpack.c.bf16 %v2284_v41, %v2283_v28  ;;  %v2512_v24 = vpack.c.bf16 %v2334_v18, %v2333_v42  ;;  %v2319_v50 = vld [vmem:[%s10138_s8 + $0x570] sm:$0xff]  ;;  %v2320_v19 = vld [vmem:[%s10138_s8 + $0x578] sm:$0xff]  ;;  %v2353_v0 = vld [vmem:[%s10138_s8 + $0x680] sm:$0xff] }
 0xa2f   :  { %6412 = vmatprep.subr.bf16.mxu0 %v2492_v56  ;;  %v2496_v56 = vpack.c.bf16 %v2302_v30, %v2301_v13  ;;  %v2354_v3 = vld [vmem:[%s10138_s8 + $0x688] sm:$0xff]  ;;  %v2385_v52 = vld [vmem:[%s10138_s8 + $0x780] sm:$0xff]  ;;  %v2355_v6 = vld [vmem:[%s10138_s8 + $0x690] sm:$0xff] }
 0xa30   :  { %v2386_v47 = vld [vmem:[%s10138_s8 + $0x788] sm:$0xff]  ;;  %v2337_v21 = vld [vmem:[%s10138_s8 + $0x600] sm:$0xff]  ;;  %v2356_v8 = vld [vmem:[%s10138_s8 + $0x698] sm:$0xff] }
 0xa31   :  { %6435 = vmatpush3.bf16.msra.mxu1 %v2500_v32  ;;  %v2504_v32 = vpack.c.bf16 %v2318_v31, %v2317_v37  ;;  %v2338_v40 = vld [vmem:[%s10138_s8 + $0x608] sm:$0xff]  ;;  %v2538_v59 = vpack.c.bf16 %v2386_v47, %v2385_v52  ;;  %v2387_v27 = vld [vmem:[%s10138_s8 + $0x790] sm:$0xff]  ;;  %v2340_v28 = vld [vmem:[%s10138_s8 + $0x618] sm:$0xff]  ;;  %v2523_v38 = vpack.c.bf16 %v2356_v8, %v2355_v6 }
 0xa32   :  { %6413 = vmatpush3.bf16.msra.mxu0 %v2484_v22  ;;  %6436 = vmatprep.subr.bf16.mxu1 %v2509_v55  ;;  %v2488_v22 = vpack.c.bf16 %v2286_v49, %v2285_v26  ;;  %v2513_v55 = vpack.c.bf16 %v2336_v44, %v2335_v12  ;;  %v2370_v7 = vld [vmem:[%s10138_s8 + $0x708] sm:$0xff]  ;;  %v2514_v48 = vpack.c.bf16 %v2338_v40, %v2337_v21  ;;  %v2371_v41 = vld [vmem:[%s10138_s8 + $0x710] sm:$0xff]  ;;  %v2357_v16 = vld [vmem:[%s10138_s8 + $0x6a0] sm:$0xff] }
 0xa33   :  { %6414 = vmatprep.subr.bf16.mxu0 %v2493_v17  ;;  %v2497_v17 = vpack.c.bf16 %v2304_v11, %v2303_v25  ;;  %v2358_v13 = vld [vmem:[%s10138_s8 + $0x6a8] sm:$0xff]  ;;  %v2389_v42 = vld [vmem:[%s10138_s8 + $0x7a0] sm:$0xff]  ;;  %v2359_v37 = vld [vmem:[%s10138_s8 + $0x6b0] sm:$0xff] }
 0xa34   :  { %v2390_v18 = vld [vmem:[%s10138_s8 + $0x7a8] sm:$0xff]  ;;  %v2373_v49 = vld [vmem:[%s10138_s8 + $0x720] sm:$0xff]  ;;  %v2391_v31 = vld [vmem:[%s10138_s8 + $0x7b0] sm:$0xff] }
 0xa35   :  { %6437 = vmatpush3.bf16.msra.mxu1 %v2501_v5  ;;  %v2505_v5 = vpack.c.bf16 %v2320_v19, %v2319_v50  ;;  %v2342_v26 = vld [vmem:[%s10138_s8 + $0x628] sm:$0xff]  ;;  %v2343_v44 = vld [vmem:[%s10138_s8 + $0x630] sm:$0xff]  ;;  %v2345_v47 = vld [vmem:[%s10138_s8 + $0x640] sm:$0xff] }
 0xa36   :  { %6415 = vmatpush3.bf16.msra.mxu0 %v2485_v4  ;;  %6438 = vmatprep.subr.bf16.mxu1 %v2510_v35  ;;  %v2489_v4 = vpack.c.bf16 %v2288_v51, %v2287_v53  ;;  %v2369_v35 = vld [vmem:[%s10138_s8 + $0x700] sm:$0xff]  ;;  %v2376_v53 = vld [vmem:[%s10138_s8 + $0x738] sm:$0xff]  ;;  %v2362_v50 = vld [vmem:[%s10138_s8 + $0x6c8] sm:$0xff] }
 0xa37   :  { %6416 = vmatprep.subr.bf16.mxu0 %v2494_v39  ;;  %v2522_v39 = vpack.c.bf16 %v2354_v3, %v2353_v0  ;;  %v2361_v51 = vld [vmem:[%s10138_s8 + $0x6c0] sm:$0xff]  ;;  %v2394_v19 = vld [vmem:[%s10138_s8 + $0x7c8] sm:$0xff]  ;;  %v2363_v40 = vld [vmem:[%s10138_s8 + $0x6d0] sm:$0xff] }
 0xa38   :  { %v2526_v52 = vpack.c.bf16 %v2362_v50, %v2361_v51  ;;  %v2378_v21 = vld [vmem:[%s10138_s8 + $0x748] sm:$0xff]  ;;  %v5899_v50 = vld [vmem:[%s10140_s9] ss:$0 sm:$0xff] }
 0xa39   :  { %6439 = vmatpush3.bf16.msra.mxu1 %v2502_v20  ;;  %v2530_v20 = vpack.c.bf16 %v2370_v7, %v2369_v35  ;;  %v2395_v35 = vld [vmem:[%s10138_s8 + $0x7d0] sm:$0xff]  ;;  %v2396_v7 = vld [vmem:[%s10138_s8 + $0x7d8] sm:$0xff] }
 0xa3a   :  { %6417 = vmatpush3.bf16.msra.mxu0 %v2486_v33  ;;  %6440 = vmatprep.subr.bf16.mxu1 %v2511_v46  ;;  %v2388_v33 = vld [vmem:[%s10138_s8 + $0x798] sm:$0xff] }
 0xa3b   :  { %6418 = vmatprep.subr.bf16.mxu0 %v2495_v29  ;;  %v2339_v29 = vld [vmem:[%s10138_s8 + $0x610] sm:$0xff]  ;;  %v2372_v46 = vld [vmem:[%s10138_s8 + $0x718] sm:$0xff]  ;;  %v2539_v30 = vpack.c.bf16 %v2388_v33, %v2387_v27 }
 0xa3c   :  { %v2347_v27 = vld [vmem:[%s10138_s8 + $0x650] sm:$0xff]  ;;  %v2348_v33 = vld [vmem:[%s10138_s8 + $0x658] sm:$0xff] }
 0xa3d   :  { %6441 = vmatpush3.bf16.msra.mxu1 %v2503_v34  ;;  %v2531_v34 = vpack.c.bf16 %v2372_v46, %v2371_v41  ;;  %v2365_v41 = vld [vmem:[%s10138_s8 + $0x6e0] sm:$0xff] }
 0xa3e   :  { %6419 = vmatpush3.bf16.msra.mxu0 %v2487_v36  ;;  %6442 = vmatprep.subr.bf16.mxu1 %v2512_v24  ;;  %v2515_v36 = vpack.c.bf16 %v2340_v28, %v2339_v29  ;;  %v2360_v24 = vld [vmem:[%s10138_s8 + $0x6b8] sm:$0xff]  ;;  %v2543_v29 = vpack.c.bf16 %v2396_v7, %v2395_v35  ;;  %v2397_v46 = vld [vmem:[%s10138_s8 + $0x7e0] sm:$0xff] }
 0xa3f   :  { %6420 = vmatprep.subr.bf16.mxu0 %v2496_v56  ;;  %v2524_v56 = vpack.c.bf16 %v2358_v13, %v2357_v16  ;;  %v2525_v12 = vpack.c.bf16 %v2360_v24, %v2359_v37  ;;  %v2380_v28 = vld [vmem:[%s10138_s8 + $0x758] sm:$0xff]  ;;  %v2398_v16 = vld [vmem:[%s10138_s8 + $0x7e8] sm:$0xff]  ;;  %v2519_v13 = vpack.c.bf16 %v2348_v33, %v2347_v27 }
 0xa41   :  { %6443 = vmatpush3.bf16.msra.mxu1 %v2504_v32  ;;  %v2375_v32 = vld [vmem:[%s10138_s8 + $0x730] sm:$0xff] }
 0xa42   :  { %6421 = vmatpush3.bf16.msra.mxu0 %v2488_v22  ;;  %6444 = vmatprep.subr.bf16.mxu1 %v2513_v55  ;;  %v2344_v22 = vld [vmem:[%s10138_s8 + $0x638] sm:$0xff]  ;;  %v2393_v55 = vld [vmem:[%s10138_s8 + $0x7c0] sm:$0xff]  ;;  %v2533_v3 = vpack.c.bf16 %v2376_v53, %v2375_v32 }
 0xa43   :  { %6422 = vmatprep.subr.bf16.mxu0 %v2497_v17  ;;  %v2517_v0 = vpack.c.bf16 %v2344_v22, %v2343_v44  ;;  %v2384_v44 = vld [vmem:[%s10138_s8 + $0x778] sm:$0xff] }
 0xa45   :  { %6445 = vmatpush3.bf16.msra.mxu1 %v2505_v5  ;;  %v2377_v5 = vld [vmem:[%s10138_s8 + $0x740] sm:$0xff] }
 0xa46   :  { %6423 = vmatpush3.bf16.msra.mxu0 %v2489_v4  ;;  %6474 = vmatprep.subr.bf16.mxu1 %v2538_v59  ;;  %v2346_v4 = vld [vmem:[%s10138_s8 + $0x648] sm:$0xff]  ;;  %v2364_v59 = vld [vmem:[%s10138_s8 + $0x6d8] sm:$0xff]  ;;  %v2534_v8 = vpack.c.bf16 %v2378_v21, %v2377_v5 }
 0xa47   :  { %6452 = vmatprep.subr.bf16.mxu0 %v2522_v39  ;;  %v2542_v39 = vpack.c.bf16 %v2394_v19, %v2393_v55  ;;  %v2518_v6 = vpack.c.bf16 %v2346_v4, %v2345_v47 }
 0xa48   :  { %2790 = vmatmul.mubr.bf16.vlgmr.msra.gmra.mrb[48].mxu1 %v8137_v54  ;;  %v2540_v54 = vpack.c.bf16 %v2390_v18, %v2389_v42  ;;  %v2349_v18 = vld [vmem:[%s10138_s8 + $0x660] sm:$0xff] }
 0xa49   :  { %2749 = vmatmul.mubr.bf16.vlgmr.msra.gmra.mrb[44].mxu0 %v8135_v45  ;;  %6475 = vmatpush3.bf16.msra.mxu1 %v2530_v20  ;;  %v2341_v45 = vld [vmem:[%s10138_s8 + $0x620] sm:$0xff]  ;;  %v2379_v20 = vld [vmem:[%s10138_s8 + $0x750] sm:$0xff] }
 0xa4a   :  { %6453 = vmatpush3.bf16.msra.mxu0 %v2514_v48  ;;  %2830 = vmatprep.mubr.bf16.mxu0 %v8210_v43  ;;  %v2374_v43 = vld [vmem:[%s10138_s8 + $0x728] sm:$0xff]  ;;  %v2516_v25 = vpack.c.bf16 %v2342_v26, %v2341_v45  ;;  %v2527_v48 = vpack.c.bf16 %v2364_v59, %v2363_v40  ;;  %v2367_v26 = vld [vmem:[%s10138_s8 + $0x6f0] sm:$0xff] }
 0xa4b   :  { %2871 = vmatprep.mubr.bf16.mxu1 %v8212_v23  ;;  %6454 = vmatprep.subr.bf16.mxu0 %v2523_v38  ;;  %v2392_v23 = vld [vmem:[%s10138_s8 + $0x7b8] sm:$0xff]  ;;  %v2532_v11 = vpack.c.bf16 %v2374_v43, %v2373_v49  ;;  %v2366_v38 = vld [vmem:[%s10138_s8 + $0x6e8] sm:$0xff] }
 0xa4c   :  { %6476 = vmatprep.subr.bf16.mxu1 %v2539_v30  ;;  %v2541_v17 = vpack.c.bf16 %v2392_v23, %v2391_v31  ;;  %v2535_v30 = vpack.c.bf16 %v2380_v28, %v2379_v20  ;;  %v2528_v42 = vpack.c.bf16 %v2366_v38, %v2365_v41  ;;  %v2382_v45 = vld [vmem:[%s10138_s8 + $0x768] sm:$0xff]  ;;  %v2368_v49 = vld [vmem:[%s10138_s8 + $0x6f8] sm:$0xff]  ;;  %v2351_v23 = vld [vmem:[%s10138_s8 + $0x670] sm:$0xff] }
 0xa4d   :  { %6477 = vmatpush3.bf16.msra.mxu1 %v2531_v34  ;;  %v2381_v34 = vld [vmem:[%s10138_s8 + $0x760] sm:$0xff]  ;;  %v2400_v43 = vld [vmem:[%s10138_s8 + $0x7f8] sm:$0xff]  ;;  %v2529_v31 = vpack.c.bf16 %v2368_v49, %v2367_v26 }
 0xa4e   :  { %6455 = vmatpush3.bf16.msra.mxu0 %v2515_v36  ;;  %6478 = vmatprep.subr.bf16.mxu1 %v2540_v54  ;;  %v2350_v36 = vld [vmem:[%s10138_s8 + $0x668] sm:$0xff]  ;;  %v2399_v54 = vld [vmem:[%s10138_s8 + $0x7f0] sm:$0xff]  ;;  %v2536_v24 = vpack.c.bf16 %v2382_v45, %v2381_v34 }
 0xa4f   :  { %6456 = vmatprep.subr.bf16.mxu0 %v2524_v56  ;;  %v2544_v56 = vpack.c.bf16 %v2398_v16, %v2397_v46  ;;  %v2520_v37 = vpack.c.bf16 %v2350_v36, %v2349_v18 }
 0xa51   :  { %6479 = vmatpush3.bf16.msra.mxu1 %v2532_v11  ;;  %v2545_v11 = vpack.c.bf16 %v2400_v43, %v2399_v54 }
 0xa52   :  { %6457 = vmatpush3.bf16.msra.mxu0 %v2516_v25  ;;  %6480 = vmatprep.subr.bf16.mxu1 %v2541_v17  ;;  %v2352_v25 = vld [vmem:[%s10138_s8 + $0x678] sm:$0xff]  ;;  %v10171_v17 = vmov 0.0  }
 0xa53   :  { %6458 = vmatprep.subr.bf16.mxu0 %v2525_v12  ;;  %v2383_v12 = vld [vmem:[%s10138_s8 + $0x770] sm:$0xff]  ;;  %v2521_v22 = vpack.c.bf16 %v2352_v25, %v2351_v23 }
 0xa54   :  { %v2537_v32 = vpack.c.bf16 %v2384_v44, %v2383_v12 }
 0xa55   :  { %6481 = vmatpush3.bf16.msra.mxu1 %v2533_v3 }
 0xa56   :  { %6459 = vmatpush3.bf16.msra.mxu0 %v2517_v0  ;;  %6482 = vmatprep.subr.bf16.mxu1 %v2542_v39 }
 0xa57   :  { %6460 = vmatprep.subr.bf16.mxu0 %v2526_v52 }
 0xa59   :  { %6483 = vmatpush3.bf16.msra.mxu1 %v2534_v8 }
 0xa5a   :  { %6461 = vmatpush3.bf16.msra.mxu0 %v2518_v6  ;;  %6484 = vmatprep.subr.bf16.mxu1 %v2543_v29 }
 0xa5b   :  { %6462 = vmatprep.subr.bf16.mxu0 %v2527_v48 }
 0xa5d   :  { %6485 = vmatpush3.bf16.msra.mxu1 %v2535_v30 }
 0xa5e   :  { %6463 = vmatpush3.bf16.msra.mxu0 %v2519_v13  ;;  %6486 = vmatprep.subr.bf16.mxu1 %v2544_v56 }
 0xa5f   :  { %6464 = vmatprep.subr.bf16.mxu0 %v2528_v42 }
 0xa61   :  { %6487 = vmatpush3.bf16.msra.mxu1 %v2536_v24 }
 0xa62   :  { %6465 = vmatpush3.bf16.msra.mxu0 %v2520_v37  ;;  %6488 = vmatprep.subr.bf16.mxu1 %v2545_v11 }
 0xa63   :  { %6466 = vmatprep.subr.bf16.mxu0 %v2529_v31 }
 0xa65   :  { %6489 = vmatpush3.bf16.msra.mxu1 %v2537_v32 }
 0xa66   :  { %6467 = vmatpush3.bf16.msra.mxu0 %v2521_v22  ;;  %6817 = vmatprep.subr.mxu1 %v10171_v17 }
 0xa67   :  { %6809 = vmatprep.subr.bf16.mxu0 %v10171_v17 }
 0xa68   :  { %2872 = vmatmul.mubr.bf16.vlgmr.msra.gmra.mrb[52].mxu1 %v8208_v15 }
 0xa69   :  { %2831 = vmatmul.mubr.bf16.vlgmr.msra.gmra.mrb[48].mxu0 %v8206_v14  ;;  %6819 = vmatprep.mubr.msk.f32.mxu1 %vm7041_vm0, %v10171_v17 }
 0xa6a   :  { %6813 = vmatprep.mubr.msk.bf16.mxu0 %vm7041_vm0, %v10171_v17 }
 0xadb   :  { %v6336_v53 = vpop.f32.mrb[36].mxu0  ;;  %v6358_v51 = vpop.f32.mrb[40].mxu1 }
 0xadc   :  { %v6337_v55 = vpop.f32.mrb[37].mxu0  ;;  %v6359_v19 = vpop.f32.mrb[41].mxu1 }
 0xadd   :  { %v6338_v0 = vadd.f32 %v6337_v55, %v6336_v53  ;;  %v6360_v3 = vadd.f32 %v6359_v19, %v6358_v51  ;;  %v6339_v52 = vpop.f32.mrb[38].mxu0  ;;  %v6361_v14 = vpop.f32.mrb[42].mxu1 }
 0xade   :  { %v6340_v47 = vpop.f32.mrb[39].mxu0  ;;  %v6362_v15 = vpop.f32.mrb[43].mxu1 }
 0xadf   :  { %v2587_v4 = vadd.f32 %v6338_v0, %v5899_v50  ;;  %v6341_v5 = vadd.f32 %v6340_v47, %v6339_v52  ;;  %v6363_v39 = vadd.f32 %v6362_v15, %v6361_v14 }
 0xae1   :  { %v2628_v21 = vadd.f32 %v6360_v3, %v2587_v4  ;;  %v2590_v40 = vadd.f32 %v6341_v5, %v5899_v50 }
 0xae3   :  { %v2631_v59 = vadd.f32 %v6363_v39, %v2590_v40 }
 0xafb   :  { %v6402_v7 = vpop.f32.mrb[44].mxu1 }
 0xafc   :  { %v6380_v35 = vpop.f32.mrb[40].mxu0  ;;  %v6403_v8 = vpop.f32.mrb[45].mxu1 }
 0xafd   :  { %v6381_v6 = vpop.f32.mrb[41].mxu0  ;;  %v6404_v27 = vadd.f32 %v6403_v8, %v6402_v7  ;;  %v6405_v20 = vpop.f32.mrb[46].mxu1 }
 0xafe   :  { %v6382_v48 = vadd.f32 %v6381_v6, %v6380_v35  ;;  %v6383_v33 = vpop.f32.mrb[42].mxu0  ;;  %v6406_v28 = vpop.f32.mrb[47].mxu1 }
 0xaff   :  { %v6384_v29 = vpop.f32.mrb[43].mxu0  ;;  %v6407_v46 = vadd.f32 %v6406_v28, %v6405_v20 }
 0xb00   :  { %v2669_v41 = vadd.f32 %v6382_v48, %v2628_v21  ;;  %v6385_v38 = vadd.f32 %v6384_v29, %v6383_v33  ;;  %v5903_v29 = vld [vmem:[%s10169_s23 + $0x28] sm:$0xff] }
 0xb02   :  { %v2710_v16 = vadd.f32 %v6404_v27, %v2669_v41  ;;  %v2672_v13 = vadd.f32 %v6385_v38, %v2631_v59  ;;  %v5904_v41 = vld [vmem:[%s10169_s23 + $0x30] sm:$0xff]  ;;  %v5905_v38 = vld [vmem:[%s10169_s23 + $0x38] sm:$0xff] }
 0xb04   :  { %v2713_v30 = vadd.f32 %v6407_v46, %v2672_v13  ;;  %v2935_v46 = vpack.c.bf16 %v5905_v38, %v5904_v41 }
 0xb1b   :  { %v6446_v18 = vpop.f32.mrb[48].mxu1 }
 0xb1c   :  { %v6424_v42 = vpop.f32.mrb[44].mxu0  ;;  %v6447_v56 = vpop.f32.mrb[49].mxu1 }
 0xb1d   :  { %v6425_v36 = vpop.f32.mrb[45].mxu0  ;;  %v6448_v26 = vadd.f32 %v6447_v56, %v6446_v18  ;;  %v6449_v49 = vpop.f32.mrb[50].mxu1  ;;  %v5900_v56 = vld [vmem:[%s10141_s12] ss:$0 sm:$0xff] }
 0xb1e   :  { %v6426_v34 = vadd.f32 %v6425_v36, %v6424_v42  ;;  %v6427_v45 = vpop.f32.mrb[46].mxu0  ;;  %v6450_v24 = vpop.f32.mrb[51].mxu1 }
 0xb1f   :  { %v6428_v54 = vpop.f32.mrb[47].mxu0  ;;  %v6451_v31 = vadd.f32 %v6450_v24, %v6449_v49 }
 0xb20   :  { %v2751_v43 = vadd.f32 %v6426_v34, %v2710_v16  ;;  %v6429_v37 = vadd.f32 %v6428_v54, %v6427_v45 }
 0xb22   :  { %v2792_v23 = vadd.f32 %v6448_v26, %v2751_v43  ;;  %v2754_v25 = vadd.f32 %v6429_v37, %v2713_v30  ;;  %v5901_v43 = vld [vmem:[%s10142_s13] ss:$0 sm:$0xff] }
 0xb24   :  { %v2795_v11 = vadd.f32 %v6451_v31, %v2754_v25  ;;  %v5907_v25 = vld [vmem:[%s10132_s3 + $0x1] ss:$0 sm:$0xff]  ;;  %s10173_s3 = smov 72  }
 0xb3b   :  { %v6490_v44 = vpop.f32.mrb[52].mxu1 }
 0xb3c   :  { %v6468_v12 = vpop.f32.mrb[48].mxu0  ;;  %v6491_v53 = vpop.f32.mrb[53].mxu1 }
 0xb3d   :  { %v6469_v22 = vpop.f32.mrb[49].mxu0  ;;  %v6492_v50 = vadd.f32 %v6491_v53, %v6490_v44  ;;  %v6493_v55 = vpop.f32.mrb[54].mxu1 }
 0xb3e   :  { %v6470_v32 = vadd.f32 %v6469_v22, %v6468_v12  ;;  %v6471_v51 = vpop.f32.mrb[50].mxu0  ;;  %v6494_v52 = vpop.f32.mrb[55].mxu1 }
 0xb3f   :  { %v6472_v19 = vpop.f32.mrb[51].mxu0  ;;  %v6495_v14 = vadd.f32 %v6494_v52, %v6493_v55 }
 0xb40   :  { %v2833_v0 = vadd.f32 %v6470_v32, %v2792_v23  ;;  %v6473_v3 = vadd.f32 %v6472_v19, %v6471_v51 }
 0xb42   :  { %v2874_v47 = vadd.f32 %v6492_v50, %v2833_v0  ;;  %v2836_v15 = vadd.f32 %v6473_v3, %v2795_v11 }
 0xb44   :  { %v2877_v4 = vadd.f32 %v6495_v14, %v2836_v15  ;;  %v2880_v5 = vadd.f32 %v2874_v47, %v7462_v9 }
 0xb46   :  { %v2884_v39 = vsel %vm76_vm1, %v2880_v5, 0.0  ;;  %v2881_v21 = vadd.f32 %v2877_v4, %v7464_v10  ;;  %v5902_v10 = vld [vmem:[%s10169_s23 + $0x20] sm:$0xff] }
 0xb47   :  { %2885 = vadd.xlane.f32.xlu0 %v2884_v39  ;;  %v2934_v28 = vpack.c.bf16 %v5903_v29, %v5902_v10 }
 0xb48   :  { %v2887_v40 = vsel %vm76_vm1, %v2881_v21, 0.0 }
 0xb49   :  { %2888 = vadd.xlane.f32.xlu1 %v2887_v40  ;;  %6810 = vmatpush3.bf16.msra.mxu0 %v2934_v28 }
 0xb4a   :  { %6811 = vmatprep.subr.bf16.mxu0 %v10171_v17 }
 0xb4d   :  { %6812 = vmatpush3.bf16.msra.mxu0 %v2935_v46 }
 0xb4e   :  { %6822 = vmatprep.subr.mxu0 %v10171_v17 }
 0xbd4   :  { %v2886_v59 = vpop.xlane.xlu0 %2885 }
 0xbd5   :  { %v2890_v35 = vmul.f32 0.03125, %v2886_v59 }
 0xbd6   :  { %v2889_v7 = vpop.xlane.xlu1 %2888 }
 0xbd7   :  { %v2892_v6 = vsub.f32 %v2880_v5, %v2890_v35  ;;  %v2891_v8 = vmul.f32 0.03125, %v2889_v7 }
 0xbd9   :  { %v2893_v48 = vsub.f32 %v2881_v21, %v2891_v8  ;;  %v2894_v27 = vmul.f32 %v2892_v6, %v2892_v6 }
 0xbdb   :  { %v2896_v33 = vsel %vm76_vm1, %v2894_v27, 0.0  ;;  %v2895_v20 = vmul.f32 %v2893_v48, %v2893_v48 }
 0xbdc   :  { %2897 = vadd.xlane.f32.xlu0 %v2896_v33 }
 0xbdd   :  { %v2899_v9 = vsel %vm76_vm1, %v2895_v20, 0.0 }
 0xbde   :  { %2900 = vadd.xlane.f32.xlu1 %v2899_v9 }
 0xc69   :  { %v2898_v16 = vpop.xlane.xlu0 %2897 }
 0xc6a   :  { %v2902_v13 = vmul.f32 0.03125, %v2898_v16 }
 0xc6b   :  { %v2901_v30 = vpop.xlane.xlu1 %2900 }
 0xc6c   :  { %v2904_v42 = vadd.f32 1e-05, %v2902_v13  ;;  %v2903_v18 = vmul.f32 0.03125, %v2901_v30 }
 0xc6e   :  { %6996 = vrsqrt.f32 %v2904_v42  ;;  %v2905_v36 = vadd.f32 1e-05, %v2903_v18 }
 0xc70   :  { %6998 = vrsqrt.f32 %v2905_v36 }
 0xc78   :  { %v6997_v34 = vpop.eup %6996 }
 0xc79   :  { %v2908_v45 = vmul.f32 %v6997_v34, %v2892_v6 }
 0xc7a   :  { %v6999_v26 = vpop.eup %6998 }
 0xc7b   :  { %v2916_v49 = vmul.f32 %v5900_v56, %v2908_v45  ;;  %v2909_v54 = vmul.f32 %v6999_v26, %v2893_v48 }
 0xc7d   :  { %v2917_v37 = vmul.f32 %v5900_v56, %v2909_v54  ;;  %v8655_v24 = vadd.f32 %v5901_v43, %v2916_v49 }
 0xc7f   :  { %v8657_v31 = vadd.f32 %v5901_v43, %v2917_v37 }
 0xc81   :  { %v2933_v23 = vpack.c.bf16 %v8657_v31, %v8655_v24 }
 0xc83   :  { %6814 = vmatmul.mubr.msk.bf16.vlgmr.msra.gmra.mrb[52].mxu0 %vm76_vm1, %v2933_v23 }
 0xc84   :  { %6824 = vmatprep.mubr.msk.f32.mxu0 %vm7041_vm0, %v10171_v17 }
 0xd56   :  { %v2979_v11 = vpop.f32.mrb[52].mxu0 }
 0xd57   :  { %v8667_v12 = vadd.f32 %v5907_v25, %v2979_v11  ;;  %v6815_v44 = vpop.f32.mrb[53].mxu0 }
 0xd58   :  { %v2982_v22 = vpop.f32.mrb[54].mxu0 }
 0xd59   :  { %3153 = vrot.lane.b32.xlu1 %v8667_v12, %s7044_s26  ;;  %2987 = vrot.lane.b32.xlu0 %v8667_v12, %s7043_s25  ;;  %v6816_v32 = vpop.f32.mrb[55].mxu0  ;;  %v8681_v53 = vadd.f32 %v5907_v25, %v2982_v22 }
 0xd5d   :  { %3151 = vrot.lane.b32.xlu1 %v8667_v12, %s7045_s27  ;;  %3319 = vrot.lane.b32.xlu0 %v8667_v12, %s7046_s28 }
 0xd61   :  { %3317 = vrot.lane.b32.xlu1 %v8667_v12, %s10172_s2  ;;  %3485 = vrot.lane.b32.xlu0 %v8667_v12, %s10173_s3 }
 0xd65   :  { %3483 = vrot.lane.b32.xlu1 %v8667_v12, %s10174_s29  ;;  %3665 = vrot.lane.b32.xlu0 %v8681_v53, %s7043_s25  ;;  %s10176_s25 = smov 48  }
 0xd69   :  { %3831 = vrot.lane.b32.xlu1 %v8681_v53, %s7044_s26  ;;  %3829 = vrot.lane.b32.xlu0 %v8681_v53, %s7045_s27  ;;  %s10177_s26 = smov 56   ;;  %s10178_s27 = smov 40  }
 0xd6d   :  { %3997 = vrot.lane.b32.xlu1 %v8681_v53, %s7046_s28  ;;  %3995 = vrot.lane.b32.xlu0 %v8681_v53, %s10172_s2 }
 0xd71   :  { %4163 = vrot.lane.b32.xlu1 %v8681_v53, %s10173_s3  ;;  %4161 = vrot.lane.b32.xlu0 %v8681_v53, %s10174_s29 }
 0xd75   :  { %3075 = vrot.lane.b32.xlu1 %v8667_v12, %s10175_s20 }
 0xdcb   :  { %v3154_v51 = vpop.permute.xlu1 %3153  ;;  %v2988_v50 = vpop.permute.xlu0 %2987 }
 0xdcc   :  { %6818 = vmatpush3.xpose.msk.msra.mxu1 %vm124_vm2, %v2988_v50 }
 0xdcd   :  { %6827 = vmatprep.subr.mxu1 %v10171_v17 }
 0xdcf   :  { %v3152_v55 = vpop.permute.xlu1 %3151  ;;  %6820 = vmatmul.mubr.msk.f32.vlgmr.msra.gmra.mrb[18].mxu1 %vm124_vm2, %v8667_v12  ;;  %v3320_v19 = vpop.permute.xlu0 %3319 }
 0xdd0   :  { %6828 = vmatpush3.xpose.msk.msra.mxu1 %vm124_vm2, %v3154_v51  ;;  %6829 = vmatprep.mubr.msk.f32.mxu1 %vm7041_vm0, %v10171_v17 }
 0xdd1   :  { %6837 = vmatprep.subr.mxu1 %v10171_v17 }
 0xdd3   :  { %v3318_v0 = vpop.permute.xlu1 %3317  ;;  %6830 = vmatmul.mubr.msk.f32.vlgmr.msra.gmra.mrb[56].mxu1 %vm124_vm2, %v3152_v55  ;;  %v3486_v3 = vpop.permute.xlu0 %3485 }
 0xdd4   :  { %6838 = vmatpush3.xpose.msk.msra.mxu1 %vm124_vm2, %v3320_v19  ;;  %6839 = vmatprep.mubr.msk.f32.mxu1 %vm7041_vm0, %v10171_v17 }
 0xdd5   :  { %6847 = vmatprep.subr.mxu1 %v10171_v17 }
 0xdd7   :  { %v3484_v52 = vpop.permute.xlu1 %3483  ;;  %6840 = vmatmul.mubr.msk.f32.vlgmr.msra.gmra.mrb[58].mxu1 %vm124_vm2, %v3318_v0  ;;  %v3666_v14 = vpop.permute.xlu0 %3665 }
 0xdd8   :  { %6848 = vmatpush3.xpose.msk.msra.mxu1 %vm124_vm2, %v3486_v3  ;;  %6849 = vmatprep.mubr.msk.f32.mxu1 %vm7041_vm0, %v10171_v17 }
 0xdd9   :  { %6857 = vmatprep.subr.mxu1 %v10171_v17 }
 0xddb   :  { %6850 = vmatmul.mubr.msk.f32.vlgmr.msra.gmra.mrb[60].mxu1 %vm124_vm2, %v3484_v52  ;;  %v3832_v47 = vpop.permute.xlu1 %3831  ;;  %v3830_v15 = vpop.permute.xlu0 %3829 }
 0xddc   :  { %6858 = vmatpush3.xpose.msk.msra.mxu1 %vm124_vm2, %v3666_v14  ;;  %6859 = vmatprep.mubr.msk.f32.mxu1 %vm7041_vm0, %v10171_v17 }
 0xddd   :  { %6867 = vmatprep.subr.mxu1 %v10171_v17 }
 0xddf   :  { %v3998_v4 = vpop.permute.xlu1 %3997  ;;  %6860 = vmatmul.mubr.msk.f32.vlgmr.msra.gmra.mrb[62].mxu1 %vm124_vm2, %v8681_v53  ;;  %v3996_v39 = vpop.permute.xlu0 %3995 }
 0xde0   :  { %6868 = vmatpush3.xpose.msk.msra.mxu1 %vm124_vm2, %v3832_v47  ;;  %6869 = vmatprep.mubr.msk.f32.mxu1 %vm7041_vm0, %v10171_v17 }
 0xde1   :  { %6877 = vmatprep.subr.mxu1 %v10171_v17 }
 0xde3   :  { %v4164_v5 = vpop.permute.xlu1 %4163  ;;  %6870 = vmatmul.mubr.msk.f32.vlgmr.msra.gmra.mrb[64].mxu1 %vm124_vm2, %v3830_v15  ;;  %v4162_v40 = vpop.permute.xlu0 %4161 }
 0xde4   :  { %6878 = vmatpush3.xpose.msk.msra.mxu1 %vm124_vm2, %v3998_v4  ;;  %6879 = vmatprep.mubr.msk.f32.mxu1 %vm7041_vm0, %v10171_v17 }
 0xde5   :  { %6887 = vmatprep.subr.mxu1 %v10171_v17 }
 0xde7   :  { %v3076_v21 = vpop.permute.xlu1 %3075  ;;  %6880 = vmatmul.mubr.msk.f32.vlgmr.msra.gmra.mrb[66].mxu1 %vm124_vm2, %v3996_v39 }
 0xde8   :  { %6823 = vmatpush3.msra.mxu0 %v3076_v21  ;;  %6888 = vmatpush3.xpose.msk.msra.mxu1 %vm124_vm2, %v4164_v5 }
 0xde9   :  { %6889 = vmatprep.mubr.msk.f32.mxu1 %vm7041_vm0, %v10171_v17  ;;  %6832 = vmatprep.subr.mxu0 %v10171_v17 }
 0xdea   :  { %6897 = vmatprep.subr.bf16.mxu1 %v10171_v17 }
 0xdeb   :  { %6890 = vmatmul.mubr.msk.f32.vlgmr.msra.gmra.mrb[68].mxu1 %vm124_vm2, %v4162_v40 }
 0xdec   :  { %6901 = vmatprep.mubr.msk.bf16.mxu1 %vm7041_vm0, %v10171_v17 }
 0xea2   :  { %v3059_v59 = vpop.f32.mrb[18].mxu1 }
 0xea3   :  { %v3063_v35 = vmul.f32 0.35355338, %v3059_v59  ;;  %v6821_v7 = vpop.f32.mrb[19].mxu1 }
 0xea5   :  { %v3064_v6 = vsel %vm124_vm2, %v3063_v35, -inf }
 0xea6   :  { %v3225_v8 = vpop.f32.mrb[56].mxu1  ;;  %3065 = vmax.xlane.f32.xlu1 %v3064_v6 }
 0xea7   :  { %v3229_v48 = vmul.f32 0.35355338, %v3225_v8  ;;  %v6831_v27 = vpop.f32.mrb[57].mxu1 }
 0xea9   :  { %v3230_v33 = vsel %vm124_vm2, %v3229_v48, -inf }
 0xeaa   :  { %v3391_v20 = vpop.f32.mrb[58].mxu1  ;;  %3231 = vmax.xlane.f32.xlu0 %v3230_v33 }
 0xeab   :  { %v3395_v9 = vmul.f32 0.35355338, %v3391_v20  ;;  %v6841_v10 = vpop.f32.mrb[59].mxu1 }
 0xead   :  { %v3396_v29 = vsel %vm124_vm2, %v3395_v9, -inf }
 0xeae   :  { %v3557_v28 = vpop.f32.mrb[60].mxu1  ;;  %3397 = vmax.xlane.f32.xlu0 %v3396_v29 }
 0xeaf   :  { %v3561_v41 = vmul.f32 0.35355338, %v3557_v28  ;;  %v6851_v38 = vpop.f32.mrb[61].mxu1 }
 0xeb1   :  { %v3562_v46 = vsel %vm124_vm2, %v3561_v41, -inf }
 0xeb2   :  { %3563 = vmax.xlane.f32.xlu1 %v3562_v46  ;;  %v3737_v16 = vpop.f32.mrb[62].mxu1 }
 0xeb3   :  { %v3741_v13 = vmul.f32 0.35355338, %v3737_v16  ;;  %v6861_v30 = vpop.f32.mrb[63].mxu1 }
 0xeb5   :  { %v3742_v42 = vsel %vm124_vm2, %v3741_v13, -inf }
 0xeb6   :  { %3743 = vmax.xlane.f32.xlu0 %v3742_v42  ;;  %v3903_v18 = vpop.f32.mrb[64].mxu1 }
 0xeb7   :  { %v3907_v36 = vmul.f32 0.35355338, %v3903_v18  ;;  %v6871_v34 = vpop.f32.mrb[65].mxu1 }
 0xeb9   :  { %v3908_v56 = vsel %vm124_vm2, %v3907_v36, -inf }
 0xeba   :  { %3909 = vmax.xlane.f32.xlu1 %v3908_v56  ;;  %v4069_v45 = vpop.f32.mrb[66].mxu1 }
 0xebb   :  { %v4073_v26 = vmul.f32 0.35355338, %v4069_v45  ;;  %v6881_v49 = vpop.f32.mrb[67].mxu1 }
 0xebd   :  { %v4074_v54 = vsel %vm124_vm2, %v4073_v26, -inf }
 0xebe   :  { %4075 = vmax.xlane.f32.xlu0 %v4074_v54  ;;  %v4235_v43 = vpop.f32.mrb[68].mxu1 }
 0xebf   :  { %v6891_v37 = vpop.f32.mrb[69].mxu1  ;;  %v4239_v23 = vmul.f32 0.35355338, %v4235_v43 }
 0xec1   :  { %v4240_v25 = vsel %vm124_vm2, %v4239_v23, -inf }
 0xecb   :  { %3407 = vrot.lane.b32.xlu1 %v8667_v12, %s10176_s25 }
 0xed4   :  { %3241 = vrot.lane.b32.xlu0 %v8667_v12, %s10177_s26 }
 0xeef   :  { %4241 = vmax.xlane.f32.xlu1 %v4240_v25 }
 0xf00   :  { %3573 = vrot.lane.b32.xlu1 %v8667_v12, %s10178_s27 }
 0xf33   :  { %v3066_v11 = vpop.xlane.xlu1 %3065 }
 0xf34   :  { %v3067_v44 = vsub.f32 %v3063_v35, %v3066_v11 }
 0xf36   :  { %v3068_v22 = vmul.f32 1.442695, %v3067_v44 }
 0xf37   :  { %v3232_v32 = vpop.xlane.xlu0 %3231 }
 0xf38   :  { %7000 = vpow2.f32 %v3068_v22  ;;  %v3233_v51 = vsub.f32 %v3229_v48, %v3232_v32 }
 0xf3a   :  { %v3234_v50 = vmul.f32 1.442695, %v3233_v51 }
 0xf3b   :  { %v3398_v55 = vpop.xlane.xlu0 %3397 }
 0xf3c   :  { %7002 = vpow2.f32 %v3234_v50  ;;  %v3399_v19 = vsub.f32 %v3395_v9, %v3398_v55 }
 0xf3e   :  { %v3400_v0 = vmul.f32 1.442695, %v3399_v19 }
 0xf3f   :  { %v3564_v4 = vpop.xlane.xlu1 %3563 }
 0xf40   :  { %7004 = vpow2.f32 %v3400_v0  ;;  %v3565_v5 = vsub.f32 %v3561_v41, %v3564_v4 }
 0xf42   :  { %v7001_v3 = vpop.eup %7000  ;;  %v3566_v59 = vmul.f32 1.442695, %v3565_v5 }
 0xf43   :  { %v3070_v52 = vsel %vm124_vm2, %v7001_v3, 0.0  ;;  %v3744_v39 = vpop.xlane.xlu0 %3743 }
 0xf44   :  { %3071 = vadd.xlane.f32.xlu0 %v3070_v52  ;;  %v3745_v40 = vsub.f32 %v3741_v13, %v3744_v39  ;;  %7006 = vpow2.f32 %v3566_v59 }
 0xf46   :  { %v7003_v14 = vpop.eup %7002  ;;  %v3746_v6 = vmul.f32 1.442695, %v3745_v40 }
 0xf47   :  { %v3236_v47 = vsel %vm124_vm2, %v7003_v14, 0.0  ;;  %v3910_v21 = vpop.xlane.xlu1 %3909 }
 0xf48   :  { %3237 = vadd.xlane.f32.xlu1 %v3236_v47  ;;  %v3911_v35 = vsub.f32 %v3907_v36, %v3910_v21  ;;  %7008 = vpow2.f32 %v3746_v6  ;;  %v10179_v21 = vmov 0  }
 0xf4a   :  { %v8760_v12 = vpop.eup %7004  ;;  %v3912_v8 = vmul.f32 1.442695, %v3911_v35 }
 0xf4b   :  { %v3402_v15 = vsel %vm124_vm2, %v8760_v12, 0.0  ;;  %v4076_v7 = vpop.xlane.xlu0 %4075  ;;  %v3408_v33 = vpop.permute.xlu1 %3407 }
 0xf4c   :  { %3403 = vadd.xlane.f32.xlu0 %v3402_v15  ;;  %v4077_v48 = vsub.f32 %v4073_v26, %v4076_v7  ;;  %7010 = vpow2.f32 %v3912_v8 }
 0xf4e   :  { %v4078_v27 = vmul.f32 1.442695, %v4077_v48  ;;  %v7007_v20 = vpop.eup %7006 }
 0xf4f   :  { %v3568_v29 = vsel %vm124_vm2, %v7007_v20, 0.0  ;;  %v3242_v36 = vpop.permute.xlu0 %3241 }
 0xf50   :  { %7012 = vpow2.f32 %v4078_v27 }
 0xf52   :  { %v8768_v9 = vpop.eup %7008 }
 0xf53   :  { %v3748_v16 = vsel %vm124_vm2, %v8768_v9, 0.0 }
 0xf56   :  { %v8771_v28 = vpop.eup %7010 }
 0xf57   :  { %v3914_v46 = vsel %vm124_vm2, %v8771_v28, 0.0 }
 0xf59   :  { %3753 = vrot.lane.b32.xlu1 %v8681_v53, %s10175_s20 }
 0xf5a   :  { %v8777_v13 = vpop.eup %7012 }
 0xf5b   :  { %v4080_v30 = vsel %vm124_vm2, %v8777_v13, 0.0 }
 0xf62   :  { %3919 = vrot.lane.b32.xlu0 %v8681_v53, %s10177_s26 }
 0xf7c   :  { %v4242_v10 = vpop.xlane.xlu1 %4241 }
 0xf7d   :  { %v4243_v41 = vsub.f32 %v4239_v23, %v4242_v10  ;;  %3569 = vadd.xlane.f32.xlu1 %v3568_v29 }
 0xf7f   :  { %v4244_v38 = vmul.f32 1.442695, %v4243_v41  ;;  %v5936_v41 = vld [vmem:[%s10133_s4 + $0x38] sm:$0xff] }
 0xf80   :  { %v3574_v34 = vpop.permute.xlu1 %3573 }
 0xf81   :  { %7014 = vpow2.f32 %v4244_v38  ;;  %3915 = vadd.xlane.f32.xlu1 %v3914_v46  ;;  %3749 = vadd.xlane.f32.xlu0 %v3748_v16 }
 0xf85   :  { %4081 = vadd.xlane.f32.xlu0 %v4080_v30 }
 0xf8b   :  { %v8781_v42 = vpop.eup %7014 }
 0xf8c   :  { %v4246_v18 = vsel %vm124_vm2, %v8781_v42, 0.0 }
 0xf8d   :  { %4247 = vadd.xlane.f32.xlu0 %v4246_v18 }
 0xf92   :  { %4085 = vrot.lane.b32.xlu1 %v8681_v53, %s10176_s25 }
 0xfa3   :  { %4251 = vrot.lane.b32.xlu0 %v8681_v53, %s10178_s27 }
 0xfd1   :  { %v3072_v56 = vpop.xlane.xlu0 %3071 }
 0xfd2   :  { %7016 = vrcp.f32 %v3072_v56 }
 0xfd5   :  { %v3238_v45 = vpop.xlane.xlu1 %3237 }
 0xfd6   :  { %7018 = vrcp.f32 %v3238_v45 }
 0xfd9   :  { %v3404_v26 = vpop.xlane.xlu0 %3403  ;;  %v3754_v25 = vpop.permute.xlu1 %3753 }
 0xfda   :  { %7020 = vrcp.f32 %v3404_v26 }
 0xfdc   :  { %v7017_v49 = vpop.eup %7016 }
 0xfdd   :  { %v3074_v54 = vmul.f32 %v7017_v49, %v7001_v3  ;;  %v3920_v11 = vpop.permute.xlu0 %3919 }
 0xfdf   :  { %6825 = vmatmul.mubr.msk.f32.vlgmr.msra.gmra.mrb[18].mxu0 %vm124_vm2, %v3074_v54 }
 0xfe0   :  { %v7019_v43 = vpop.eup %7018  ;;  %6833 = vmatpush3.msra.mxu0 %v3242_v36  ;;  %6834 = vmatprep.mubr.msk.f32.mxu0 %vm7041_vm0, %v10171_v17 }
 0xfe1   :  { %v3240_v37 = vmul.f32 %v7019_v43, %v7003_v14  ;;  %6842 = vmatprep.subr.mxu0 %v10171_v17 }
 0xfe3   :  { %6835 = vmatmul.mubr.msk.f32.vlgmr.msra.gmra.mrb[56].mxu0 %vm124_vm2, %v3240_v37 }
 0xfe4   :  { %v7021_v53 = vpop.eup %7020  ;;  %6843 = vmatpush3.msra.mxu0 %v3408_v33  ;;  %6844 = vmatprep.mubr.msk.f32.mxu0 %vm7041_vm0, %v10171_v17  ;;  %v5933_v33 = vld [vmem:[%s10133_s4 + $0x20] sm:$0xff] }
 0xfe5   :  { %v3406_v23 = vmul.f32 %v7021_v53, %v8760_v12  ;;  %6852 = vmatprep.subr.mxu0 %v10171_v17 }
 0xfe7   :  { %6845 = vmatmul.mubr.msk.f32.vlgmr.msra.gmra.mrb[58].mxu0 %vm124_vm2, %v3406_v23 }
 0xfe8   :  { %6853 = vmatpush3.msra.mxu0 %v3574_v34  ;;  %6854 = vmatprep.mubr.msk.f32.mxu0 %vm7041_vm0, %v10171_v17 }
 0xfe9   :  { %6862 = vmatprep.subr.mxu0 %v10171_v17 }
0x100a   :  { %v3570_v44 = vpop.xlane.xlu1 %3569 }
0x100b   :  { %7022 = vrcp.f32 %v3570_v44 }
0x100e   :  { %v3750_v22 = vpop.xlane.xlu0 %3749  ;;  %v3916_v32 = vpop.xlane.xlu1 %3915 }
0x100f   :  { %7024 = vrcp.f32 %v3750_v22 }
0x1010   :  { %7026 = vrcp.f32 %v3916_v32 }
0x1012   :  { %v4082_v51 = vpop.xlane.xlu0 %4081  ;;  %v4086_v12 = vpop.permute.xlu1 %4085 }
0x1013   :  { %7028 = vrcp.f32 %v4082_v51 }
0x1015   :  { %v7023_v50 = vpop.eup %7022 }
0x1016   :  { %v3572_v55 = vmul.f32 %v7023_v50, %v7007_v20  ;;  %v5934_v20 = vld [vmem:[%s10133_s4 + $0x28] sm:$0xff] }
0x1018   :  { %6855 = vmatmul.mubr.msk.f32.vlgmr.msra.gmra.mrb[60].mxu0 %vm124_vm2, %v3572_v55 }
0x1019   :  { %6863 = vmatpush3.msra.mxu0 %v3754_v25  ;;  %6864 = vmatprep.mubr.msk.f32.mxu0 %vm7041_vm0, %v10171_v17  ;;  %v7025_v19 = vpop.eup %7024 }
0x101a   :  { %v4248_v0 = vpop.xlane.xlu0 %4247  ;;  %6872 = vmatprep.subr.mxu0 %v10171_v17  ;;  %v3752_v3 = vmul.f32 %v7025_v19, %v8768_v9  ;;  %v7027_v52 = vpop.eup %7026  ;;  %v4350_v9 = vpack.c.bf16 %v5934_v20, %v5933_v33  ;;  %v5938_v19 = vld [vmem:[%s10134_s5 + $0x1] ss:$0 sm:$0xff]  ;;  %v5961_v20 = vld [vmem:[%s10135_s6 + $0x288] sm:$0xff] }
0x101b   :  { %7030 = vrcp.f32 %v4248_v0  ;;  %v3918_v14 = vmul.f32 %v7027_v52, %v8771_v28  ;;  %v5935_v28 = vld [vmem:[%s10133_s4 + $0x30] sm:$0xff] }
0x101c   :  { %6865 = vmatmul.mubr.msk.f32.vlgmr.msra.gmra.mrb[62].mxu0 %vm124_vm2, %v3752_v3  ;;  %6898 = vmatpush3.bf16.msra.mxu1 %v4350_v9  ;;  %v4351_v38 = vpack.c.bf16 %v5936_v41, %v5935_v28  ;;  %v5947_v9 = vld [vmem:[%s10135_s6 + $0x218] sm:$0xff]  ;;  %v5944_v28 = vld [vmem:[%s10135_s6 + $0x200] sm:$0xff] }
0x101d   :  { %6873 = vmatpush3.msra.mxu0 %v3920_v11  ;;  %6874 = vmatprep.mubr.msk.f32.mxu0 %vm7041_vm0, %v10171_v17  ;;  %v7029_v47 = vpop.eup %7028  ;;  %v5960_v41 = vld [vmem:[%s10135_s6 + $0x280] sm:$0xff] }
0x101e   :  { %6882 = vmatprep.subr.mxu0 %v10171_v17  ;;  %v4084_v15 = vmul.f32 %v7029_v47, %v8777_v13  ;;  %v4252_v5 = vpop.permute.xlu0 %4251  ;;  %6899 = vmatprep.subr.bf16.mxu1 %v10171_v17 }
0x1020   :  { %6875 = vmatmul.mubr.msk.f32.vlgmr.msra.gmra.mrb[64].mxu0 %vm124_vm2, %v3918_v14  ;;  %6900 = vmatpush3.bf16.msra.mxu1 %v4351_v38 }
0x1021   :  { %6883 = vmatpush3.msra.mxu0 %v4086_v12  ;;  %6884 = vmatprep.mubr.msk.f32.mxu0 %vm7041_vm0, %v10171_v17 }
0x1022   :  { %6892 = vmatprep.subr.mxu0 %v10171_v17 }
0x1024   :  { %6885 = vmatmul.mubr.msk.f32.vlgmr.msra.gmra.mrb[66].mxu0 %vm124_vm2, %v4084_v15 }
0x1025   :  { %v7031_v4 = vpop.eup %7030  ;;  %6893 = vmatpush3.msra.mxu0 %v4252_v5  ;;  %6894 = vmatprep.mubr.msk.f32.mxu0 %vm7041_vm0, %v10171_v17 }
0x1026   :  { %v4250_v39 = vmul.f32 %v7031_v4, %v8781_v42 }
0x1028   :  { %6895 = vmatmul.mubr.msk.f32.vlgmr.msra.gmra.mrb[68].mxu0 %vm124_vm2, %v4250_v39 }
0x1029   :  { %4668 = vmatprep.mubr.bf16.mxu0 %v10179_v21 }
0x10b2   :  { %v3147_v40 = vpop.f32.mrb[18].mxu0 }
0x10b3   :  { %v6826_v59 = vpop.f32.mrb[19].mxu0 }
0x10b6   :  { %v3313_v35 = vpop.f32.mrb[56].mxu0 }
0x10b7   :  { %v6836_v7 = vpop.f32.mrb[57].mxu0 }
0x10ba   :  { %v3479_v6 = vpop.f32.mrb[58].mxu0 }
0x10bb   :  { %v6846_v8 = vpop.f32.mrb[59].mxu0 }
0x10eb   :  { %v3645_v48 = vpop.f32.mrb[60].mxu0 }
0x10ec   :  { %v6856_v27 = vpop.f32.mrb[61].mxu0 }
0x10ef   :  { %v3825_v10 = vpop.f32.mrb[62].mxu0 }
0x10f0   :  { %v6866_v29 = vpop.f32.mrb[63].mxu0 }
0x10f1   :  { %v5963_v29 = vld [vmem:[%s10135_s6 + $0x298] sm:$0xff] }
0x10f2   :  { %v4522_v38 = vpack.c.bf16 %v5963_v29, %v5947_v9  ;;  %v5980_v9 = vld [vmem:[%s10135_s6 + $0x320] sm:$0xff] }
0x10f3   :  { %v3991_v46 = vpop.f32.mrb[64].mxu0 }
0x10f4   :  { %v6945_v16 = vpack.i.bf16 %v3991_v46, %v3313_v35  ;;  %v6876_v13 = vpop.f32.mrb[65].mxu0  ;;  %v4519_v46 = vpack.c.bf16 %v5960_v41, %v5944_v28  ;;  %4679 = vmatprep.subr.bf16.mxu1 %v4522_v38  ;;  %v5982_v38 = vld [vmem:[%s10135_s6 + $0x330] sm:$0xff] }
0x10f5   :  { %v5962_v13 = vld [vmem:[%s10135_s6 + $0x290] sm:$0xff] }
0x10f6   :  { %6946 = vrot.lane.b32.xlu1 %v6945_v16, %s10180_s17  ;;  %v5946_v16 = vld [vmem:[%s10135_s6 + $0x210] sm:$0xff] }
0x10f7   :  { %v4157_v30 = vpop.f32.mrb[66].mxu0 }
0x10f8   :  { %v6950_v42 = vpack.i.bf16 %v4157_v30, %v3479_v6  ;;  %v6886_v18 = vpop.f32.mrb[67].mxu0  ;;  %v4521_v30 = vpack.c.bf16 %v5962_v13, %v5946_v16  ;;  %v5953_v16 = vld [vmem:[%s10135_s6 + $0x248] sm:$0xff] }
0x10f9   :  { %v5993_v18 = vld [vmem:[%s10135_s6 + $0x388] sm:$0xff] }
0x10fa   :  { %6951 = vrot.lane.b32.xlu0 %v6950_v42, %s10181_s24  ;;  %v5977_v42 = vld [vmem:[%s10135_s6 + $0x308] sm:$0xff] }
0x10fb   :  { %v4323_v36 = vpop.f32.mrb[68].mxu0  ;;  %v5969_v13 = vld [vmem:[%s10135_s6 + $0x2c8] sm:$0xff] }
0x10fc   :  { %v6955_v34 = vpack.i.bf16 %v4323_v36, %v3645_v48  ;;  %v6896_v56 = vpop.f32.mrb[69].mxu0  ;;  %v5979_v36 = vld [vmem:[%s10135_s6 + $0x318] sm:$0xff] }
0x10fd   :  { %v5995_v56 = vld [vmem:[%s10135_s6 + $0x398] sm:$0xff] }
0x10fe   :  { %6956 = vrot.lane.b32.xlu1 %v6955_v34, %s10182_s30  ;;  %v4536_v34 = vpack.c.bf16 %v5993_v18, %v5977_v42  ;;  %v5971_v42 = vld [vmem:[%s10135_s6 + $0x2d8] sm:$0xff] }
0x1168   :  { %v6947_v45 = vpop.permute.xlu1 %6946 }
0x1169   :  { %v6949_v49 = vunpack.i.h.bf16 %v6947_v45  ;;  %v6948_v54 = vunpack.i.l.bf16 %v6947_v45  ;;  %v5976_v45 = vld [vmem:[%s10135_s6 + $0x300] sm:$0xff] }
0x116b   :  { %v4339_v23 = vsel %vm124_vm2, %v3825_v10, %v6949_v49  ;;  %v3661_v25 = vsel %vm124_vm2, %v3147_v40, %v6948_v54  ;;  %v4538_v49 = vpack.c.bf16 %v5995_v56, %v5979_v36  ;;  %v5968_v56 = vld [vmem:[%s10135_s6 + $0x2c0] sm:$0xff] }
0x116c   :  { %v6952_v26 = vpop.permute.xlu0 %6951 }
0x116d   :  { %v6954_v43 = vunpack.i.h.bf16 %v6952_v26  ;;  %v6953_v37 = vunpack.i.l.bf16 %v6952_v26  ;;  %v5992_v26 = vld [vmem:[%s10135_s6 + $0x380] sm:$0xff] }
0x116e   :  { %v4535_v54 = vpack.c.bf16 %v5992_v26, %v5976_v45  ;;  %v4528_v45 = vpack.c.bf16 %v5969_v13, %v5953_v16  ;;  %v6067_v16 = vld [vmem:[%s10138_s8 + $0x988] sm:$0xff] }
0x116f   :  { %v4340_v22 = vsel %vm798_vm3, %v4339_v23, %v6954_v43  ;;  %v3662_v32 = vsel %vm798_vm3, %v3661_v25, %v6953_v37  ;;  %v5978_v43 = vld [vmem:[%s10135_s6 + $0x310] sm:$0xff]  ;;  %v5949_v23 = vld [vmem:[%s10135_s6 + $0x228] sm:$0xff] }
0x1170   :  { %v6957_v53 = vpop.permute.xlu1 %6956  ;;  %v5994_v37 = vld [vmem:[%s10135_s6 + $0x390] sm:$0xff]  ;;  %v5965_v25 = vld [vmem:[%s10135_s6 + $0x2a8] sm:$0xff] }
0x1171   :  { %v6959_v11 = vunpack.i.h.bf16 %v6957_v53  ;;  %v6958_v44 = vunpack.i.l.bf16 %v6957_v53  ;;  %v4537_v53 = vpack.c.bf16 %v5994_v37, %v5978_v43  ;;  %v5985_v43 = vld [vmem:[%s10135_s6 + $0x348] sm:$0xff] }
0x1172   :  { %v6001_v37 = vld [vmem:[%s10135_s6 + $0x3c8] sm:$0xff] }
0x1173   :  { %v4341_v51 = vsel %vm800_vm4, %v4340_v22, %v6959_v11  ;;  %v3663_v50 = vsel %vm800_vm4, %v3662_v32, %v6958_v44  ;;  %v5951_v11 = vld [vmem:[%s10135_s6 + $0x238] sm:$0xff]  ;;  %v4524_v44 = vpack.c.bf16 %v5965_v25, %v5949_v23 }
0x1174   :  { %v4349_v55 = vpack.c.bf16 %v4341_v51, %v3663_v50  ;;  %v5967_v22 = vld [vmem:[%s10135_s6 + $0x2b8] sm:$0xff] }
0x1175   :  { %v4526_v32 = vpack.c.bf16 %v5967_v22, %v5951_v11  ;;  %v6003_v23 = vld [vmem:[%s10135_s6 + $0x3d8] sm:$0xff]  ;;  %v6000_v22 = vld [vmem:[%s10135_s6 + $0x3c0] sm:$0xff] }
0x1176   :  { %6902 = vmatmul.mubr.msk.bf16.vlgmr.msra.gmra.mrb[72].mxu1 %vm76_vm1, %v4349_v55 }
0x1177   :  { %4711 = vmatprep.mubr.bf16.mxu1 %v10179_v21  ;;  %4680 = vmatpush1.bf16.msra.mxu1 %v4521_v30  ;;  %v5955_v30 = vld [vmem:[%s10135_s6 + $0x258] sm:$0xff] }
0x1178   :  { %4681 = vmatprep.subr.bf16.mxu1 %v4538_v49  ;;  %v4530_v26 = vpack.c.bf16 %v5971_v42, %v5955_v30  ;;  %v5954_v49 = vld [vmem:[%s10135_s6 + $0x250] sm:$0xff]  ;;  %v6018_v42 = vld [vmem:[%s10138_s8 + $0x800] sm:$0xff] }
0x117b   :  { %4682 = vmatpush1.bf16.msra.mxu1 %v4537_v53  ;;  %v5987_v53 = vld [vmem:[%s10135_s6 + $0x358] sm:$0xff] }
0x117c   :  { %4765 = vmatprep.subr.bf16.mxu1 %v4526_v32  ;;  %v4544_v32 = vpack.c.bf16 %v6001_v37, %v5985_v43  ;;  %v6069_v43 = vld [vmem:[%s10138_s8 + $0x998] sm:$0xff] }
0x1249   :  { %v4395_v0 = vpop.f32.mrb[72].mxu1 }
0x124a   :  { %v4396_v3 = vadd.f32 %v5938_v19, %v4395_v0  ;;  %v6903_v52 = vpop.f32.mrb[73].mxu1 }
0x124b   :  { %v4398_v14 = vpop.f32.mrb[74].mxu1 }
0x124c   :  { %v4399_v47 = vadd.f32 %v5938_v19, %v4398_v14  ;;  %v6904_v12 = vpop.f32.mrb[75].mxu1  ;;  %v4402_v15 = vadd.f32 %v4396_v3, %v8655_v24 }
0x124e   :  { %v4403_v4 = vadd.f32 %v4399_v47, %v8657_v31  ;;  %v4408_v5 = vsel %vm76_vm1, %v4402_v15, 0.0  ;;  %v5945_v31 = vld [vmem:[%s10135_s6 + $0x208] sm:$0xff]  ;;  %v5942_v47 = vld [vmem:[%s10136_s10 + $0x1] ss:$0 sm:$0xff] }
0x124f   :  { %4409 = vadd.xlane.f32.xlu0 %v4408_v5  ;;  %v4520_v10 = vpack.c.bf16 %v5961_v20, %v5945_v31  ;;  %v5943_v5 = vld [vmem:[%s10137_s11 + $0x1] ss:$0 sm:$0xff] }
0x1250   :  { %v4411_v39 = vsel %vm76_vm1, %v4403_v4, 0.0 }
0x1251   :  { %4412 = vadd.xlane.f32.xlu1 %v4411_v39  ;;  %4636 = vmatprep.subr.bf16.mxu0 %v4520_v10  ;;  %v5948_v39 = vld [vmem:[%s10135_s6 + $0x220] sm:$0xff] }
0x1252   :  { %4637 = vmatpush1.bf16.msra.mxu0 %v4519_v46  ;;  %v5996_v10 = vld [vmem:[%s10135_s6 + $0x3a0] sm:$0xff]  ;;  %v5998_v46 = vld [vmem:[%s10135_s6 + $0x3b0] sm:$0xff] }
0x1253   :  { %4638 = vmatprep.subr.bf16.mxu0 %v4536_v34  ;;  %v4539_v18 = vpack.c.bf16 %v5996_v10, %v5980_v9  ;;  %v4541_v36 = vpack.c.bf16 %v5998_v46, %v5982_v38  ;;  %v5952_v34 = vld [vmem:[%s10135_s6 + $0x240] sm:$0xff]  ;;  %v5990_v10 = vld [vmem:[%s10135_s6 + $0x370] sm:$0xff]  ;;  %v6035_v38 = vld [vmem:[%s10138_s8 + $0x888] sm:$0xff] }
0x1254   :  { %v4527_v25 = vpack.c.bf16 %v5968_v56, %v5952_v34  ;;  %v6066_v46 = vld [vmem:[%s10138_s8 + $0x980] sm:$0xff] }
0x1255   :  { %v5311_v34 = vpack.c.bf16 %v6067_v16, %v6066_v46  ;;  %v6050_v56 = vld [vmem:[%s10138_s8 + $0x900] sm:$0xff]  ;;  %v6027_v46 = vld [vmem:[%s10138_s8 + $0x848] sm:$0xff] }
0x1256   :  { %4639 = vmatpush1.bf16.msra.mxu0 %v4535_v54  ;;  %v5970_v54 = vld [vmem:[%s10135_s6 + $0x2d0] sm:$0xff] }
0x1257   :  { %4722 = vmatprep.subr.bf16.mxu0 %v4524_v44  ;;  %v4529_v11 = vpack.c.bf16 %v5970_v54, %v5954_v49  ;;  %v5984_v44 = vld [vmem:[%s10135_s6 + $0x340] sm:$0xff]  ;;  %v6037_v49 = vld [vmem:[%s10138_s8 + $0x898] sm:$0xff]  ;;  %v6068_v54 = vld [vmem:[%s10138_s8 + $0x990] sm:$0xff] }
0x12dc   :  { %v4410_v40 = vpop.xlane.xlu0 %4409 }
0x12dd   :  { %v4414_v59 = vmul.f32 0.03125, %v4410_v40  ;;  %v5964_v40 = vld [vmem:[%s10135_s6 + $0x2a0] sm:$0xff] }
0x12de   :  { %v4413_v35 = vpop.xlane.xlu1 %4412  ;;  %v4523_v31 = vpack.c.bf16 %v5964_v40, %v5948_v39  ;;  %v5958_v39 = vld [vmem:[%s10135_s6 + $0x270] sm:$0xff] }
0x12df   :  { %v4416_v7 = vsub.f32 %v4402_v15, %v4414_v59  ;;  %v4415_v6 = vmul.f32 0.03125, %v4413_v35  ;;  %v5950_v35 = vld [vmem:[%s10135_s6 + $0x230] sm:$0xff] }
0x12e0   :  { %v5974_v40 = vld [vmem:[%s10135_s6 + $0x2f0] sm:$0xff] }
0x12e1   :  { %v4417_v8 = vsub.f32 %v4403_v4, %v4415_v6  ;;  %v4418_v48 = vmul.f32 %v4416_v7, %v4416_v7  ;;  %v5981_v6 = vld [vmem:[%s10135_s6 + $0x328] sm:$0xff] }
0x12e3   :  { %v4420_v27 = vsel %vm76_vm1, %v4418_v48, 0.0  ;;  %v4419_v33 = vmul.f32 %v4417_v8, %v4417_v8  ;;  %v5983_v48 = vld [vmem:[%s10135_s6 + $0x338] sm:$0xff] }
0x12e4   :  { %4421 = vadd.xlane.f32.xlu0 %v4420_v27  ;;  %v5999_v27 = vld [vmem:[%s10135_s6 + $0x3b8] sm:$0xff] }
0x12e5   :  { %v4423_v24 = vsel %vm76_vm1, %v4419_v33, 0.0  ;;  %v4542_v41 = vpack.c.bf16 %v5999_v27, %v5983_v48  ;;  %v4533_v48 = vpack.c.bf16 %v5974_v40, %v5958_v39  ;;  %v5988_v27 = vld [vmem:[%s10135_s6 + $0x360] sm:$0xff]  ;;  %v6073_v39 = vld [vmem:[%s10138_s8 + $0x9b8] sm:$0xff] }
0x12e8   :  { %4424 = vadd.xlane.f32.xlu0 %v4423_v24 }
0x1371   :  { %v4422_v51 = vpop.xlane.xlu0 %4421 }
0x1372   :  { %v4426_v50 = vmul.f32 0.03125, %v4422_v51  ;;  %v4546_v51 = vpack.c.bf16 %v6003_v23, %v5987_v53  ;;  %v6021_v23 = vld [vmem:[%s10138_s8 + $0x818] sm:$0xff] }
0x1374   :  { %v4428_v55 = vadd.f32 1e-05, %v4426_v50  ;;  %v5986_v50 = vld [vmem:[%s10135_s6 + $0x350] sm:$0xff] }
0x1375   :  { %v4425_v19 = vpop.xlane.xlu0 %4424 }
0x1376   :  { %7032 = vrsqrt.f32 %v4428_v55  ;;  %v4427_v0 = vmul.f32 0.03125, %v4425_v19  ;;  %v6002_v55 = vld [vmem:[%s10135_s6 + $0x3d0] sm:$0xff]  ;;  %v5957_v19 = vld [vmem:[%s10135_s6 + $0x268] sm:$0xff] }
0x1378   :  { %v4429_v3 = vadd.f32 1e-05, %v4427_v0  ;;  %v5973_v0 = vld [vmem:[%s10135_s6 + $0x2e8] sm:$0xff] }
0x137a   :  { %7034 = vrsqrt.f32 %v4429_v3  ;;  %v5959_v3 = vld [vmem:[%s10135_s6 + $0x278] sm:$0xff] }
0x1380   :  { %v7033_v52 = vpop.eup %7032 }
0x1381   :  { %v4432_v14 = vmul.f32 %v7033_v52, %v4416_v7  ;;  %v5966_v7 = vld [vmem:[%s10135_s6 + $0x2b0] sm:$0xff]  ;;  %v5975_v52 = vld [vmem:[%s10135_s6 + $0x2f8] sm:$0xff] }
0x1382   :  { %v4525_v20 = vpack.c.bf16 %v5966_v7, %v5950_v35  ;;  %v6005_v35 = vld [vmem:[%s10135_s6 + $0x3e8] sm:$0xff]  ;;  %v5991_v7 = vld [vmem:[%s10135_s6 + $0x378] sm:$0xff] }
0x1383   :  { %v4440_v15 = vmul.f32 %v5942_v47, %v4432_v14  ;;  %v4543_v14 = vpack.c.bf16 %v6000_v22, %v5984_v44  ;;  %v6052_v44 = vld [vmem:[%s10138_s8 + $0x910] sm:$0xff]  ;;  %v6053_v22 = vld [vmem:[%s10138_s8 + $0x918] sm:$0xff] }
0x1384   :  { %v7035_v12 = vpop.eup %7034 }
0x1385   :  { %v4433_v4 = vmul.f32 %v7035_v12, %v4417_v8  ;;  %v5997_v8 = vld [vmem:[%s10135_s6 + $0x3a8] sm:$0xff]  ;;  %v8946_v33 = vadd.f32 %v5943_v5, %v4440_v15  ;;  %v5956_v12 = vld [vmem:[%s10135_s6 + $0x260] sm:$0xff] }
0x1386   :  { %v4540_v28 = vpack.c.bf16 %v5997_v8, %v5981_v6  ;;  %v5972_v15 = vld [vmem:[%s10135_s6 + $0x2e0] sm:$0xff]  ;;  %v6007_v6 = vld [vmem:[%s10135_s6 + $0x3f8] sm:$0xff] }
0x1387   :  { %v4441_v59 = vmul.f32 %v5942_v47, %v4433_v4  ;;  %v4545_v47 = vpack.c.bf16 %v6002_v55, %v5986_v50  ;;  %v4532_v4 = vpack.c.bf16 %v5973_v0, %v5957_v19  ;;  %v4531_v8 = vpack.c.bf16 %v5972_v15, %v5956_v12  ;;  %v6070_v50 = vld [vmem:[%s10138_s8 + $0x9a0] sm:$0xff]  ;;  %v6071_v55 = vld [vmem:[%s10138_s8 + $0x9a8] sm:$0xff]  ;;  %v6040_v15 = vld [vmem:[%s10138_s8 + $0x8b0] sm:$0xff] }
0x1388   :  { %v4550_v9 = vpack.c.bf16 %v6007_v6, %v5991_v7  ;;  %v5304_v0 = vpack.c.bf16 %v6053_v22, %v6052_v44  ;;  %v6055_v12 = vld [vmem:[%s10138_s8 + $0x928] sm:$0xff]  ;;  %v6025_v7 = vld [vmem:[%s10138_s8 + $0x838] sm:$0xff]  ;;  %v6078_v22 = vld [vmem:[%s10138_s8 + $0x9e0] sm:$0xff] }
0x1389   :  { %v8948_v24 = vadd.f32 %v5943_v5, %v4441_v59  ;;  %v4534_v5 = vpack.c.bf16 %v5975_v52, %v5959_v3  ;;  %v5989_v59 = vld [vmem:[%s10135_s6 + $0x368] sm:$0xff]  ;;  %v6022_v3 = vld [vmem:[%s10138_s8 + $0x820] sm:$0xff] }
0x138a   :  { %v6023_v52 = vld [vmem:[%s10138_s8 + $0x828] sm:$0xff] }
0x138b   :  { %v8958_v29 = vpack.c.bf16 %v8948_v24, %v8946_v33  ;;  %v5289_v40 = vpack.c.bf16 %v6023_v52, %v6022_v3  ;;  %v6047_v44 = vld [vmem:[%s10138_s8 + $0x8e8] sm:$0xff]  ;;  %v6062_v3 = vld [vmem:[%s10138_s8 + $0x960] sm:$0xff] }
0x138c   :  { %v6063_v52 = vld [vmem:[%s10138_s8 + $0x968] sm:$0xff] }
0x138d   :  { %6010 = vmatmul.mubr.msk.bf16.vlgmr.msra.gmra.mrb[72].mxu0 %vm76_vm1, %v8958_v29  ;;  %6011 = vmatmul.mubr.msk.bf16.vlgmr.msra.gmra.mrb[76].mxu1 %vm76_vm1, %v8958_v29 }
0x138e   :  { %4723 = vmatpush1.bf16.msra.mxu0 %v4523_v31  ;;  %4766 = vmatpush1.bf16.msra.mxu1 %v4525_v20  ;;  %v6004_v31 = vld [vmem:[%s10135_s6 + $0x3e0] sm:$0xff]  ;;  %v4548_v20 = vpack.c.bf16 %v6005_v35, %v5989_v59  ;;  %v6024_v35 = vld [vmem:[%s10138_s8 + $0x830] sm:$0xff] }
0x138f   :  { %4724 = vmatprep.subr.bf16.mxu0 %v4540_v28  ;;  %4767 = vmatprep.subr.bf16.mxu1 %v4542_v41  ;;  %v6006_v28 = vld [vmem:[%s10135_s6 + $0x3f0] sm:$0xff]  ;;  %v6034_v41 = vld [vmem:[%s10138_s8 + $0x880] sm:$0xff]  ;;  %v4547_v13 = vpack.c.bf16 %v6004_v31, %v5988_v27  ;;  %v6057_v27 = vld [vmem:[%s10138_s8 + $0x938] sm:$0xff] }
0x1390   :  { %4754 = vmatprep.mubr.bf16.mxu0 %v10179_v21  ;;  %4797 = vmatprep.mubr.bf16.mxu1 %v10179_v21  ;;  %v4549_v30 = vpack.c.bf16 %v6006_v28, %v5990_v10  ;;  %v6042_v31 = vld [vmem:[%s10138_s8 + $0x8c0] sm:$0xff]  ;;  %v6075_v10 = vld [vmem:[%s10138_s8 + $0x9c8] sm:$0xff]  ;;  %v5290_v28 = vpack.c.bf16 %v6025_v7, %v6024_v35  ;;  %v6064_v35 = vld [vmem:[%s10138_s8 + $0x970] sm:$0xff] }
0x1391   :  { %v6065_v7 = vld [vmem:[%s10138_s8 + $0x978] sm:$0xff] }
0x1392   :  { %4725 = vmatpush1.bf16.msra.mxu0 %v4539_v18  ;;  %4768 = vmatpush1.bf16.msra.mxu1 %v4541_v36  ;;  %v6019_v18 = vld [vmem:[%s10138_s8 + $0x808] sm:$0xff]  ;;  %v5295_v36 = vpack.c.bf16 %v6035_v38, %v6034_v41  ;;  %v6026_v38 = vld [vmem:[%s10138_s8 + $0x840] sm:$0xff] }
0x1393   :  { %4808 = vmatprep.subr.bf16.mxu0 %v4528_v45  ;;  %4851 = vmatprep.subr.bf16.mxu1 %v4530_v26  ;;  %v6051_v45 = vld [vmem:[%s10138_s8 + $0x908] sm:$0xff]  ;;  %v6036_v26 = vld [vmem:[%s10138_s8 + $0x890] sm:$0xff]  ;;  %v5287_v37 = vpack.c.bf16 %v6019_v18, %v6018_v42 }
0x1394   :  { %v5303_v53 = vpack.c.bf16 %v6051_v45, %v6050_v56  ;;  %v6059_v42 = vld [vmem:[%s10138_s8 + $0x948] sm:$0xff]  ;;  %v6044_v18 = vld [vmem:[%s10138_s8 + $0x8d0] sm:$0xff]  ;;  %v6077_v56 = vld [vmem:[%s10138_s8 + $0x9d8] sm:$0xff]  ;;  %v5291_v45 = vpack.c.bf16 %v6027_v46, %v6026_v38 }
0x1395   :  { %6012 = vmatmul.mubr.msk.bf16.vlgmr.msra.gmra.mrb[76].mxu0 %vm76_vm1, %v8958_v29  ;;  %6013 = vmatmul.mubr.msk.bf16.vlgmr.msra.gmra.mrb[80].mxu1 %vm76_vm1, %v8958_v29  ;;  %v9296_v38 = vld [vmem:[%s10138_s8 + $0xa00] sm:$0xff] }
0x1396   :  { %4809 = vmatpush1.bf16.msra.mxu0 %v4527_v25  ;;  %4852 = vmatpush1.bf16.msra.mxu1 %v4529_v11  ;;  %v5296_v25 = vpack.c.bf16 %v6037_v49, %v6036_v26  ;;  %v5312_v11 = vpack.c.bf16 %v6069_v43, %v6068_v54  ;;  %v6028_v49 = vld [vmem:[%s10138_s8 + $0x850] sm:$0xff] }
0x1397   :  { %4810 = vmatprep.subr.bf16.mxu0 %v4544_v32  ;;  %4853 = vmatprep.subr.bf16.mxu1 %v4546_v51  ;;  %v6038_v32 = vld [vmem:[%s10138_s8 + $0x8a0] sm:$0xff]  ;;  %v6039_v51 = vld [vmem:[%s10138_s8 + $0x8a8] sm:$0xff] }
0x1398   :  { %4840 = vmatprep.mubr.bf16.mxu0 %v10179_v21  ;;  %4883 = vmatprep.mubr.bf16.mxu1 %v10179_v21 }
0x139a   :  { %4811 = vmatpush1.bf16.msra.mxu0 %v4543_v14  ;;  %4854 = vmatpush1.bf16.msra.mxu1 %v4545_v47  ;;  %v5297_v14 = vpack.c.bf16 %v6039_v51, %v6038_v32  ;;  %v5313_v47 = vpack.c.bf16 %v6071_v55, %v6070_v50  ;;  %v6079_v51 = vld [vmem:[%s10138_s8 + $0x9e8] sm:$0xff]  ;;  %v6030_v50 = vld [vmem:[%s10138_s8 + $0x860] sm:$0xff] }
0x139b   :  { %4894 = vmatprep.subr.bf16.mxu0 %v4532_v4  ;;  %4937 = vmatprep.subr.bf16.mxu1 %v4534_v5  ;;  %v6041_v4 = vld [vmem:[%s10138_s8 + $0x8b8] sm:$0xff]  ;;  %v6072_v5 = vld [vmem:[%s10138_s8 + $0x9b0] sm:$0xff]  ;;  %v6031_v55 = vld [vmem:[%s10138_s8 + $0x868] sm:$0xff] }
0x139c   :  { %v5298_v6 = vpack.c.bf16 %v6041_v4, %v6040_v15  ;;  %v6081_v4 = vld [vmem:[%s10138_s8 + $0x9f8] sm:$0xff] }
0x139d   :  { %6014 = vmatmul.mubr.msk.bf16.vlgmr.msra.gmra.mrb[80].mxu0 %vm76_vm1, %v8958_v29  ;;  %6015 = vmatmul.mubr.msk.bf16.vlgmr.msra.gmra.mrb[84].mxu1 %vm76_vm1, %v8958_v29 }
0x139e   :  { %4895 = vmatpush1.bf16.msra.mxu0 %v4531_v8  ;;  %4938 = vmatpush1.bf16.msra.mxu1 %v4533_v48  ;;  %v5314_v8 = vpack.c.bf16 %v6073_v39, %v6072_v5  ;;  %v6056_v48 = vld [vmem:[%s10138_s8 + $0x930] sm:$0xff]  ;;  %v6033_v39 = vld [vmem:[%s10138_s8 + $0x878] sm:$0xff] }
0x139f   :  { %4896 = vmatprep.subr.bf16.mxu0 %v4548_v20  ;;  %4939 = vmatprep.subr.bf16.mxu1 %v4550_v9  ;;  %v6043_v20 = vld [vmem:[%s10138_s8 + $0x8c8] sm:$0xff]  ;;  %v6074_v9 = vld [vmem:[%s10138_s8 + $0x9c0] sm:$0xff]  ;;  %v5306_v41 = vpack.c.bf16 %v6057_v27, %v6056_v48  ;;  %v6032_v5 = vld [vmem:[%s10138_s8 + $0x870] sm:$0xff] }
0x13a0   :  { %4926 = vmatprep.mubr.bf16.mxu0 %v10179_v21  ;;  %4969 = vmatprep.mubr.bf16.mxu1 %v10179_v21  ;;  %v6020_v21 = vld [vmem:[%s10138_s8 + $0x810] sm:$0xff]  ;;  %v5299_v16 = vpack.c.bf16 %v6043_v20, %v6042_v31  ;;  %v6099_v48 = vld [vmem:[%s10138_s8 + $0xa88] sm:$0xff]  ;;  %v6130_v27 = vld [vmem:[%s10138_s8 + $0xb80] sm:$0xff] }
0x13a1   :  { %v5288_v19 = vpack.c.bf16 %v6021_v23, %v6020_v21  ;;  %v6061_v21 = vld [vmem:[%s10138_s8 + $0x958] sm:$0xff]  ;;  %v6131_v20 = vld [vmem:[%s10138_s8 + $0xb88] sm:$0xff] }
0x13a2   :  { %4897 = vmatpush1.bf16.msra.mxu0 %v4547_v13  ;;  %4940 = vmatpush1.bf16.msra.mxu1 %v4549_v30  ;;  %v5315_v13 = vpack.c.bf16 %v6075_v10, %v6074_v9  ;;  %v6058_v30 = vld [vmem:[%s10138_s8 + $0x940] sm:$0xff]  ;;  %v5343_v9 = vpack.c.bf16 %v6131_v20, %v6130_v27  ;;  %v6008_v10 = vld [vmem:[%s10139_s7 + $0x10] sm:$0xff] }
0x13a3   :  { %6534 = vmatprep.subr.bf16.mxu0 %v5295_v36  ;;  %6556 = vmatprep.subr.bf16.mxu1 %v5311_v34  ;;  %v6045_v36 = vld [vmem:[%s10138_s8 + $0x8d8] sm:$0xff]  ;;  %v6076_v34 = vld [vmem:[%s10138_s8 + $0x9d0] sm:$0xff]  ;;  %v5307_v26 = vpack.c.bf16 %v6059_v42, %v6058_v30  ;;  %v4560_v46 = vrot.slane %v6008_v10, %v7811_v60  ;;  %v9308_v30 = vld [vmem:[%s10138_s8 + $0xb00] sm:$0xff] }
0x13a4   :  { %v5300_v54 = vpack.c.bf16 %v6045_v36, %v6044_v18  ;;  %v5316_v43 = vpack.c.bf16 %v6077_v56, %v6076_v34  ;;  %v9313_v42 = vld [vmem:[%s10138_s8 + $0xb08] sm:$0xff]  ;;  %v9318_v18 = vld [vmem:[%s10138_s8 + $0xa90] sm:$0xff]  ;;  %v9323_v36 = vld [vmem:[%s10138_s8 + $0xa98] sm:$0xff] }
0x13a5   :  { %6016 = vmatmul.mubr.msk.bf16.vlgmr.msra.gmra.mrb[84].mxu0 %vm76_vm1, %v8958_v29  ;;  %6017 = vmatmul.mubr.msk.bf16.vlgmr.msra.gmra.mrb[88].mxu1 %vm76_vm1, %v8958_v29  ;;  %v6054_v29 = vld [vmem:[%s10138_s8 + $0x920] sm:$0xff]  ;;  %v9328_v34 = vld [vmem:[%s10138_s8 + $0xb90] sm:$0xff] }
0x13a6   :  { %6535 = vmatpush3.bf16.msra.mxu0 %v5287_v37  ;;  %6557 = vmatpush3.bf16.msra.mxu1 %v5303_v53  ;;  %v5305_v59 = vpack.c.bf16 %v6055_v12, %v6054_v29  ;;  %v6029_v37 = vld [vmem:[%s10138_s8 + $0x858] sm:$0xff]  ;;  %v6060_v53 = vld [vmem:[%s10138_s8 + $0x950] sm:$0xff]  ;;  %v9401_v20 = vld [vmem:[%s10138_s8 + $0xba0] sm:$0xff] }
0x13a7   :  { %6536 = vmatprep.subr.bf16.mxu0 %v5296_v25  ;;  %6558 = vmatprep.subr.bf16.mxu1 %v5312_v11  ;;  %v5292_v23 = vpack.c.bf16 %v6029_v37, %v6028_v49  ;;  %v5308_v25 = vpack.c.bf16 %v6061_v21, %v6060_v53  ;;  %v6046_v11 = vld [vmem:[%s10138_s8 + $0x8e0] sm:$0xff]  ;;  %v6049_v29 = vld [vmem:[%s10138_s8 + $0x8f8] sm:$0xff]  ;;  %v6080_v12 = vld [vmem:[%s10138_s8 + $0x9f0] sm:$0xff]  ;;  %v9334_v49 = vrot.slane %v6008_v10, %v7817_v63 }
0x13a8   :  { %v5301_v32 = vpack.c.bf16 %v6047_v44, %v6046_v11  ;;  %v9347_v37 = vld [vmem:[%s10138_s8 + $0xa10] sm:$0xff]  ;;  %v9352_v53 = vld [vmem:[%s10138_s8 + $0xa18] sm:$0xff]  ;;  %v9355_v44 = vrot.slane %v6008_v10, %v7823_v2 }
0x13aa   :  { %6537 = vmatpush3.bf16.msra.mxu0 %v5288_v19  ;;  %6559 = vmatpush3.bf16.msra.mxu1 %v5304_v0  ;;  %v5317_v19 = vpack.c.bf16 %v6079_v51, %v6078_v22  ;;  %v5293_v0 = vpack.c.bf16 %v6031_v55, %v6030_v50  ;;  %v9367_v51 = vld [vmem:[%s10138_s8 + $0xb18] sm:$0xff] }
0x13ab   :  { %6538 = vmatprep.subr.bf16.mxu0 %v5297_v14  ;;  %6560 = vmatprep.subr.bf16.mxu1 %v5313_v47  ;;  %v5309_v14 = vpack.c.bf16 %v6063_v52, %v6062_v3  ;;  %v6048_v47 = vld [vmem:[%s10138_s8 + $0x8f0] sm:$0xff]  ;;  %v9372_v50 = vld [vmem:[%s10139_s7 + $0x18] sm:$0xff]  ;;  %v5335_v52 = vpack.c.bf16 %v9313_v42, %v9308_v30 }
0x13ac   :  { %v5302_v15 = vpack.c.bf16 %v6049_v29, %v6048_v47 }
0x13ae   :  { %6539 = vmatpush3.bf16.msra.mxu0 %v5289_v40  ;;  %6561 = vmatpush3.bf16.msra.mxu1 %v5305_v59  ;;  %v5318_v40 = vpack.c.bf16 %v6081_v4, %v6080_v12  ;;  %v5294_v59 = vpack.c.bf16 %v6033_v39, %v6032_v5  ;;  %v5320_v5 = vpack.c.bf16 %v9352_v53, %v9347_v37  ;;  %v9538_v37 = vld [vmem:[%s10138_s8 + $0xac8] sm:$0xff] }
0x13af   :  { %6540 = vmatprep.subr.bf16.mxu0 %v5298_v6  ;;  %6562 = vmatprep.subr.bf16.mxu1 %v5314_v8  ;;  %v5310_v6 = vpack.c.bf16 %v6065_v7, %v6064_v35  ;;  %v6098_v8 = vld [vmem:[%s10138_s8 + $0xa80] sm:$0xff]  ;;  %v9386_v35 = vrot.slane %v9372_v50, %v7804_v57 }
0x13b0   :  { %v5327_v31 = vpack.c.bf16 %v6099_v48, %v6098_v8  ;;  %v9391_v7 = vld [vmem:[%s10138_s8 + $0xaa0] sm:$0xff] }
0x13b2   :  { %6541 = vmatpush3.bf16.msra.mxu0 %v5290_v28  ;;  %6563 = vmatpush3.bf16.msra.mxu1 %v5306_v41  ;;  %v4556_v28 = vrot.slane %v6008_v10, %v7804_v57  ;;  %v4564_v41 = vrot.slane %v6008_v10, %v7806_v58  ;;  %v9406_v57 = vld [vmem:[%s10138_s8 + $0xba8] sm:$0xff] }
0x13b3   :  { %6542 = vmatprep.subr.bf16.mxu0 %v5299_v16  ;;  %6564 = vmatprep.subr.bf16.mxu1 %v5315_v13  ;;  %v4568_v16 = vrot.slane %v6008_v10, %v7813_v61  ;;  %v9303_v13 = vld [vmem:[%s10138_s8 + $0xa08] sm:$0xff] }
0x13b4   :  { %v5319_v22 = vpack.c.bf16 %v9303_v13, %v9296_v38  ;;  %v9504_v38 = vld [vmem:[%s10138_s8 + $0xb38] sm:$0xff] }
0x13b6   :  { %6543 = vmatpush3.bf16.msra.mxu0 %v5291_v45  ;;  %6565 = vmatpush3.bf16.msra.mxu1 %v5307_v26  ;;  %v9331_v26 = vrot.slane %v6008_v10, %v7815_v62 }
0x13b7   :  { %6544 = vmatprep.subr.bf16.mxu0 %v5300_v54  ;;  %6566 = vmatprep.subr.bf16.mxu1 %v5316_v43  ;;  %v9337_v54 = vrot.slane %v6008_v10, %v7819_v1  ;;  %v9342_v43 = vld [vmem:[%s10138_s8 + $0xb98] sm:$0xff] }
0x13b8   :  { %v5344_v4 = vpack.c.bf16 %v9342_v43, %v9328_v34 }
0x13ba   :  { %6545 = vmatpush3.bf16.msra.mxu0 %v5292_v23  ;;  %6567 = vmatpush3.bf16.msra.mxu1 %v5308_v25 }
0x13bb   :  { %6546 = vmatprep.subr.bf16.mxu0 %v5301_v32  ;;  %6568 = vmatprep.subr.bf16.mxu1 %v5317_v19  ;;  %v9362_v32 = vld [vmem:[%s10138_s8 + $0xb10] sm:$0xff] }
0x13be   :  { %6547 = vmatpush3.bf16.msra.mxu0 %v5293_v0  ;;  %6569 = vmatpush3.bf16.msra.mxu1 %v5309_v14  ;;  %v5328_v14 = vpack.c.bf16 %v9323_v36, %v9318_v18 }
0x13bf   :  { %6548 = vmatprep.subr.bf16.mxu0 %v5302_v15  ;;  %6570 = vmatprep.subr.bf16.mxu1 %v5318_v40 }
0x13c2   :  { %6549 = vmatpush3.bf16.msra.mxu0 %v5294_v59  ;;  %6571 = vmatpush3.bf16.msra.mxu1 %v5310_v6  ;;  %v5336_v59 = vpack.c.bf16 %v9367_v51, %v9362_v32  ;;  %v9396_v6 = vld [vmem:[%s10138_s8 + $0xaa8] sm:$0xff] }
0x13c3   :  { %6578 = vmatprep.subr.bf16.mxu0 %v5327_v31  ;;  %6600 = vmatprep.subr.bf16.mxu1 %v5343_v9 }
0x1460   :  { %v4670_v56 = vpop.f32.mrb[72].mxu0  ;;  %v4713_v45 = vpop.f32.mrb[76].mxu1 }
0x1461   :  { %v4671_v21 = vadd.f32 %v4670_v56, %v4556_v28  ;;  %v4714_v23 = vadd.f32 %v4713_v45, %v4564_v41  ;;  %v4672_v25 = vpop.f32.mrb[73].mxu0  ;;  %v4715_v11 = vpop.f32.mrb[77].mxu1 }
0x1462   :  { %v4673_v55 = vadd.f32 %v4672_v25, %v4560_v46  ;;  %v4716_v19 = vadd.f32 %v4715_v11, %v4568_v16  ;;  %v4674_v0 = vpop.f32.mrb[74].mxu0  ;;  %v4717_v3 = vpop.f32.mrb[78].mxu1  ;;  %v9429_v25 = vld [vmem:[%s10138_s8 + $0xb20] sm:$0xff]  ;;  %v9434_v11 = vld [vmem:[%s10138_s8 + $0xb28] sm:$0xff] }
0x1463   :  { %v4675_v47 = vadd.f32 %v4674_v0, %v4556_v28  ;;  %v4718_v29 = vadd.f32 %v4717_v3, %v4564_v41  ;;  %v4676_v12 = vpop.f32.mrb[75].mxu0  ;;  %v4719_v15 = vpop.f32.mrb[79].mxu1  ;;  %v4980_v8 = vmax.f32 %v4671_v21, 0.0  ;;  %v4982_v48 = vmax.f32 %v4714_v23, 0.0 }
0x1464   :  { %v4677_v39 = vadd.f32 %v4676_v12, %v4560_v46  ;;  %v4720_v40 = vadd.f32 %v4719_v15, %v4568_v16  ;;  %v4981_v9 = vmax.f32 %v4673_v55, 0.0  ;;  %v4983_v10 = vmax.f32 %v4716_v19, 0.0  ;;  %v9411_v46 = vld [vmem:[%s10138_s8 + $0xa20] sm:$0xff]  ;;  %v9416_v16 = vld [vmem:[%s10138_s8 + $0xa28] sm:$0xff] }
0x1465   :  { %v4996_v27 = vmax.f32 %v4675_v47, 0.0  ;;  %v4998_v31 = vmax.f32 %v4718_v29, 0.0  ;;  %v9420_v21 = vrot.slane %v9372_v50, %v7806_v58  ;;  %v9424_v23 = vrot.slane %v9372_v50, %v7811_v60  ;;  %v9445_v47 = vld [vmem:[%s10138_s8 + $0xab0] sm:$0xff]  ;;  %v9450_v29 = vld [vmem:[%s10138_s8 + $0xab8] sm:$0xff] }
0x1466   :  { %v4997_v28 = vmax.f32 %v4677_v39, 0.0  ;;  %v4999_v41 = vmax.f32 %v4720_v40, 0.0  ;;  %v9438_v58 = vrot.slane %v9372_v50, %v7813_v61  ;;  %v5329_v60 = vpack.c.bf16 %v9396_v6, %v9391_v7  ;;  %v9461_v6 = vld [vmem:[%s10138_s8 + $0xbb0] sm:$0xff] }
0x1467   :  { %v5271_v56 = vpack.c.bf16 %v4996_v27, %v4980_v8  ;;  %v5273_v45 = vpack.c.bf16 %v4998_v31, %v4982_v48  ;;  %v5345_v40 = vpack.c.bf16 %v9406_v57, %v9401_v20  ;;  %v5321_v7 = vpack.c.bf16 %v9416_v16, %v9411_v46  ;;  %v9466_v8 = vld [vmem:[%s10138_s8 + $0xbb8] sm:$0xff] }
0x1468   :  { %v5272_v55 = vpack.c.bf16 %v4997_v28, %v4981_v9  ;;  %v5274_v19 = vpack.c.bf16 %v4999_v41, %v4983_v10  ;;  %v4756_v0 = vpop.f32.mrb[76].mxu0  ;;  %v4799_v3 = vpop.f32.mrb[80].mxu1  ;;  %v5337_v20 = vpack.c.bf16 %v9434_v11, %v9429_v25  ;;  %v6108_v25 = vld [vmem:[%s10138_s8 + $0xad0] sm:$0xff]  ;;  %v6109_v11 = vld [vmem:[%s10138_s8 + $0xad8] sm:$0xff] }
0x1469   :  { %v4757_v12 = vadd.f32 %v4756_v0, %v9331_v26  ;;  %v4800_v15 = vadd.f32 %v4799_v3, %v9334_v49  ;;  %v4758_v39 = vpop.f32.mrb[77].mxu0  ;;  %v4801_v61 = vpop.f32.mrb[81].mxu1  ;;  %v5330_v0 = vpack.c.bf16 %v9450_v29, %v9445_v47  ;;  %v9479_v3 = vld [vmem:[%s10138_s8 + $0xa30] sm:$0xff]  ;;  %v6141_v47 = vld [vmem:[%s10138_s8 + $0xbd8] sm:$0xff] }
0x146a   :  { %v4759_v48 = vadd.f32 %v4758_v39, %v9337_v54  ;;  %v4802_v27 = vadd.f32 %v4801_v61, %v9355_v44  ;;  %v4760_v31 = vpop.f32.mrb[78].mxu0  ;;  %v4803_v9 = vpop.f32.mrb[82].mxu1  ;;  %5453 = vmatprep.mubr.bf16.mxu0 %v5272_v55  ;;  %5494 = vmatprep.mubr.bf16.mxu1 %v5274_v19 }
0x146b   :  { %v4761_v57 = vadd.f32 %v4760_v31, %v9331_v26  ;;  %v4804_v10 = vadd.f32 %v4803_v9, %v9334_v49  ;;  %v4762_v28 = vpop.f32.mrb[79].mxu0  ;;  %v4805_v41 = vpop.f32.mrb[83].mxu1  ;;  %5454 = vmatmul.mubr.bf16.vlgmr.msra.gmra.mrb[88].mxu0 %v5271_v56  ;;  %5495 = vmatmul.mubr.bf16.vlgmr.msra.gmra.mrb[92].mxu1 %v5273_v45  ;;  %v5346_v26 = vpack.c.bf16 %v9466_v8, %v9461_v6  ;;  %v9494_v49 = vld [vmem:[%s10138_s8 + $0xa38] sm:$0xff]  ;;  %v4984_v13 = vmax.f32 %v4757_v12, 0.0  ;;  %v6139_v6 = vld [vmem:[%s10138_s8 + $0xbc8] sm:$0xff] }
0x146c   :  { %v4763_v55 = vadd.f32 %v4762_v28, %v9337_v54  ;;  %v4806_v19 = vadd.f32 %v4805_v41, %v9355_v44  ;;  %6579 = vmatpush3.bf16.msra.mxu0 %v5319_v22  ;;  %6601 = vmatpush3.bf16.msra.mxu1 %v5335_v52  ;;  %v9499_v54 = vld [vmem:[%s10138_s8 + $0xb30] sm:$0xff]  ;;  %v4986_v30 = vmax.f32 %v4800_v15, 0.0  ;;  %v4985_v22 = vmax.f32 %v4759_v48, 0.0  ;;  %v9569_v41 = vld [vmem:[%s10138_s8 + $0xa40] sm:$0xff] }
0x146d   :  { %v5000_v42 = vmax.f32 %v4761_v57, 0.0  ;;  %v5002_v44 = vmax.f32 %v4804_v10, 0.0  ;;  %6580 = vmatprep.subr.bf16.mxu0 %v5328_v14  ;;  %6602 = vmatprep.subr.bf16.mxu1 %v5344_v4  ;;  %v4987_v52 = vmax.f32 %v4802_v27, 0.0  ;;  %v5322_v12 = vpack.c.bf16 %v9494_v49, %v9479_v3  ;;  %v9533_v4 = vld [vmem:[%s10138_s8 + $0xac0] sm:$0xff]  ;;  %v6111_v3 = vld [vmem:[%s10138_s8 + $0xae8] sm:$0xff] }
0x146e   :  { %v5001_v56 = vmax.f32 %v4763_v55, 0.0  ;;  %v5003_v45 = vmax.f32 %v4806_v19, 0.0  ;;  %v5338_v15 = vpack.c.bf16 %v9504_v38, %v9499_v54  ;;  %v9528_v14 = vrot.slane %v9372_v50, %v7815_v62 }
0x146f   :  { %v9512_v39 = vpack.c.bf16 %v5000_v42, %v4984_v13  ;;  %v9514_v61 = vpack.c.bf16 %v5002_v44, %v4986_v30  ;;  %v9544_v62 = vrot.slane %v9372_v50, %v7817_v63  ;;  %v9556_v63 = vrot.slane %v9372_v50, %v7819_v1  ;;  %v6140_v30 = vld [vmem:[%s10138_s8 + $0xbd0] sm:$0xff] }
0x1470   :  { %v5276_v18 = vpack.c.bf16 %v5001_v56, %v4985_v22  ;;  %v5278_v36 = vpack.c.bf16 %v5003_v45, %v4987_v52  ;;  %6581 = vmatpush3.bf16.msra.mxu0 %v5320_v5  ;;  %6603 = vmatpush3.bf16.msra.mxu1 %v5336_v59  ;;  %v4842_v34 = vpop.f32.mrb[80].mxu0  ;;  %v4885_v43 = vpop.f32.mrb[84].mxu1  ;;  %v6138_v59 = vld [vmem:[%s10138_s8 + $0xbc0] sm:$0xff]  ;;  %v9562_v10 = vrot.slane %v9372_v50, %v7823_v2  ;;  %v6091_v50 = vld [vmem:[%s10138_s8 + $0xa48] sm:$0xff]  ;;  %v6092_v44 = vld [vmem:[%s10138_s8 + $0xa50] sm:$0xff] }
0x1471   :  { %v4843_v53 = vadd.f32 %v4842_v34, %v9386_v35  ;;  %v4886_v32 = vadd.f32 %v4885_v43, %v9420_v21  ;;  %v4844_v51 = vpop.f32.mrb[81].mxu0  ;;  %v4887_v5 = vpop.f32.mrb[85].mxu1  ;;  %6582 = vmatprep.subr.bf16.mxu0 %v5329_v60  ;;  %6604 = vmatprep.subr.bf16.mxu1 %v5345_v40  ;;  %v5331_v28 = vpack.c.bf16 %v9538_v37, %v9533_v4  ;;  %v6093_v22 = vld [vmem:[%s10138_s8 + $0xa58] sm:$0xff]  ;;  %v6124_v52 = vld [vmem:[%s10138_s8 + $0xb50] sm:$0xff]  ;;  %v6110_v4 = vld [vmem:[%s10138_s8 + $0xae0] sm:$0xff] }
0x1472   :  { %v4845_v8 = vadd.f32 %v4844_v51, %v9424_v23  ;;  %v4888_v48 = vadd.f32 %v4887_v5, %v9438_v58  ;;  %v4846_v27 = vpop.f32.mrb[82].mxu0  ;;  %v4889_v31 = vpop.f32.mrb[86].mxu1  ;;  %5535 = vmatprep.mubr.bf16.mxu0 %v5276_v18  ;;  %5576 = vmatprep.mubr.bf16.mxu1 %v5278_v36  ;;  %v5347_v2 = vpack.c.bf16 %v6139_v6, %v6138_v59  ;;  %v6125_v43 = vld [vmem:[%s10138_s8 + $0xb58] sm:$0xff]  ;;  %v6142_v37 = vld [vmem:[%s10138_s8 + $0xbe0] sm:$0xff] }
0x1473   :  { %v4847_v60 = vadd.f32 %v4846_v27, %v9386_v35  ;;  %v4890_v40 = vadd.f32 %v4889_v31, %v9420_v21  ;;  %v4848_v9 = vpop.f32.mrb[83].mxu0  ;;  %v4891_v57 = vpop.f32.mrb[87].mxu1  ;;  %v6122_v21 = vld [vmem:[%s10138_s8 + $0xb40] sm:$0xff]  ;;  %v4990_v46 = vmax.f32 %v4886_v32, 0.0  ;;  %v5332_v34 = vpack.c.bf16 %v6109_v11, %v6108_v25  ;;  %v6145_v25 = vld [vmem:[%s10138_s8 + $0xbf8] sm:$0xff] }
0x1474   :  { %v4849_v1 = vadd.f32 %v4848_v9, %v9424_v23  ;;  %v4892_v35 = vadd.f32 %v4891_v57, %v9438_v58  ;;  %6583 = vmatpush3.bf16.msra.mxu0 %v5321_v7  ;;  %6605 = vmatpush3.bf16.msra.mxu1 %v5337_v20  ;;  %v6123_v23 = vld [vmem:[%s10138_s8 + $0xb48] sm:$0xff]  ;;  %v4988_v58 = vmax.f32 %v4843_v53, 0.0  ;;  %v4989_v20 = vmax.f32 %v4845_v8, 0.0  ;;  %v6094_v9 = vld [vmem:[%s10138_s8 + $0xa60] sm:$0xff] }
0x1475   :  { %v5004_v16 = vmax.f32 %v4847_v60, 0.0  ;;  %v5006_v7 = vmax.f32 %v4890_v40, 0.0  ;;  %6584 = vmatprep.subr.bf16.mxu0 %v5330_v0  ;;  %6606 = vmatprep.subr.bf16.mxu1 %v5346_v26  ;;  %v4991_v55 = vmax.f32 %v4888_v48, 0.0  ;;  %v5323_v26 = vpack.c.bf16 %v6091_v50, %v9569_v41  ;;  %v6143_v53 = vld [vmem:[%s10138_s8 + $0xbe8] sm:$0xff] }
0x1476   :  { %v5005_v19 = vmax.f32 %v4849_v1, 0.0  ;;  %v5007_v13 = vmax.f32 %v4892_v35, 0.0  ;;  %v5339_v42 = vpack.c.bf16 %v6123_v23, %v6122_v21  ;;  %v5324_v6 = vpack.c.bf16 %v6093_v22, %v6092_v44  ;;  %v6127_v1 = vld [vmem:[%s10138_s8 + $0xb68] sm:$0xff]  ;;  %v6113_v21 = vld [vmem:[%s10138_s8 + $0xaf8] sm:$0xff]  ;;  %v6128_v22 = vld [vmem:[%s10138_s8 + $0xb70] sm:$0xff] }
0x1477   :  { %v9603_v29 = vpack.c.bf16 %v5004_v16, %v4988_v58  ;;  %v9605_v0 = vpack.c.bf16 %v5006_v7, %v4990_v46  ;;  %v5340_v60 = vpack.c.bf16 %v6125_v43, %v6124_v52  ;;  %v5333_v40 = vpack.c.bf16 %v6111_v3, %v6110_v4  ;;  %v6144_v7 = vld [vmem:[%s10138_s8 + $0xbf0] sm:$0xff]  ;;  %v6129_v52 = vld [vmem:[%s10138_s8 + $0xb78] sm:$0xff]  ;;  %v6195_v43 = vld [vmem:[%s10138_s8 + $0xd88] sm:$0xff] }
0x1478   :  { %v9617_v56 = vpack.c.bf16 %v5005_v19, %v4989_v20  ;;  %v9619_v45 = vpack.c.bf16 %v5007_v13, %v4991_v55  ;;  %6585 = vmatpush3.bf16.msra.mxu0 %v5322_v12  ;;  %6607 = vmatpush3.bf16.msra.mxu1 %v5338_v15  ;;  %v4928_v18 = vpop.f32.mrb[84].mxu0  ;;  %v4971_v36 = vpop.f32.mrb[88].mxu1  ;;  %v5348_v15 = vpack.c.bf16 %v6141_v47, %v6140_v30  ;;  %v6096_v47 = vld [vmem:[%s10138_s8 + $0xa70] sm:$0xff] }
0x1479   :  { %v4929_v49 = vadd.f32 %v4928_v18, %v9528_v14  ;;  %v4972_v54 = vadd.f32 %v4971_v36, %v9544_v62  ;;  %v4930_v38 = vpop.f32.mrb[85].mxu0  ;;  %v4973_v12 = vpop.f32.mrb[89].mxu1  ;;  %6586 = vmatprep.subr.bf16.mxu0 %v5331_v28  ;;  %6608 = vmatprep.subr.bf16.mxu1 %v5347_v2  ;;  %v5349_v41 = vpack.c.bf16 %v6143_v53, %v6142_v37  ;;  %v6162_v18 = vld [vmem:[%s10138_s8 + $0xc80] sm:$0xff]  ;;  %v6163_v36 = vld [vmem:[%s10138_s8 + $0xc88] sm:$0xff]  ;;  %v6164_v53 = vld [vmem:[%s10138_s8 + $0xc90] sm:$0xff] }
0x147a   :  { %v4931_v32 = vadd.f32 %v4930_v38, %v9556_v63  ;;  %v4974_v51 = vadd.f32 %v4973_v12, %v9562_v10  ;;  %v4932_v5 = vpop.f32.mrb[86].mxu0  ;;  %v4975_v59 = vpop.f32.mrb[90].mxu1  ;;  %v5350_v44 = vpack.c.bf16 %v6145_v25, %v6144_v7  ;;  %v5342_v3 = vpack.c.bf16 %v6129_v52, %v6128_v22  ;;  %v6146_v38 = vld [vmem:[%s10138_s8 + $0xc00] sm:$0xff]  ;;  %v6147_v12 = vld [vmem:[%s10138_s8 + $0xc08] sm:$0xff]  ;;  %v6184_v7 = vld [vmem:[%s10138_s8 + $0xd30] sm:$0xff] }
0x147b   :  { %v4933_v8 = vadd.f32 %v4932_v5, %v9528_v14  ;;  %v4976_v48 = vadd.f32 %v4975_v59, %v9544_v62  ;;  %v4934_v27 = vpop.f32.mrb[87].mxu0  ;;  %v4977_v31 = vpop.f32.mrb[91].mxu1  ;;  %v6095_v14 = vld [vmem:[%s10138_s8 + $0xa68] sm:$0xff]  ;;  %v6126_v62 = vld [vmem:[%s10138_s8 + $0xb60] sm:$0xff]  ;;  %v4992_v35 = vmax.f32 %v4929_v49, 0.0  ;;  %v4994_v2 = vmax.f32 %v4972_v54, 0.0 }
0x147c   :  { %v4935_v57 = vadd.f32 %v4934_v27, %v9556_v63  ;;  %v4978_v28 = vadd.f32 %v4977_v31, %v9562_v10  ;;  %6587 = vmatpush3.bf16.msra.mxu0 %v5323_v26  ;;  %6609 = vmatpush3.bf16.msra.mxu1 %v5339_v42  ;;  %v6112_v10 = vld [vmem:[%s10138_s8 + $0xaf0] sm:$0xff]  ;;  %v4993_v23 = vmax.f32 %v4931_v32, 0.0  ;;  %v4995_v58 = vmax.f32 %v4974_v51, 0.0  ;;  %v6097_v26 = vld [vmem:[%s10138_s8 + $0xa78] sm:$0xff]  ;;  %v6179_v37 = vld [vmem:[%s10138_s8 + $0xd08] sm:$0xff] }
0x147d   :  { %v5008_v63 = vmax.f32 %v4933_v8, 0.0  ;;  %v5010_v50 = vmax.f32 %v4976_v48, 0.0  ;;  %6588 = vmatprep.subr.bf16.mxu0 %v5332_v34  ;;  %6610 = vmatprep.subr.bf16.mxu1 %v5348_v15  ;;  %v5325_v55 = vpack.c.bf16 %v6095_v14, %v6094_v9  ;;  %v5341_v30 = vpack.c.bf16 %v6127_v1, %v6126_v62  ;;  %v6194_v34 = vld [vmem:[%s10138_s8 + $0xd80] sm:$0xff]  ;;  %v6165_v32 = vld [vmem:[%s10138_s8 + $0xc98] sm:$0xff]  ;;  %v6196_v51 = vld [vmem:[%s10138_s8 + $0xd90] sm:$0xff] }
0x147e   :  { %v5009_v46 = vmax.f32 %v4935_v57, 0.0  ;;  %v5011_v16 = vmax.f32 %v4978_v28, 0.0  ;;  %v5334_v42 = vpack.c.bf16 %v6113_v21, %v6112_v10  ;;  %v5326_v4 = vpack.c.bf16 %v6097_v26, %v6096_v47  ;;  %v6178_v15 = vld [vmem:[%s10138_s8 + $0xd00] sm:$0xff]  ;;  %v6197_v5 = vld [vmem:[%s10138_s8 + $0xd98] sm:$0xff]  ;;  %v6148_v8 = vld [vmem:[%s10138_s8 + $0xc10] sm:$0xff] }
0x147f   :  { %v9674_v11 = vpack.c.bf16 %v5008_v63, %v4992_v35  ;;  %v9676_v20 = vpack.c.bf16 %v5010_v50, %v4994_v2  ;;  %v5359_v49 = vpack.c.bf16 %v6163_v36, %v6162_v18  ;;  %v5375_v54 = vpack.c.bf16 %v6195_v43, %v6194_v34  ;;  %v6149_v48 = vld [vmem:[%s10138_s8 + $0xc18] sm:$0xff]  ;;  %v6180_v27 = vld [vmem:[%s10138_s8 + $0xd10] sm:$0xff]  ;;  %v6166_v9 = vld [vmem:[%s10138_s8 + $0xca0] sm:$0xff] }
0x1480   :  { %v9678_v19 = vpack.c.bf16 %v5009_v46, %v4993_v23  ;;  %v9680_v13 = vpack.c.bf16 %v5011_v16, %v4995_v58  ;;  %6589 = vmatpush3.bf16.msra.mxu0 %v5324_v6  ;;  %6611 = vmatpush3.bf16.msra.mxu1 %v5340_v60  ;;  %v5351_v59 = vpack.c.bf16 %v6147_v12, %v6146_v38  ;;  %v6167_v57 = vld [vmem:[%s10138_s8 + $0xca8] sm:$0xff]  ;;  %v6198_v28 = vld [vmem:[%s10138_s8 + $0xda0] sm:$0xff]  ;;  %v6168_v2 = vld [vmem:[%s10138_s8 + $0xcb0] sm:$0xff] }
0x1481   :  { %6590 = vmatprep.subr.bf16.mxu0 %v5333_v40  ;;  %6612 = vmatprep.subr.bf16.mxu1 %v5349_v41  ;;  %v5367_v6 = vpack.c.bf16 %v6179_v37, %v6178_v15  ;;  %v5360_v31 = vpack.c.bf16 %v6165_v32, %v6164_v53  ;;  %v5376_v60 = vpack.c.bf16 %v6197_v5, %v6196_v51  ;;  %v6181_v40 = vld [vmem:[%s10138_s8 + $0xd18] sm:$0xff]  ;;  %v6199_v41 = vld [vmem:[%s10138_s8 + $0xda8] sm:$0xff]  ;;  %v6182_v35 = vld [vmem:[%s10138_s8 + $0xd20] sm:$0xff] }
0x1482   :  { %v5352_v14 = vpack.c.bf16 %v6149_v48, %v6148_v8  ;;  %v5368_v62 = vpack.c.bf16 %v6181_v40, %v6180_v27  ;;  %v5361_v1 = vpack.c.bf16 %v6167_v57, %v6166_v9  ;;  %v6169_v63 = vld [vmem:[%s10138_s8 + $0xcb8] sm:$0xff]  ;;  %v6200_v50 = vld [vmem:[%s10138_s8 + $0xdb0] sm:$0xff]  ;;  %v6171_v47 = vld [vmem:[%s10138_s8 + $0xcc8] sm:$0xff] }
0x1483   :  { %v6201_v10 = vld [vmem:[%s10138_s8 + $0xdb8] sm:$0xff]  ;;  %v5362_v58 = vpack.c.bf16 %v6169_v63, %v6168_v2  ;;  %v6152_v46 = vld [vmem:[%s10138_s8 + $0xc30] sm:$0xff]  ;;  %v6202_v26 = vld [vmem:[%s10138_s8 + $0xdc0] sm:$0xff] }
0x1484   :  { %6591 = vmatpush3.bf16.msra.mxu0 %v5325_v55  ;;  %6613 = vmatpush3.bf16.msra.mxu1 %v5341_v30  ;;  %v6153_v16 = vld [vmem:[%s10138_s8 + $0xc38] sm:$0xff]  ;;  %v5378_v25 = vpack.c.bf16 %v6201_v10, %v6200_v50  ;;  %v6170_v30 = vld [vmem:[%s10138_s8 + $0xcc0] sm:$0xff]  ;;  %v6155_v36 = vld [vmem:[%s10138_s8 + $0xc48] sm:$0xff] }
0x1485   :  { %6592 = vmatprep.subr.bf16.mxu0 %v5334_v42  ;;  %6614 = vmatprep.subr.bf16.mxu1 %v5350_v44  ;;  %v6185_v55 = vld [vmem:[%s10138_s8 + $0xd38] sm:$0xff]  ;;  %v6203_v42 = vld [vmem:[%s10138_s8 + $0xdc8] sm:$0xff]  ;;  %v5354_v44 = vpack.c.bf16 %v6153_v16, %v6152_v46  ;;  %v5363_v52 = vpack.c.bf16 %v6171_v47, %v6170_v30  ;;  %v6154_v18 = vld [vmem:[%s10138_s8 + $0xc40] sm:$0xff] }
0x1486   :  { %v5370_v22 = vpack.c.bf16 %v6185_v55, %v6184_v7  ;;  %v6186_v34 = vld [vmem:[%s10138_s8 + $0xd40] sm:$0xff]  ;;  %v5379_v43 = vpack.c.bf16 %v6203_v42, %v6202_v26  ;;  %v6205_v38 = vld [vmem:[%s10138_s8 + $0xdd8] sm:$0xff]  ;;  %v5355_v12 = vpack.c.bf16 %v6155_v36, %v6154_v18  ;;  %v6156_v53 = vld [vmem:[%s10138_s8 + $0xc50] sm:$0xff] }
0x1487   :  { %v6157_v32 = vld [vmem:[%s10138_s8 + $0xc58] sm:$0xff]  ;;  %v6188_v51 = vld [vmem:[%s10138_s8 + $0xd50] sm:$0xff]  ;;  %v6175_v8 = vld [vmem:[%s10138_s8 + $0xce8] sm:$0xff] }
0x1488   :  { %6593 = vmatpush3.bf16.msra.mxu0 %v5326_v4  ;;  %6615 = vmatpush3.bf16.msra.mxu1 %v5342_v3  ;;  %v6187_v4 = vld [vmem:[%s10138_s8 + $0xd48] sm:$0xff]  ;;  %v6172_v3 = vld [vmem:[%s10138_s8 + $0xcd0] sm:$0xff]  ;;  %v6206_v48 = vld [vmem:[%s10138_s8 + $0xde0] sm:$0xff] }
0x1489   :  { %6622 = vmatprep.subr.bf16.mxu0 %v5359_v49  ;;  %6644 = vmatprep.subr.bf16.mxu1 %v5375_v54  ;;  %v6173_v49 = vld [vmem:[%s10138_s8 + $0xcd8] sm:$0xff]  ;;  %v6204_v54 = vld [vmem:[%s10138_s8 + $0xdd0] sm:$0xff]  ;;  %v5371_v15 = vpack.c.bf16 %v6187_v4, %v6186_v34  ;;  %v6207_v27 = vld [vmem:[%s10138_s8 + $0xde8] sm:$0xff] }
0x148a   :  { %v5364_v37 = vpack.c.bf16 %v6173_v49, %v6172_v3  ;;  %v5380_v5 = vpack.c.bf16 %v6205_v38, %v6204_v54  ;;  %v6158_v9 = vld [vmem:[%s10138_s8 + $0xc60] sm:$0xff]  ;;  %v6159_v57 = vld [vmem:[%s10138_s8 + $0xc68] sm:$0xff]  ;;  %v6160_v2 = vld [vmem:[%s10138_s8 + $0xc70] sm:$0xff] }
0x148b   :  { %5536 = vmatmul.mubr.bf16.vlgmr.msra.gmra.mrb[92].mxu0 %v9512_v39  ;;  %5577 = vmatmul.mubr.bf16.vlgmr.msra.gmra.mrb[96].mxu1 %v9514_v61  ;;  %v6150_v39 = vld [vmem:[%s10138_s8 + $0xc20] sm:$0xff]  ;;  %v6151_v61 = vld [vmem:[%s10138_s8 + $0xc28] sm:$0xff]  ;;  %v6161_v63 = vld [vmem:[%s10138_s8 + $0xc78] sm:$0xff] }
0x148c   :  { %6623 = vmatpush3.bf16.msra.mxu0 %v5351_v59  ;;  %5617 = vmatprep.mubr.bf16.mxu0 %v9617_v56  ;;  %v5377_v56 = vpack.c.bf16 %v6199_v41, %v6198_v28  ;;  %v5353_v21 = vpack.c.bf16 %v6151_v61, %v6150_v39  ;;  %v6189_v59 = vld [vmem:[%s10138_s8 + $0xd58] sm:$0xff]  ;;  %v6190_v28 = vld [vmem:[%s10138_s8 + $0xd60] sm:$0xff]  ;;  %v5381_v41 = vpack.c.bf16 %v6207_v27, %v6206_v48  ;;  %v6208_v39 = vld [vmem:[%s10138_s8 + $0xdf0] sm:$0xff] }
0x148d   :  { %6645 = vmatpush3.bf16.msra.mxu1 %v5367_v6  ;;  %5658 = vmatprep.mubr.bf16.mxu1 %v9619_v45  ;;  %v6183_v45 = vld [vmem:[%s10138_s8 + $0xd28] sm:$0xff]  ;;  %v6174_v6 = vld [vmem:[%s10138_s8 + $0xce0] sm:$0xff]  ;;  %v6209_v61 = vld [vmem:[%s10138_s8 + $0xdf8] sm:$0xff]  ;;  %v5358_v7 = vpack.c.bf16 %v6161_v63, %v6160_v2 }
0x148e   :  { %6624 = vmatprep.subr.bf16.mxu0 %v5360_v31  ;;  %6646 = vmatprep.subr.bf16.mxu1 %v5376_v60  ;;  %v5369_v23 = vpack.c.bf16 %v6183_v45, %v6182_v35  ;;  %v5356_v31 = vpack.c.bf16 %v6157_v32, %v6156_v53  ;;  %v5372_v60 = vpack.c.bf16 %v6189_v59, %v6188_v51  ;;  %v6192_v50 = vld [vmem:[%s10138_s8 + $0xd70] sm:$0xff]  ;;  %v6258_v46 = vld [vmem:[%s10138_s8 + $0xf80] sm:$0xff]  ;;  %v6259_v16 = vld [vmem:[%s10138_s8 + $0xf88] sm:$0xff] }
0x148f   :  { %v5365_v40 = vpack.c.bf16 %v6175_v8, %v6174_v6  ;;  %v5357_v35 = vpack.c.bf16 %v6159_v57, %v6158_v9  ;;  %v5382_v10 = vpack.c.bf16 %v6209_v61, %v6208_v39  ;;  %v6210_v30 = vld [vmem:[%s10138_s8 + $0xe00] sm:$0xff]  ;;  %v6211_v47 = vld [vmem:[%s10138_s8 + $0xe08] sm:$0xff]  ;;  %v5407_v26 = vpack.c.bf16 %v6259_v16, %v6258_v46  ;;  %v6260_v36 = vld [vmem:[%s10138_s8 + $0xf90] sm:$0xff] }
0x1490   :  { %6625 = vmatpush3.bf16.msra.mxu0 %v5352_v14  ;;  %v6191_v14 = vld [vmem:[%s10138_s8 + $0xd68] sm:$0xff]  ;;  %v6242_v42 = vld [vmem:[%s10138_s8 + $0xf00] sm:$0xff]  ;;  %v5383_v18 = vpack.c.bf16 %v6211_v47, %v6210_v30  ;;  %v6261_v34 = vld [vmem:[%s10138_s8 + $0xf98] sm:$0xff] }
0x1491   :  { %6647 = vmatpush3.bf16.msra.mxu1 %v5368_v62  ;;  %6626 = vmatprep.subr.bf16.mxu0 %v5361_v1  ;;  %v6176_v62 = vld [vmem:[%s10138_s8 + $0xcf0] sm:$0xff]  ;;  %v6177_v1 = vld [vmem:[%s10138_s8 + $0xcf8] sm:$0xff]  ;;  %v6262_v53 = vld [vmem:[%s10138_s8 + $0xfa0] sm:$0xff] }
0x1492   :  { %6648 = vmatprep.subr.bf16.mxu1 %v5377_v56  ;;  %v5373_v56 = vpack.c.bf16 %v6191_v14, %v6190_v28  ;;  %v5366_v45 = vpack.c.bf16 %v6177_v1, %v6176_v62  ;;  %v6212_v4 = vld [vmem:[%s10138_s8 + $0xe10] sm:$0xff]  ;;  %v6213_v3 = vld [vmem:[%s10138_s8 + $0xe18] sm:$0xff]  ;;  %v6263_v32 = vld [vmem:[%s10138_s8 + $0xfa8] sm:$0xff] }
0x1493   :  { %v6244_v49 = vld [vmem:[%s10138_s8 + $0xf10] sm:$0xff]  ;;  %v6245_v38 = vld [vmem:[%s10138_s8 + $0xf18] sm:$0xff]  ;;  %v5384_v51 = vpack.c.bf16 %v6213_v3, %v6212_v4  ;;  %v6215_v6 = vld [vmem:[%s10138_s8 + $0xe28] sm:$0xff] }
0x1494   :  { %6627 = vmatpush3.bf16.msra.mxu0 %v5353_v21  ;;  %v6193_v21 = vld [vmem:[%s10138_s8 + $0xd78] sm:$0xff]  ;;  %v6246_v8 = vld [vmem:[%s10138_s8 + $0xf20] sm:$0xff]  ;;  %v6232_v48 = vld [vmem:[%s10138_s8 + $0xeb0] sm:$0xff] }
0x1495   :  { %6649 = vmatpush3.bf16.msra.mxu1 %v5369_v23  ;;  %6628 = vmatprep.subr.bf16.mxu0 %v5362_v58  ;;  %v6226_v23 = vld [vmem:[%s10138_s8 + $0xe80] sm:$0xff]  ;;  %v6227_v58 = vld [vmem:[%s10138_s8 + $0xe88] sm:$0xff]  ;;  %v6233_v27 = vld [vmem:[%s10138_s8 + $0xeb8] sm:$0xff] }
0x1496   :  { %6650 = vmatprep.subr.bf16.mxu1 %v5378_v25  ;;  %v5374_v25 = vpack.c.bf16 %v6193_v21, %v6192_v50  ;;  %v5391_v55 = vpack.c.bf16 %v6227_v58, %v6226_v23  ;;  %v5394_v9 = vpack.c.bf16 %v6233_v27, %v6232_v48  ;;  %v6216_v57 = vld [vmem:[%s10138_s8 + $0xe30] sm:$0xff]  ;;  %v6217_v28 = vld [vmem:[%s10138_s8 + $0xe38] sm:$0xff]  ;;  %v6234_v1 = vld [vmem:[%s10138_s8 + $0xec0] sm:$0xff] }
0x1497   :  { %v6249_v62 = vld [vmem:[%s10138_s8 + $0xf38] sm:$0xff]  ;;  %v6235_v39 = vld [vmem:[%s10138_s8 + $0xec8] sm:$0xff]  ;;  %v6266_v61 = vld [vmem:[%s10138_s8 + $0xfc0] sm:$0xff] }
0x1498   :  { %6629 = vmatpush3.bf16.msra.mxu0 %v5354_v44  ;;  %v6243_v44 = vld [vmem:[%s10138_s8 + $0xf08] sm:$0xff]  ;;  %v5395_v2 = vpack.c.bf16 %v6235_v39, %v6234_v1  ;;  %v6218_v63 = vld [vmem:[%s10138_s8 + $0xe40] sm:$0xff]  ;;  %v6236_v58 = vld [vmem:[%s10138_s8 + $0xed0] sm:$0xff] }
0x1499   :  { %6651 = vmatpush3.bf16.msra.mxu1 %v5370_v22  ;;  %6630 = vmatprep.subr.bf16.mxu0 %v5363_v52  ;;  %v6228_v22 = vld [vmem:[%s10138_s8 + $0xe90] sm:$0xff]  ;;  %v6229_v52 = vld [vmem:[%s10138_s8 + $0xe98] sm:$0xff]  ;;  %v6219_v50 = vld [vmem:[%s10138_s8 + $0xe48] sm:$0xff] }
0x149a   :  { %6652 = vmatprep.subr.bf16.mxu1 %v5379_v43  ;;  %v5399_v43 = vpack.c.bf16 %v6243_v44, %v6242_v42  ;;  %v5392_v54 = vpack.c.bf16 %v6229_v52, %v6228_v22  ;;  %v6251_v23 = vld [vmem:[%s10138_s8 + $0xf48] sm:$0xff]  ;;  %v6237_v46 = vld [vmem:[%s10138_s8 + $0xed8] sm:$0xff]  ;;  %v6268_v16 = vld [vmem:[%s10138_s8 + $0xfd0] sm:$0xff] }
0x149b   :  { %v5396_v30 = vpack.c.bf16 %v6237_v46, %v6236_v58  ;;  %v6220_v47 = vld [vmem:[%s10138_s8 + $0xe50] sm:$0xff]  ;;  %v6253_v22 = vld [vmem:[%s10138_s8 + $0xf58] sm:$0xff]  ;;  %v6238_v52 = vld [vmem:[%s10138_s8 + $0xee0] sm:$0xff] }
0x149c   :  { %6631 = vmatpush3.bf16.msra.mxu0 %v5355_v12  ;;  %v6230_v12 = vld [vmem:[%s10138_s8 + $0xea0] sm:$0xff]  ;;  %v6252_v42 = vld [vmem:[%s10138_s8 + $0xf50] sm:$0xff]  ;;  %v6257_v48 = vld [vmem:[%s10138_s8 + $0xf78] sm:$0xff] }
0x149d   :  { %6653 = vmatpush3.bf16.msra.mxu1 %v5371_v15  ;;  %6632 = vmatprep.subr.bf16.mxu0 %v5364_v37  ;;  %v6231_v15 = vld [vmem:[%s10138_s8 + $0xea8] sm:$0xff]  ;;  %v5408_v37 = vpack.c.bf16 %v6261_v34, %v6260_v36  ;;  %v6270_v36 = vld [vmem:[%s10138_s8 + $0xfe0] sm:$0xff]  ;;  %v5404_v4 = vpack.c.bf16 %v6253_v22, %v6252_v42 }
0x149e   :  { %6654 = vmatprep.subr.bf16.mxu1 %v5380_v5  ;;  %v5400_v5 = vpack.c.bf16 %v6245_v38, %v6244_v49  ;;  %v5393_v59 = vpack.c.bf16 %v6231_v15, %v6230_v12  ;;  %v6271_v34 = vld [vmem:[%s10138_s8 + $0xfe8] sm:$0xff]  ;;  %v6222_v49 = vld [vmem:[%s10138_s8 + $0xe60] sm:$0xff] }
0x149f   :  { %v6254_v38 = vld [vmem:[%s10138_s8 + $0xf60] sm:$0xff]  ;;  %v5413_v12 = vpack.c.bf16 %v6271_v34, %v6270_v36  ;;  %v6255_v15 = vld [vmem:[%s10138_s8 + $0xf68] sm:$0xff] }
0x14a0   :  { %6633 = vmatpush3.bf16.msra.mxu0 %v5356_v31  ;;  %v6264_v31 = vld [vmem:[%s10138_s8 + $0xfb0] sm:$0xff] }
0x14a1   :  { %6655 = vmatpush3.bf16.msra.mxu1 %v5372_v60  ;;  %6634 = vmatprep.subr.bf16.mxu0 %v5365_v40 }
0x14a2   :  { %6656 = vmatprep.subr.bf16.mxu1 %v5381_v41  ;;  %v6248_v41 = vld [vmem:[%s10138_s8 + $0xf30] sm:$0xff] }
0x14a4   :  { %6635 = vmatpush3.bf16.msra.mxu0 %v5357_v35  ;;  %v6267_v35 = vld [vmem:[%s10138_s8 + $0xfc8] sm:$0xff] }
0x14a5   :  { %6657 = vmatpush3.bf16.msra.mxu1 %v5373_v56  ;;  %6636 = vmatprep.subr.bf16.mxu0 %v5366_v45  ;;  %v5386_v56 = vpack.c.bf16 %v6217_v28, %v6216_v57  ;;  %v5402_v45 = vpack.c.bf16 %v6249_v62, %v6248_v41  ;;  %v5411_v21 = vpack.c.bf16 %v6267_v35, %v6266_v61 }
0x14a6   :  { %6658 = vmatprep.subr.bf16.mxu1 %v5382_v10  ;;  %v6250_v10 = vld [vmem:[%s10138_s8 + $0xf40] sm:$0xff] }
0x14a8   :  { %6637 = vmatpush3.bf16.msra.mxu0 %v5358_v7  ;;  %v6269_v7 = vld [vmem:[%s10138_s8 + $0xfd8] sm:$0xff] }
0x14a9   :  { %6659 = vmatpush3.bf16.msra.mxu1 %v5374_v25  ;;  %6666 = vmatprep.subr.bf16.mxu0 %v5391_v55  ;;  %v5387_v25 = vpack.c.bf16 %v6219_v50, %v6218_v63  ;;  %v5403_v55 = vpack.c.bf16 %v6251_v23, %v6250_v10  ;;  %v5412_v44 = vpack.c.bf16 %v6269_v7, %v6268_v16 }
0x14aa   :  { %6688 = vmatprep.subr.bf16.mxu1 %v5407_v26  ;;  %v6221_v26 = vld [vmem:[%s10138_s8 + $0xe58] sm:$0xff] }
0x14ab   :  { %5618 = vmatmul.mubr.bf16.vlgmr.msra.gmra.mrb[96].mxu0 %v9603_v29  ;;  %v6214_v29 = vld [vmem:[%s10138_s8 + $0xe20] sm:$0xff] }
0x14ac   :  { %5659 = vmatmul.mubr.bf16.vlgmr.msra.gmra.mrb[100].mxu1 %v9605_v0  ;;  %6667 = vmatpush3.bf16.msra.mxu0 %v5383_v18  ;;  %v5409_v0 = vpack.c.bf16 %v6263_v32, %v6262_v53  ;;  %v5385_v60 = vpack.c.bf16 %v6215_v6, %v6214_v29  ;;  %v6239_v18 = vld [vmem:[%s10138_s8 + $0xee8] sm:$0xff]  ;;  %v6241_v53 = vld [vmem:[%s10138_s8 + $0xef8] sm:$0xff]  ;;  %v6272_v32 = vld [vmem:[%s10138_s8 + $0xff0] sm:$0xff] }
0x14ad   :  { %5699 = vmatprep.mubr.bf16.mxu0 %v9678_v19  ;;  %6689 = vmatpush3.bf16.msra.mxu1 %v5399_v43  ;;  %v6247_v19 = vld [vmem:[%s10138_s8 + $0xf28] sm:$0xff]  ;;  %v5388_v43 = vpack.c.bf16 %v6221_v26, %v6220_v47  ;;  %v5397_v3 = vpack.c.bf16 %v6239_v18, %v6238_v52  ;;  %v6224_v6 = vld [vmem:[%s10138_s8 + $0xe70] sm:$0xff] }
0x14ae   :  { %5740 = vmatprep.mubr.bf16.mxu1 %v9680_v13  ;;  %6668 = vmatprep.subr.bf16.mxu0 %v5392_v54  ;;  %v6265_v13 = vld [vmem:[%s10138_s8 + $0xfb8] sm:$0xff]  ;;  %v5401_v40 = vpack.c.bf16 %v6247_v19, %v6246_v8  ;;  %v6223_v54 = vld [vmem:[%s10138_s8 + $0xe68] sm:$0xff]  ;;  %v6256_v19 = vld [vmem:[%s10138_s8 + $0xf70] sm:$0xff] }
0x14af   :  { %6690 = vmatprep.subr.bf16.mxu1 %v5408_v37  ;;  %v5410_v14 = vpack.c.bf16 %v6265_v13, %v6264_v31  ;;  %v6240_v37 = vld [vmem:[%s10138_s8 + $0xef0] sm:$0xff]  ;;  %v6225_v8 = vld [vmem:[%s10138_s8 + $0xe78] sm:$0xff]  ;;  %v5406_v31 = vpack.c.bf16 %v6257_v48, %v6256_v19 }
0x14b0   :  { %6669 = vmatpush3.bf16.msra.mxu0 %v5384_v51  ;;  %v6273_v51 = vld [vmem:[%s10138_s8 + $0xff8] sm:$0xff]  ;;  %v5398_v29 = vpack.c.bf16 %v6241_v53, %v6240_v37  ;;  %v5390_v27 = vpack.c.bf16 %v6225_v8, %v6224_v6 }
0x14b1   :  { %6691 = vmatpush3.bf16.msra.mxu1 %v5400_v5  ;;  %6670 = vmatprep.subr.bf16.mxu0 %v5393_v59  ;;  %v5389_v5 = vpack.c.bf16 %v6223_v54, %v6222_v49  ;;  %v5405_v59 = vpack.c.bf16 %v6255_v15, %v6254_v38 }
0x14b2   :  { %6692 = vmatprep.subr.bf16.mxu1 %v5409_v0  ;;  %v5414_v0 = vpack.c.bf16 %v6273_v51, %v6272_v32 }
0x14b4   :  { %6671 = vmatpush3.bf16.msra.mxu0 %v5385_v60 }
0x14b5   :  { %6693 = vmatpush3.bf16.msra.mxu1 %v5401_v40  ;;  %6672 = vmatprep.subr.bf16.mxu0 %v5394_v9  ;;  %v6275_v40 = vld [vmem:[%s10140_s9 + $0x1] ss:$0 sm:$0xff] }
0x14b6   :  { %6694 = vmatprep.subr.bf16.mxu1 %v5410_v14 }
0x14b8   :  { %6673 = vmatpush3.bf16.msra.mxu0 %v5386_v56 }
0x14b9   :  { %6695 = vmatpush3.bf16.msra.mxu1 %v5402_v45  ;;  %6674 = vmatprep.subr.bf16.mxu0 %v5395_v2 }
0x14ba   :  { %6696 = vmatprep.subr.bf16.mxu1 %v5411_v21 }
0x14bc   :  { %6675 = vmatpush3.bf16.msra.mxu0 %v5387_v25 }
0x14bd   :  { %6697 = vmatpush3.bf16.msra.mxu1 %v5403_v55  ;;  %6676 = vmatprep.subr.bf16.mxu0 %v5396_v30 }
0x14be   :  { %6698 = vmatprep.subr.bf16.mxu1 %v5412_v44 }
0x14c0   :  { %6677 = vmatpush3.bf16.msra.mxu0 %v5388_v43 }
0x14c1   :  { %6699 = vmatpush3.bf16.msra.mxu1 %v5404_v4  ;;  %6678 = vmatprep.subr.bf16.mxu0 %v5397_v3 }
0x14c2   :  { %6700 = vmatprep.subr.bf16.mxu1 %v5413_v12 }
0x14c4   :  { %6679 = vmatpush3.bf16.msra.mxu0 %v5389_v5 }
0x14c5   :  { %6701 = vmatpush3.bf16.msra.mxu1 %v5405_v59  ;;  %6680 = vmatprep.subr.bf16.mxu0 %v5398_v29 }
0x14c6   :  { %6702 = vmatprep.subr.bf16.mxu1 %v5414_v0 }
0x14c8   :  { %6681 = vmatpush3.bf16.msra.mxu0 %v5390_v27 }
0x14c9   :  { %6703 = vmatpush3.bf16.msra.mxu1 %v5406_v31  ;;  %6905 = vmatprep.subr.bf16.mxu0 %v10171_v17 }
0x14cb   :  { %5700 = vmatmul.mubr.bf16.vlgmr.msra.gmra.mrb[100].mxu0 %v9674_v11 }
0x14cc   :  { %5741 = vmatmul.mubr.bf16.vlgmr.msra.gmra.mrb[104].mxu1 %v9676_v20  ;;  %6909 = vmatprep.mubr.msk.bf16.mxu0 %vm7041_vm0, %v10171_v17 }
0x153e   :  { %v6550_v13 = vpop.f32.mrb[88].mxu0  ;;  %v6572_v60 = vpop.f32.mrb[92].mxu1 }
0x153f   :  { %v6551_v9 = vpop.f32.mrb[89].mxu0  ;;  %v6573_v57 = vpop.f32.mrb[93].mxu1 }
0x1540   :  { %v6552_v28 = vadd.f32 %v6551_v9, %v6550_v13  ;;  %v6574_v41 = vadd.f32 %v6573_v57, %v6572_v60  ;;  %v6553_v14 = vpop.f32.mrb[90].mxu0  ;;  %v6575_v62 = vpop.f32.mrb[94].mxu1 }
0x1541   :  { %v6554_v1 = vpop.f32.mrb[91].mxu0  ;;  %v6576_v39 = vpop.f32.mrb[95].mxu1 }
0x1542   :  { %v5456_v11 = vadd.f32 %v6552_v28, %v6275_v40  ;;  %v6555_v61 = vadd.f32 %v6554_v1, %v6553_v14  ;;  %v6577_v20 = vadd.f32 %v6576_v39, %v6575_v62 }
0x1544   :  { %v5497_v35 = vadd.f32 %v6574_v41, %v5456_v11  ;;  %v5459_v56 = vadd.f32 %v6555_v61, %v6275_v40 }
0x1546   :  { %v5500_v45 = vadd.f32 %v6577_v20, %v5459_v56 }
0x155e   :  { %v6594_v2 = vpop.f32.mrb[92].mxu0  ;;  %v6616_v63 = vpop.f32.mrb[96].mxu1 }
0x155f   :  { %v6595_v50 = vpop.f32.mrb[93].mxu0  ;;  %v6617_v10 = vpop.f32.mrb[97].mxu1 }
0x1560   :  { %v6596_v21 = vadd.f32 %v6595_v50, %v6594_v2  ;;  %v6618_v23 = vadd.f32 %v6617_v10, %v6616_v63  ;;  %v6597_v58 = vpop.f32.mrb[94].mxu0  ;;  %v6619_v46 = vpop.f32.mrb[98].mxu1  ;;  %v5798_v2 = vld [vmem:[%s10143_s14 + $0x8] sm:$0xff]  ;;  %v5799_v50 = vld [vmem:[%s10143_s14 + $0x10] sm:$0xff]  ;;  %v5800_v10 = vld [vmem:[%s10143_s14 + $0x18] sm:$0xff] }
0x1561   :  { %v6598_v16 = vpop.f32.mrb[95].mxu0  ;;  %v6620_v7 = vpop.f32.mrb[99].mxu1 }
0x1562   :  { %v5538_v25 = vadd.f32 %v6596_v21, %v5497_v35  ;;  %v6599_v55 = vadd.f32 %v6598_v16, %v6597_v58  ;;  %v6621_v30 = vadd.f32 %v6620_v7, %v6619_v46  ;;  %v5804_v21 = vpack.c.bf16 %v5800_v10, %v5799_v50 }
0x1564   :  { %v5579_v47 = vadd.f32 %v6618_v23, %v5538_v25  ;;  %v5541_v26 = vadd.f32 %v6599_v55, %v5500_v45 }
0x1566   :  { %v5582_v42 = vadd.f32 %v6621_v30, %v5541_v26  ;;  %v6278_v30 = vld [vmem:[%s10141_s12 + $0x1] ss:$0 sm:$0xff] }
0x157e   :  { %v6638_v44 = vpop.f32.mrb[96].mxu0 }
0x157f   :  { %v6660_v22 = vpop.f32.mrb[100].mxu1  ;;  %v6639_v52 = vpop.f32.mrb[97].mxu0 }
0x1580   :  { %v6640_v18 = vadd.f32 %v6639_v52, %v6638_v44  ;;  %v6661_v36 = vpop.f32.mrb[101].mxu1  ;;  %v6641_v34 = vpop.f32.mrb[98].mxu0 }
0x1581   :  { %v6662_v43 = vadd.f32 %v6661_v36, %v6660_v22  ;;  %v6663_v4 = vpop.f32.mrb[102].mxu1  ;;  %v6642_v3 = vpop.f32.mrb[99].mxu0 }
0x1582   :  { %v5620_v49 = vadd.f32 %v6640_v18, %v5579_v47  ;;  %v6643_v54 = vadd.f32 %v6642_v3, %v6641_v34  ;;  %v6664_v38 = vpop.f32.mrb[103].mxu1  ;;  %v6280_v34 = vld [vmem:[%s10144_s15] ss:$0 sm:$0xff] }
0x1583   :  { %v6665_v12 = vadd.f32 %v6664_v38, %v6663_v4 }
0x1584   :  { %v5661_v15 = vadd.f32 %v6662_v43, %v5620_v49  ;;  %v5623_v37 = vadd.f32 %v6643_v54, %v5582_v42 }
0x1586   :  { %v5664_v53 = vadd.f32 %v6665_v12, %v5623_v37 }
0x159e   :  { %v6682_v32 = vpop.f32.mrb[100].mxu0 }
0x159f   :  { %v6704_v51 = vpop.f32.mrb[104].mxu1  ;;  %v6683_v5 = vpop.f32.mrb[101].mxu0 }
0x15a0   :  { %v6684_v59 = vadd.f32 %v6683_v5, %v6682_v32  ;;  %v6705_v29 = vpop.f32.mrb[105].mxu1  ;;  %v6685_v6 = vpop.f32.mrb[102].mxu0 }
0x15a1   :  { %v6706_v8 = vadd.f32 %v6705_v29, %v6704_v51  ;;  %v6707_v0 = vpop.f32.mrb[106].mxu1  ;;  %v6686_v19 = vpop.f32.mrb[103].mxu0 }
0x15a2   :  { %v5702_v48 = vadd.f32 %v6684_v59, %v5661_v15  ;;  %v6687_v27 = vadd.f32 %v6686_v19, %v6685_v6  ;;  %v6708_v31 = vpop.f32.mrb[107].mxu1 }
0x15a3   :  { %v6709_v13 = vadd.f32 %v6708_v31, %v6707_v0 }
0x15a4   :  { %v5743_v60 = vadd.f32 %v6706_v8, %v5702_v48  ;;  %v5705_v40 = vadd.f32 %v6687_v27, %v5664_v53 }
0x15a6   :  { %v5746_v9 = vadd.f32 %v6709_v13, %v5705_v40  ;;  %v5749_v57 = vadd.f32 %v5743_v60, %v8946_v33 }
0x15a8   :  { %v5755_v28 = vsel %vm76_vm1, %v5749_v57, 0.0  ;;  %v5750_v41 = vadd.f32 %v5746_v9, %v8948_v24  ;;  %v5797_v24 = vld [vmem:[%s10143_s14] sm:$0xff] }
0x15a9   :  { %5756 = vadd.xlane.f32.xlu1 %v5755_v28  ;;  %v5803_v63 = vpack.c.bf16 %v5798_v2, %v5797_v24 }
0x15aa   :  { %v5758_v14 = vsel %vm76_vm1, %v5750_v41, 0.0 }
0x15ab   :  { %5759 = vadd.xlane.f32.xlu0 %v5758_v14  ;;  %6906 = vmatpush3.bf16.msra.mxu0 %v5803_v63 }
0x15ac   :  { %6907 = vmatprep.subr.bf16.mxu0 %v10171_v17  ;;  %v6279_v17 = vld [vmem:[%s10142_s13 + $0x1] ss:$0 sm:$0xff] }
0x15af   :  { %6908 = vmatpush3.bf16.msra.mxu0 %v5804_v21 }
0x1636   :  { %v5757_v62 = vpop.xlane.xlu1 %5756 }
0x1637   :  { %v5761_v1 = vmul.f32 0.03125, %v5757_v62 }
0x1638   :  { %v5760_v39 = vpop.xlane.xlu0 %5759 }
0x1639   :  { %v5763_v11 = vsub.f32 %v5749_v57, %v5761_v1  ;;  %v5762_v61 = vmul.f32 0.03125, %v5760_v39 }
0x163b   :  { %v5764_v20 = vsub.f32 %v5750_v41, %v5762_v61  ;;  %v5765_v35 = vmul.f32 %v5763_v11, %v5763_v11 }
0x163d   :  { %v5767_v56 = vsel %vm76_vm1, %v5765_v35, 0.0  ;;  %v5766_v45 = vmul.f32 %v5764_v20, %v5764_v20 }
0x163e   :  { %5768 = vadd.xlane.f32.xlu1 %v5767_v56 }
0x163f   :  { %v5770_v33 = vsel %vm76_vm1, %v5766_v45, 0.0 }
0x1640   :  { %5771 = vadd.xlane.f32.xlu0 %v5770_v33 }
0x16cb   :  { %v5769_v23 = vpop.xlane.xlu1 %5768 }
0x16cc   :  { %v5773_v58 = vmul.f32 0.03125, %v5769_v23 }
0x16cd   :  { %v5772_v46 = vpop.xlane.xlu0 %5771 }
0x16ce   :  { %v5775_v16 = vadd.f32 1e-05, %v5773_v58  ;;  %v5774_v7 = vmul.f32 0.03125, %v5772_v46 }
0x16d0   :  { %7036 = vrsqrt.f32 %v5775_v16  ;;  %v5776_v25 = vadd.f32 1e-05, %v5774_v7 }
0x16d2   :  { %7038 = vrsqrt.f32 %v5776_v25 }
0x16da   :  { %v7037_v55 = vpop.eup %7036 }
0x16db   :  { %v5779_v47 = vmul.f32 %v7037_v55, %v5763_v11 }
0x16dc   :  { %v7039_v26 = vpop.eup %7038 }
0x16dd   :  { %v5787_v42 = vmul.f32 %v6278_v30, %v5779_v47  ;;  %v5780_v44 = vmul.f32 %v7039_v26, %v5764_v20 }
0x16df   :  { %v5788_v22 = vmul.f32 %v6278_v30, %v5780_v44  ;;  %v5795_v52 = vadd.f32 %v6279_v17, %v5787_v42 }
0x16e1   :  { %v5796_v18 = vadd.f32 %v6279_v17, %v5788_v22 }
0x16e3   :  { %v5802_v36 = vpack.c.bf16 %v5796_v18, %v5795_v52 }
0x16e5   :  { %6910 = vmatmul.mubr.msk.bf16.vlgmr.msra.gmra.mrb[104].mxu0 %vm76_vm1, %v5802_v36 }
0x17b8   :  { %v5848_v43 = vpop.f32.mrb[104].mxu0 }
0x17b9   :  { %v5849_v4 = vadd.f32 %v6280_v34, %v5848_v43  ;;  %v6911_v3 = vpop.f32.mrb[105].mxu0 }
0x17ba   :  { %v5851_v49 = vpop.f32.mrb[106].mxu0 }
0x17bb   :  { %5855 = vst [vmem:[%s10145_s16] sm:$0xff] %v5849_v4  ;;  %v5852_v54 = vadd.f32 %v6280_v34, %v5851_v49  ;;  %v6912_v38 = vpop.f32.mrb[107].mxu0 }
0x17bd   :  { %5856 = vst [vmem:[%s10145_s16 + $0x8] sm:$0xff] %v5852_v54 }

</bundles_post_ra>
